<compile_context>
chip_gen: v7x
topology: tpu7x:2x2x1
jax: 0.10.0
libtpu: 0.0.40
codegen_flags: <defaults>
</compile_context>

<pallas_src>
import functools

import jax
import jax.numpy as jnp
from jax.experimental import pallas as pl
from jax.experimental.pallas import tpu as pltpu


# ------------------------------ config --------------------------------------

class GFConfig:
    feature_dim = 6          # fixed by the module (Linear(6, hidden))
    gf_hidden = 128          # synthetic Geneformer hidden size (lane-dense)
    num_heads = 4
    head_dim = 32
    intermediate = 256
    num_layers = 2
    max_positions = 256
    out_hidden = 128         # GeneformerEncoder(hidden_size=...) (small, lane-dense)
    chunk_size = 100         # same chunking (= attention window) as torch forward
    ln_eps = 1e-12


# ------------------------------ fused kernel --------------------------------

def _layernorm(x, g, b, eps):
    mu = jnp.mean(x, axis=-1, keepdims=True)
    var = jnp.mean((x - mu) * (x - mu), axis=-1, keepdims=True)
    return (x - mu) * jax.lax.rsqrt(var + eps) * g + b


def _gelu(x):
    # TODO(synk): Geneformer/BERT uses exact erf GELU; tanh approximation used here.
    return 0.5 * x * (1.0 + jnp.tanh(0.7978845608028654 * (x + 0.044715 * x * x * x)))


def _encoder_chunk_kernel(
    # scalar prefetch
    lens_ref,                                    # SMEM (num_chunks,) int32
    # per-chunk inputs
    gene_ref,                                    # (B, Lp, F)   f32
    postok_ref,                                  # (Lp, Hg)     f32  (pos + tok-type emb)
    # resident weights
    inproj_w_ref, inproj_b_ref, emb_g_ref, emb_b_ref,
    wqkv_ref, bqkv_ref, wo_ref, bo_ref, ln1g_ref, ln1b_ref,
    w1_ref, b1_ref, w2_ref, b2_ref, ln2g_ref, ln2b_ref,
    trw_ref, trb_ref,
    # output
    out_ref,                                     # (B, Lp, Hout) f32
    *, B, Lp, F, Hg, H, Dh, Hout, num_layers, eps):

    c = pl.program_id(0)
    valid = lens_ref[c]                          # valid rows in this chunk
    scale = 1.0 / float(Dh) ** 0.5
    bf16 = jnp.bfloat16

    # ---- input projection (F -> Hg) ----------------------------------------
    gene2 = gene_ref[...].reshape(B * Lp, F)
    h = jnp.dot(gene2.astype(bf16), inproj_w_ref[...],
                preferred_element_type=jnp.float32) + inproj_b_ref[...]

    # ---- BERT embeddings: + position + token-type, LayerNorm ----------------
    h = (h.reshape(B, Lp, Hg) + postok_ref[...][None]).reshape(B * Lp, Hg)
    h = _layernorm(h, emb_g_ref[...], emb_b_ref[...], eps)

    # key mask for the ragged chunk tail (padded rows are never valid keys)
    kidx = jax.lax.broadcasted_iota(jnp.int32, (1, Lp), 1)
    kmask = (kidx < valid)[None]                 # (1, 1, Lp)

    # ---- transformer layers (weights stacked on a leading layer axis) -------
    for l in range(num_layers):
        # fused QKV projection (single MXU pass, 3*Hg lane-dense output)
        qkv = jnp.dot(h.astype(bf16), wqkv_ref[l],
                      preferred_element_type=jnp.float32) + bqkv_ref[l]
        q = qkv[:, 0:Hg]
        k = qkv[:, Hg:2 * Hg]
        v = qkv[:, 2 * Hg:3 * Hg]

        ctx_heads = []
        for hh in range(H):
            sl = slice(hh * Dh, (hh + 1) * Dh)
            qh = q[:, sl].reshape(B, Lp, Dh).astype(bf16)
            kh = k[:, sl].reshape(B, Lp, Dh).astype(bf16)
            vh = v[:, sl].reshape(B, Lp, Dh).astype(bf16)
            s = jnp.einsum('bqd,bkd->bqk', qh, kh,
                           preferred_element_type=jnp.float32) * scale
            s = jnp.where(kmask, s, -1e30)
            s = s - jnp.max(s, axis=-1, keepdims=True)
            p = jnp.exp(s)
            p = p * pl.reciprocal(jnp.sum(p, axis=-1, keepdims=True), approx=True)
            ctx = jnp.einsum('bqk,bkd->bqd', p.astype(bf16), vh,
                             preferred_element_type=jnp.float32)
            ctx_heads.append(ctx.reshape(B * Lp, Dh))
        ctx_all = jnp.concatenate(ctx_heads, axis=-1)      # (B*Lp, Hg)

        attn_out = jnp.dot(ctx_all.astype(bf16), wo_ref[l],
                           preferred_element_type=jnp.float32) + bo_ref[l]
        h1 = _layernorm(attn_out + h, ln1g_ref[l], ln1b_ref[l], eps)

        ff = jnp.dot(h1.astype(bf16), w1_ref[l],
                     preferred_element_type=jnp.float32) + b1_ref[l]
        ff = _gelu(ff)
        ff = jnp.dot(ff.astype(bf16), w2_ref[l],
                     preferred_element_type=jnp.float32) + b2_ref[l]
        h = _layernorm(ff + h1, ln2g_ref[l], ln2b_ref[l], eps)

    # ---- final transform (Hg -> Hout) ---------------------------------------
    out = jnp.dot(h.astype(bf16), trw_ref[...],
                  preferred_element_type=jnp.float32) + trb_ref[...]
    out_ref[...] = out.reshape(B, Lp, Hout).astype(out_ref.dtype)


# ------------------------------ params ---------------------------------------

def init_params(key, cfg):
    def dense(k, shape, scale=0.02, dtype=jnp.bfloat16):
        return (scale * jax.random.normal(k, shape, dtype=jnp.float32)).astype(dtype)

    keys = iter(jax.random.split(key, 64))
    Hg, I, L = cfg.gf_hidden, cfg.intermediate, cfg.num_layers
    f32 = jnp.float32
    return {
        # matmul weights kept in bf16 (MXU operands); biases / LN / emb in f32
        "in_proj_w": dense(next(keys), (cfg.feature_dim, Hg)),
        "in_proj_b": jnp.zeros((1, Hg), f32),
        "pos_emb": dense(next(keys), (cfg.max_positions, Hg), dtype=f32),
        "tok_type_emb": dense(next(keys), (1, Hg), dtype=f32),
        "emb_ln_g": jnp.ones((1, Hg), f32),
        "emb_ln_b": jnp.zeros((1, Hg), f32),
        "wqkv": dense(next(keys), (L, Hg, 3 * Hg)),
        "bqkv": jnp.zeros((L, 1, 3 * Hg), f32),
        "wo": dense(next(keys), (L, Hg, Hg)),
        "bo": jnp.zeros((L, 1, Hg), f32),
        "ln1_g": jnp.ones((L, 1, Hg), f32),
        "ln1_b": jnp.zeros((L, 1, Hg), f32),
        "w1": dense(next(keys), (L, Hg, I)),
        "b1": jnp.zeros((L, 1, I), f32),
        "w2": dense(next(keys), (L, I, Hg)),
        "b2": jnp.zeros((L, 1, Hg), f32),
        "ln2_g": jnp.ones((L, 1, Hg), f32),
        "ln2_b": jnp.zeros((L, 1, Hg), f32),
        "transform_w": dense(next(keys), (Hg, cfg.out_hidden)),
        "transform_b": jnp.zeros((1, cfg.out_hidden), f32),
    }


# ------------------------------ forward ---------------------------------------

def geneformer_encoder_forward(gene_data, params, cfg):
    B, S, F = gene_data.shape
    Hg, Hout = cfg.gf_hidden, cfg.out_hidden
    nC = -(-S // cfg.chunk_size)                            # number of chunks
    Lp = ((min(cfg.chunk_size, S) + 7) // 8) * 8            # sublane-aligned chunk block

    # per-chunk valid lengths + padded-row gather indices (clamped to chunk end)
    lens, row_idx, out_idx = [], [], []
    for c in range(nC):
        s0 = c * cfg.chunk_size
        e0 = min(s0 + cfg.chunk_size, S)
        lens.append(e0 - s0)
        row_idx.extend(min(s0 + r, e0 - 1) for r in range(Lp))
    for s in range(S):
        c = s // cfg.chunk_size
        out_idx.append(c * Lp + (s - c * cfg.chunk_size))
    lens = jnp.asarray(lens, jnp.int32)
    row_idx = jnp.asarray(row_idx, jnp.int32)
    out_idx = jnp.asarray(out_idx, jnp.int32)

    gene_padded = jnp.take(gene_data, row_idx, axis=1)                  # (B, nC*Lp, F)
    # absolute positions (matches torch: position_ids = arange(S) sliced per chunk)
    pos_tok = params["pos_emb"][row_idx] + params["tok_type_emb"]       # (nC*Lp, Hg)

    weights = (params["in_proj_w"], params["in_proj_b"],
               params["emb_ln_g"], params["emb_ln_b"],
               params["wqkv"], params["bqkv"], params["wo"], params["bo"],
               params["ln1_g"], params["ln1_b"],
               params["w1"], params["b1"], params["w2"], params["b2"],
               params["ln2_g"], params["ln2_b"],
               params["transform_w"], params["transform_b"])

    def const_spec(w):
        nd = w.ndim
        return pl.BlockSpec(w.shape, lambda c, lens, _nd=nd: (0,) * _nd)

    grid_spec = pltpu.PrefetchScalarGridSpec(
        num_scalar_prefetch=1,
        grid=(nC,),
        in_specs=[pl.BlockSpec((B, Lp, F), lambda c, lens: (0, c, 0)),
                  pl.BlockSpec((Lp, Hg), lambda c, lens: (c, 0))]
                 + [const_spec(w) for w in weights],
        out_specs=pl.BlockSpec((B, Lp, Hout), lambda c, lens: (0, c, 0)),
    )

    kernel = functools.partial(
        _encoder_chunk_kernel,
        B=B, Lp=Lp, F=F, Hg=Hg, H=cfg.num_heads, Dh=cfg.head_dim,
        Hout=Hout, num_layers=cfg.num_layers, eps=cfg.ln_eps)

    out_padded = pl.pallas_call(
        kernel,
        out_shape=jax.ShapeDtypeStruct((B, nC * Lp, Hout), jnp.float32),
        grid_spec=grid_spec,
        compiler_params=pltpu.CompilerParams(
            dimension_semantics=("parallel",)),
    )(lens, gene_padded, pos_tok, *weights)

    # drop padded rows, restore original sequence layout
    return jnp.take(out_padded, out_idx, axis=1)


if __name__ == "__main__":
    cfg = GFConfig()
    key = jax.random.PRNGKey(0)
    k_in, k_par = jax.random.split(key)

    B, S = 2, 8
    gene_data = jax.random.normal(k_in, (B, S, cfg.feature_dim), dtype=jnp.float32)
    params = init_params(k_par, cfg)

    fwd = jax.jit(functools.partial(geneformer_encoder_forward, cfg=cfg))
    out = fwd(gene_data, params)
    out = jax.block_until_ready(out)
    assert out.shape == (B, S, cfg.out_hidden), out.shape
    assert bool(jnp.all(jnp.isfinite(out)))
    print("KERNEL_OK")
</pallas_src>

<mosaic_0001>
module attributes {stable_mosaic.version = 11 : i64} {
  func.func @_encoder_chunk_kernel(%arg0: i32, %arg1: memref<1xi32, #tpu.memory_space<smem>>, %arg2: memref<2x8x6xf32, #tpu.memory_space<vmem>>, %arg3: memref<8x128xf32, #tpu.memory_space<vmem>>, %arg4: memref<6x128xbf16, #tpu.memory_space<vmem>>, %arg5: memref<1x128xf32, #tpu.memory_space<vmem>>, %arg6: memref<1x128xf32, #tpu.memory_space<vmem>>, %arg7: memref<1x128xf32, #tpu.memory_space<vmem>>, %arg8: memref<2x128x384xbf16, #tpu.memory_space<vmem>>, %arg9: memref<2x1x384xf32, #tpu.memory_space<vmem>>, %arg10: memref<2x128x128xbf16, #tpu.memory_space<vmem>>, %arg11: memref<2x1x128xf32, #tpu.memory_space<vmem>>, %arg12: memref<2x1x128xf32, #tpu.memory_space<vmem>>, %arg13: memref<2x1x128xf32, #tpu.memory_space<vmem>>, %arg14: memref<2x128x256xbf16, #tpu.memory_space<vmem>>, %arg15: memref<2x1x256xf32, #tpu.memory_space<vmem>>, %arg16: memref<2x256x128xbf16, #tpu.memory_space<vmem>>, %arg17: memref<2x1x128xf32, #tpu.memory_space<vmem>>, %arg18: memref<2x1x128xf32, #tpu.memory_space<vmem>>, %arg19: memref<2x1x128xf32, #tpu.memory_space<vmem>>, %arg20: memref<128x128xbf16, #tpu.memory_space<vmem>>, %arg21: memref<1x128xf32, #tpu.memory_space<vmem>>, %arg22: memref<2x8x128xf32, #tpu.memory_space<vmem>>) attributes {dimension_semantics = [#tpu.dimension_semantics<parallel>], iteration_bounds = array<i64: 1>, scalar_prefetch = 1 : i64, scratch_operands = 0 : i64, tpu.core_type = #tpu.core_type<tc>, window_params = [{transform_indices = @transform_0, window_bounds = array<i64: 2, 8, 6>}, {transform_indices = @transform_1, window_bounds = array<i64: 8, 128>}, {pipeline_mode = #tpu.pipeline_mode<synchronous>, transform_indices = @transform_2, window_bounds = array<i64: 6, 128>}, {pipeline_mode = #tpu.pipeline_mode<synchronous>, transform_indices = @transform_3, window_bounds = array<i64: 1, 128>}, {pipeline_mode = #tpu.pipeline_mode<synchronous>, transform_indices = @transform_4, window_bounds = array<i64: 1, 128>}, {pipeline_mode = #tpu.pipeline_mode<synchronous>, transform_indices = @transform_5, window_bounds = array<i64: 1, 128>}, {pipeline_mode = #tpu.pipeline_mode<synchronous>, transform_indices = @transform_6, window_bounds = array<i64: 2, 128, 384>}, {pipeline_mode = #tpu.pipeline_mode<synchronous>, transform_indices = @transform_7, window_bounds = array<i64: 2, 1, 384>}, {pipeline_mode = #tpu.pipeline_mode<synchronous>, transform_indices = @transform_8, window_bounds = array<i64: 2, 128, 128>}, {pipeline_mode = #tpu.pipeline_mode<synchronous>, transform_indices = @transform_9, window_bounds = array<i64: 2, 1, 128>}, {pipeline_mode = #tpu.pipeline_mode<synchronous>, transform_indices = @transform_10, window_bounds = array<i64: 2, 1, 128>}, {pipeline_mode = #tpu.pipeline_mode<synchronous>, transform_indices = @transform_11, window_bounds = array<i64: 2, 1, 128>}, {pipeline_mode = #tpu.pipeline_mode<synchronous>, transform_indices = @transform_12, window_bounds = array<i64: 2, 128, 256>}, {pipeline_mode = #tpu.pipeline_mode<synchronous>, transform_indices = @transform_13, window_bounds = array<i64: 2, 1, 256>}, {pipeline_mode = #tpu.pipeline_mode<synchronous>, transform_indices = @transform_14, window_bounds = array<i64: 2, 256, 128>}, {pipeline_mode = #tpu.pipeline_mode<synchronous>, transform_indices = @transform_15, window_bounds = array<i64: 2, 1, 128>}, {pipeline_mode = #tpu.pipeline_mode<synchronous>, transform_indices = @transform_16, window_bounds = array<i64: 2, 1, 128>}, {pipeline_mode = #tpu.pipeline_mode<synchronous>, transform_indices = @transform_17, window_bounds = array<i64: 2, 1, 128>}, {pipeline_mode = #tpu.pipeline_mode<synchronous>, transform_indices = @transform_18, window_bounds = array<i64: 128, 128>}, {pipeline_mode = #tpu.pipeline_mode<synchronous>, transform_indices = @transform_19, window_bounds = array<i64: 1, 128>}, {transform_indices = @transform_20, window_bounds = array<i64: 2, 8, 128>}]} {
    %0 = arith.index_cast %arg0 : i32 to index
    %1 = memref.load %arg1[%0] : memref<1xi32, #tpu.memory_space<smem>>
    %c0 = arith.constant 0 : index
    %c0_0 = arith.constant 0 : index
    %c0_1 = arith.constant 0 : index
    %2 = vector.load %arg2[%c0, %c0_0, %c0_1] : memref<2x8x6xf32, #tpu.memory_space<vmem>>, vector<2x8x6xf32>
    %3 = vector.shape_cast %2 : vector<2x8x6xf32> to vector<16x6xf32>
    %4 = arith.truncf %3 : vector<16x6xf32> to vector<16x6xbf16>
    %c0_2 = arith.constant 0 : index
    %c0_3 = arith.constant 0 : index
    %5 = vector.load %arg4[%c0_2, %c0_3] : memref<6x128xbf16, #tpu.memory_space<vmem>>, vector<6x128xbf16>
    %cst = arith.constant dense<0.000000e+00> : vector<16x128xf32>
    %6 = tpu.matmul %4, %5, %cst {dimension_numbers = #tpu.dot_dimension_numbers<[1], [0], [0], [1], [0, 0, 1, 1], [], []>} : vector<16x6xbf16>, vector<6x128xbf16>, vector<16x128xf32> -> vector<16x128xf32>
    %c0_4 = arith.constant 0 : index
    %c0_5 = arith.constant 0 : index
    %7 = vector.load %arg5[%c0_4, %c0_5] : memref<1x128xf32, #tpu.memory_space<vmem>>, vector<1x128xf32>
    %8 = vector.broadcast %7 : vector<1x128xf32> to vector<16x128xf32>
    %9 = arith.addf %6, %8 : vector<16x128xf32>
    %10 = vector.shape_cast %9 : vector<16x128xf32> to vector<2x8x128xf32>
    %c0_6 = arith.constant 0 : index
    %c0_7 = arith.constant 0 : index
    %11 = vector.load %arg3[%c0_6, %c0_7] : memref<8x128xf32, #tpu.memory_space<vmem>>, vector<8x128xf32>
    %12 = vector.shape_cast %11 : vector<8x128xf32> to vector<1x8x128xf32>
    %13 = vector.broadcast %12 : vector<1x8x128xf32> to vector<2x8x128xf32>
    %14 = arith.addf %10, %13 : vector<2x8x128xf32>
    %15 = vector.shape_cast %14 : vector<2x8x128xf32> to vector<16x128xf32>
    %c0_8 = arith.constant 0 : index
    %c0_9 = arith.constant 0 : index
    %16 = vector.load %arg6[%c0_8, %c0_9] : memref<1x128xf32, #tpu.memory_space<vmem>>, vector<1x128xf32>
    %c0_10 = arith.constant 0 : index
    %c0_11 = arith.constant 0 : index
    %17 = vector.load %arg7[%c0_10, %c0_11] : memref<1x128xf32, #tpu.memory_space<vmem>>, vector<1x128xf32>
    %cst_12 = arith.constant dense<0.000000e+00> : vector<16xf32>
    %18 = vector.multi_reduction <add>, %15, %cst_12 [1] : vector<16x128xf32> to vector<16xf32>
    %19 = vector.shape_cast %18 : vector<16xf32> to vector<16x1xf32>
    %cst_13 = arith.constant 1.280000e+02 : f32
    %20 = vector.broadcast %cst_13 : f32 to vector<16x1xf32>
    %21 = arith.divf %19, %20 : vector<16x1xf32>
    %22 = vector.broadcast %21 : vector<16x1xf32> to vector<16x128xf32>
    %23 = arith.subf %15, %22 : vector<16x128xf32>
    %24 = vector.broadcast %21 : vector<16x1xf32> to vector<16x128xf32>
    %25 = arith.subf %15, %24 : vector<16x128xf32>
    %26 = arith.mulf %23, %25 : vector<16x128xf32>
    %cst_14 = arith.constant dense<0.000000e+00> : vector<16xf32>
    %27 = vector.multi_reduction <add>, %26, %cst_14 [1] : vector<16x128xf32> to vector<16xf32>
    %28 = vector.shape_cast %27 : vector<16xf32> to vector<16x1xf32>
    %cst_15 = arith.constant 1.280000e+02 : f32
    %29 = vector.broadcast %cst_15 : f32 to vector<16x1xf32>
    %30 = arith.divf %28, %29 : vector<16x1xf32>
    %31 = vector.broadcast %21 : vector<16x1xf32> to vector<16x128xf32>
    %32 = arith.subf %15, %31 : vector<16x128xf32>
    %cst_16 = arith.constant 9.99999996E-13 : f32
    %33 = vector.broadcast %cst_16 : f32 to vector<16x1xf32>
    %34 = arith.addf %30, %33 : vector<16x1xf32>
    %35 = math.rsqrt %34 : vector<16x1xf32>
    %36 = vector.broadcast %35 : vector<16x1xf32> to vector<16x128xf32>
    %37 = arith.mulf %32, %36 : vector<16x128xf32>
    %38 = vector.broadcast %16 : vector<1x128xf32> to vector<16x128xf32>
    %39 = arith.mulf %37, %38 : vector<16x128xf32>
    %40 = vector.broadcast %17 : vector<1x128xf32> to vector<16x128xf32>
    %41 = arith.addf %39, %40 : vector<16x128xf32>
    %42 = tpu.iota {dimensions = array<i32: 1>} : vector<1x8xi32>
    %43 = vector.broadcast %1 : i32 to vector<1x8xi32>
    %44 = arith.cmpi slt, %42, %43 : vector<1x8xi32>
    %45 = vector.shape_cast %44 : vector<1x8xi1> to vector<1x1x8xi1>
    %46 = arith.truncf %41 : vector<16x128xf32> to vector<16x128xbf16>
    %c0_17 = arith.constant 0 : index
    %c0_18 = arith.constant 0 : index
    %c0_19 = arith.constant 0 : index
    %47 = vector.load %arg8[%c0_17, %c0_18, %c0_19] : memref<2x128x384xbf16, #tpu.memory_space<vmem>>, vector<1x128x384xbf16>
    %48 = vector.shape_cast %47 : vector<1x128x384xbf16> to vector<128x384xbf16>
    %cst_20 = arith.constant dense<0.000000e+00> : vector<16x384xf32>
    %49 = tpu.matmul %46, %48, %cst_20 {dimension_numbers = #tpu.dot_dimension_numbers<[1], [0], [0], [1], [0, 0, 1, 1], [], []>} : vector<16x128xbf16>, vector<128x384xbf16>, vector<16x384xf32> -> vector<16x384xf32>
    %c0_21 = arith.constant 0 : index
    %c0_22 = arith.constant 0 : index
    %c0_23 = arith.constant 0 : index
    %50 = vector.load %arg9[%c0_21, %c0_22, %c0_23] : memref<2x1x384xf32, #tpu.memory_space<vmem>>, vector<1x1x384xf32>
    %51 = vector.shape_cast %50 : vector<1x1x384xf32> to vector<1x384xf32>
    %52 = vector.broadcast %51 : vector<1x384xf32> to vector<16x384xf32>
    %53 = arith.addf %49, %52 : vector<16x384xf32>
    %54 = vector.extract_strided_slice %53 {offsets = [0, 0], sizes = [16, 128], strides = [1, 1]} : vector<16x384xf32> to vector<16x128xf32>
    %55 = vector.extract_strided_slice %53 {offsets = [0, 128], sizes = [16, 128], strides = [1, 1]} : vector<16x384xf32> to vector<16x128xf32>
    %56 = vector.extract_strided_slice %53 {offsets = [0, 256], sizes = [16, 128], strides = [1, 1]} : vector<16x384xf32> to vector<16x128xf32>
    %57 = vector.extract_strided_slice %54 {offsets = [0, 0], sizes = [16, 32], strides = [1, 1]} : vector<16x128xf32> to vector<16x32xf32>
    %58 = vector.shape_cast %57 : vector<16x32xf32> to vector<2x8x32xf32>
    %59 = arith.truncf %58 : vector<2x8x32xf32> to vector<2x8x32xbf16>
    %60 = vector.extract_strided_slice %55 {offsets = [0, 0], sizes = [16, 32], strides = [1, 1]} : vector<16x128xf32> to vector<16x32xf32>
    %61 = vector.shape_cast %60 : vector<16x32xf32> to vector<2x8x32xf32>
    %62 = arith.truncf %61 : vector<2x8x32xf32> to vector<2x8x32xbf16>
    %63 = vector.extract_strided_slice %56 {offsets = [0, 0], sizes = [16, 32], strides = [1, 1]} : vector<16x128xf32> to vector<16x32xf32>
    %64 = vector.shape_cast %63 : vector<16x32xf32> to vector<2x8x32xf32>
    %65 = arith.truncf %64 : vector<2x8x32xf32> to vector<2x8x32xbf16>
    "tpu.trace_start"() <{level = 10 : i32, message = "bqd,bkd->bqk"}> : () -> ()
    %cst_24 = arith.constant dense<0.000000e+00> : vector<2x8x8xf32>
    %66 = tpu.matmul %59, %62, %cst_24 {dimension_numbers = #tpu.dot_dimension_numbers<[2], [2], [1], [1], [0, 0, 0, 1, 1, 1], [0], [0]>} : vector<2x8x32xbf16>, vector<2x8x32xbf16>, vector<2x8x8xf32> -> vector<2x8x8xf32>
    "tpu.trace_stop"() : () -> ()
    %cst_25 = arith.constant 0.176776692 : f32
    %67 = vector.broadcast %cst_25 : f32 to vector<2x8x8xf32>
    %68 = arith.mulf %66, %67 : vector<2x8x8xf32>
    %cst_26 = arith.constant -1.000000e+30 : f32
    %69 = vector.shape_cast %45 : vector<1x1x8xi1> to vector<1x1x8xi1>
    %70 = vector.broadcast %69 : vector<1x1x8xi1> to vector<2x8x8xi1>
    %71 = vector.broadcast %cst_26 : f32 to vector<2x8x8xf32>
    %72 = arith.select %70, %68, %71 : vector<2x8x8xi1>, vector<2x8x8xf32>
    %cst_27 = arith.constant dense<0xFF800000> : vector<2x8xf32>
    %73 = vector.multi_reduction <maximumf>, %72, %cst_27 [2] : vector<2x8x8xf32> to vector<2x8xf32>
    %74 = vector.shape_cast %73 : vector<2x8xf32> to vector<2x8x1xf32>
    %75 = vector.broadcast %74 : vector<2x8x1xf32> to vector<2x8x8xf32>
    %76 = arith.subf %72, %75 : vector<2x8x8xf32>
    %77 = math.exp %76 : vector<2x8x8xf32>
    %cst_28 = arith.constant dense<0.000000e+00> : vector<2x8xf32>
    %78 = vector.multi_reduction <add>, %77, %cst_28 [2] : vector<2x8x8xf32> to vector<2x8xf32>
    %79 = vector.shape_cast %78 : vector<2x8xf32> to vector<2x8x1xf32>
    %80 = tpu.reciprocal %79 {approx = true} : vector<2x8x1xf32> -> vector<2x8x1xf32>
    %81 = vector.broadcast %80 : vector<2x8x1xf32> to vector<2x8x8xf32>
    %82 = arith.mulf %77, %81 : vector<2x8x8xf32>
    %83 = arith.truncf %82 : vector<2x8x8xf32> to vector<2x8x8xbf16>
    "tpu.trace_start"() <{level = 10 : i32, message = "bqk,bkd->bqd"}> : () -> ()
    %cst_29 = arith.constant dense<0.000000e+00> : vector<2x8x32xf32>
    %84 = tpu.matmul %83, %65, %cst_29 {dimension_numbers = #tpu.dot_dimension_numbers<[2], [1], [1], [2], [0, 0, 0, 1, 1, 2], [0], [0]>} : vector<2x8x8xbf16>, vector<2x8x32xbf16>, vector<2x8x32xf32> -> vector<2x8x32xf32>
    "tpu.trace_stop"() : () -> ()
    %85 = vector.shape_cast %84 : vector<2x8x32xf32> to vector<16x32xf32>
    %86 = vector.extract_strided_slice %54 {offsets = [0, 32], sizes = [16, 32], strides = [1, 1]} : vector<16x128xf32> to vector<16x32xf32>
    %87 = vector.shape_cast %86 : vector<16x32xf32> to vector<2x8x32xf32>
    %88 = arith.truncf %87 : vector<2x8x32xf32> to vector<2x8x32xbf16>
    %89 = vector.extract_strided_slice %55 {offsets = [0, 32], sizes = [16, 32], strides = [1, 1]} : vector<16x128xf32> to vector<16x32xf32>
    %90 = vector.shape_cast %89 : vector<16x32xf32> to vector<2x8x32xf32>
    %91 = arith.truncf %90 : vector<2x8x32xf32> to vector<2x8x32xbf16>
    %92 = vector.extract_strided_slice %56 {offsets = [0, 32], sizes = [16, 32], strides = [1, 1]} : vector<16x128xf32> to vector<16x32xf32>
    %93 = vector.shape_cast %92 : vector<16x32xf32> to vector<2x8x32xf32>
    %94 = arith.truncf %93 : vector<2x8x32xf32> to vector<2x8x32xbf16>
    "tpu.trace_start"() <{level = 10 : i32, message = "bqd,bkd->bqk"}> : () -> ()
    %cst_30 = arith.constant dense<0.000000e+00> : vector<2x8x8xf32>
    %95 = tpu.matmul %88, %91, %cst_30 {dimension_numbers = #tpu.dot_dimension_numbers<[2], [2], [1], [1], [0, 0, 0, 1, 1, 1], [0], [0]>} : vector<2x8x32xbf16>, vector<2x8x32xbf16>, vector<2x8x8xf32> -> vector<2x8x8xf32>
    "tpu.trace_stop"() : () -> ()
    %cst_31 = arith.constant 0.176776692 : f32
    %96 = vector.broadcast %cst_31 : f32 to vector<2x8x8xf32>
    %97 = arith.mulf %95, %96 : vector<2x8x8xf32>
    %cst_32 = arith.constant -1.000000e+30 : f32
    %98 = vector.shape_cast %45 : vector<1x1x8xi1> to vector<1x1x8xi1>
    %99 = vector.broadcast %98 : vector<1x1x8xi1> to vector<2x8x8xi1>
    %100 = vector.broadcast %cst_32 : f32 to vector<2x8x8xf32>
    %101 = arith.select %99, %97, %100 : vector<2x8x8xi1>, vector<2x8x8xf32>
    %cst_33 = arith.constant dense<0xFF800000> : vector<2x8xf32>
    %102 = vector.multi_reduction <maximumf>, %101, %cst_33 [2] : vector<2x8x8xf32> to vector<2x8xf32>
    %103 = vector.shape_cast %102 : vector<2x8xf32> to vector<2x8x1xf32>
    %104 = vector.broadcast %103 : vector<2x8x1xf32> to vector<2x8x8xf32>
    %105 = arith.subf %101, %104 : vector<2x8x8xf32>
    %106 = math.exp %105 : vector<2x8x8xf32>
    %cst_34 = arith.constant dense<0.000000e+00> : vector<2x8xf32>
    %107 = vector.multi_reduction <add>, %106, %cst_34 [2] : vector<2x8x8xf32> to vector<2x8xf32>
    %108 = vector.shape_cast %107 : vector<2x8xf32> to vector<2x8x1xf32>
    %109 = tpu.reciprocal %108 {approx = true} : vector<2x8x1xf32> -> vector<2x8x1xf32>
    %110 = vector.broadcast %109 : vector<2x8x1xf32> to vector<2x8x8xf32>
    %111 = arith.mulf %106, %110 : vector<2x8x8xf32>
    %112 = arith.truncf %111 : vector<2x8x8xf32> to vector<2x8x8xbf16>
    "tpu.trace_start"() <{level = 10 : i32, message = "bqk,bkd->bqd"}> : () -> ()
    %cst_35 = arith.constant dense<0.000000e+00> : vector<2x8x32xf32>
    %113 = tpu.matmul %112, %94, %cst_35 {dimension_numbers = #tpu.dot_dimension_numbers<[2], [1], [1], [2], [0, 0, 0, 1, 1, 2], [0], [0]>} : vector<2x8x8xbf16>, vector<2x8x32xbf16>, vector<2x8x32xf32> -> vector<2x8x32xf32>
    "tpu.trace_stop"() : () -> ()
    %114 = vector.shape_cast %113 : vector<2x8x32xf32> to vector<16x32xf32>
    %115 = vector.extract_strided_slice %54 {offsets = [0, 64], sizes = [16, 32], strides = [1, 1]} : vector<16x128xf32> to vector<16x32xf32>
    %116 = vector.shape_cast %115 : vector<16x32xf32> to vector<2x8x32xf32>
    %117 = arith.truncf %116 : vector<2x8x32xf32> to vector<2x8x32xbf16>
    %118 = vector.extract_strided_slice %55 {offsets = [0, 64], sizes = [16, 32], strides = [1, 1]} : vector<16x128xf32> to vector<16x32xf32>
    %119 = vector.shape_cast %118 : vector<16x32xf32> to vector<2x8x32xf32>
    %120 = arith.truncf %119 : vector<2x8x32xf32> to vector<2x8x32xbf16>
    %121 = vector.extract_strided_slice %56 {offsets = [0, 64], sizes = [16, 32], strides = [1, 1]} : vector<16x128xf32> to vector<16x32xf32>
    %122 = vector.shape_cast %121 : vector<16x32xf32> to vector<2x8x32xf32>
    %123 = arith.truncf %122 : vector<2x8x32xf32> to vector<2x8x32xbf16>
    "tpu.trace_start"() <{level = 10 : i32, message = "bqd,bkd->bqk"}> : () -> ()
    %cst_36 = arith.constant dense<0.000000e+00> : vector<2x8x8xf32>
    %124 = tpu.matmul %117, %120, %cst_36 {dimension_numbers = #tpu.dot_dimension_numbers<[2], [2], [1], [1], [0, 0, 0, 1, 1, 1], [0], [0]>} : vector<2x8x32xbf16>, vector<2x8x32xbf16>, vector<2x8x8xf32> -> vector<2x8x8xf32>
    "tpu.trace_stop"() : () -> ()
    %cst_37 = arith.constant 0.176776692 : f32
    %125 = vector.broadcast %cst_37 : f32 to vector<2x8x8xf32>
    %126 = arith.mulf %124, %125 : vector<2x8x8xf32>
    %cst_38 = arith.constant -1.000000e+30 : f32
    %127 = vector.shape_cast %45 : vector<1x1x8xi1> to vector<1x1x8xi1>
    %128 = vector.broadcast %127 : vector<1x1x8xi1> to vector<2x8x8xi1>
    %129 = vector.broadcast %cst_38 : f32 to vector<2x8x8xf32>
    %130 = arith.select %128, %126, %129 : vector<2x8x8xi1>, vector<2x8x8xf32>
    %cst_39 = arith.constant dense<0xFF800000> : vector<2x8xf32>
    %131 = vector.multi_reduction <maximumf>, %130, %cst_39 [2] : vector<2x8x8xf32> to vector<2x8xf32>
    %132 = vector.shape_cast %131 : vector<2x8xf32> to vector<2x8x1xf32>
    %133 = vector.broadcast %132 : vector<2x8x1xf32> to vector<2x8x8xf32>
    %134 = arith.subf %130, %133 : vector<2x8x8xf32>
    %135 = math.exp %134 : vector<2x8x8xf32>
    %cst_40 = arith.constant dense<0.000000e+00> : vector<2x8xf32>
    %136 = vector.multi_reduction <add>, %135, %cst_40 [2] : vector<2x8x8xf32> to vector<2x8xf32>
    %137 = vector.shape_cast %136 : vector<2x8xf32> to vector<2x8x1xf32>
    %138 = tpu.reciprocal %137 {approx = true} : vector<2x8x1xf32> -> vector<2x8x1xf32>
    %139 = vector.broadcast %138 : vector<2x8x1xf32> to vector<2x8x8xf32>
    %140 = arith.mulf %135, %139 : vector<2x8x8xf32>
    %141 = arith.truncf %140 : vector<2x8x8xf32> to vector<2x8x8xbf16>
    "tpu.trace_start"() <{level = 10 : i32, message = "bqk,bkd->bqd"}> : () -> ()
    %cst_41 = arith.constant dense<0.000000e+00> : vector<2x8x32xf32>
    %142 = tpu.matmul %141, %123, %cst_41 {dimension_numbers = #tpu.dot_dimension_numbers<[2], [1], [1], [2], [0, 0, 0, 1, 1, 2], [0], [0]>} : vector<2x8x8xbf16>, vector<2x8x32xbf16>, vector<2x8x32xf32> -> vector<2x8x32xf32>
    "tpu.trace_stop"() : () -> ()
    %143 = vector.shape_cast %142 : vector<2x8x32xf32> to vector<16x32xf32>
    %144 = vector.extract_strided_slice %54 {offsets = [0, 96], sizes = [16, 32], strides = [1, 1]} : vector<16x128xf32> to vector<16x32xf32>
    %145 = vector.shape_cast %144 : vector<16x32xf32> to vector<2x8x32xf32>
    %146 = arith.truncf %145 : vector<2x8x32xf32> to vector<2x8x32xbf16>
    %147 = vector.extract_strided_slice %55 {offsets = [0, 96], sizes = [16, 32], strides = [1, 1]} : vector<16x128xf32> to vector<16x32xf32>
    %148 = vector.shape_cast %147 : vector<16x32xf32> to vector<2x8x32xf32>
    %149 = arith.truncf %148 : vector<2x8x32xf32> to vector<2x8x32xbf16>
    %150 = vector.extract_strided_slice %56 {offsets = [0, 96], sizes = [16, 32], strides = [1, 1]} : vector<16x128xf32> to vector<16x32xf32>
    %151 = vector.shape_cast %150 : vector<16x32xf32> to vector<2x8x32xf32>
    %152 = arith.truncf %151 : vector<2x8x32xf32> to vector<2x8x32xbf16>
    "tpu.trace_start"() <{level = 10 : i32, message = "bqd,bkd->bqk"}> : () -> ()
    %cst_42 = arith.constant dense<0.000000e+00> : vector<2x8x8xf32>
    %153 = tpu.matmul %146, %149, %cst_42 {dimension_numbers = #tpu.dot_dimension_numbers<[2], [2], [1], [1], [0, 0, 0, 1, 1, 1], [0], [0]>} : vector<2x8x32xbf16>, vector<2x8x32xbf16>, vector<2x8x8xf32> -> vector<2x8x8xf32>
    "tpu.trace_stop"() : () -> ()
    %cst_43 = arith.constant 0.176776692 : f32
    %154 = vector.broadcast %cst_43 : f32 to vector<2x8x8xf32>
    %155 = arith.mulf %153, %154 : vector<2x8x8xf32>
    %cst_44 = arith.constant -1.000000e+30 : f32
    %156 = vector.shape_cast %45 : vector<1x1x8xi1> to vector<1x1x8xi1>
    %157 = vector.broadcast %156 : vector<1x1x8xi1> to vector<2x8x8xi1>
    %158 = vector.broadcast %cst_44 : f32 to vector<2x8x8xf32>
    %159 = arith.select %157, %155, %158 : vector<2x8x8xi1>, vector<2x8x8xf32>
    %cst_45 = arith.constant dense<0xFF800000> : vector<2x8xf32>
    %160 = vector.multi_reduction <maximumf>, %159, %cst_45 [2] : vector<2x8x8xf32> to vector<2x8xf32>
    %161 = vector.shape_cast %160 : vector<2x8xf32> to vector<2x8x1xf32>
    %162 = vector.broadcast %161 : vector<2x8x1xf32> to vector<2x8x8xf32>
    %163 = arith.subf %159, %162 : vector<2x8x8xf32>
    %164 = math.exp %163 : vector<2x8x8xf32>
    %cst_46 = arith.constant dense<0.000000e+00> : vector<2x8xf32>
    %165 = vector.multi_reduction <add>, %164, %cst_46 [2] : vector<2x8x8xf32> to vector<2x8xf32>
    %166 = vector.shape_cast %165 : vector<2x8xf32> to vector<2x8x1xf32>
    %167 = tpu.reciprocal %166 {approx = true} : vector<2x8x1xf32> -> vector<2x8x1xf32>
    %168 = vector.broadcast %167 : vector<2x8x1xf32> to vector<2x8x8xf32>
    %169 = arith.mulf %164, %168 : vector<2x8x8xf32>
    %170 = arith.truncf %169 : vector<2x8x8xf32> to vector<2x8x8xbf16>
    "tpu.trace_start"() <{level = 10 : i32, message = "bqk,bkd->bqd"}> : () -> ()
    %cst_47 = arith.constant dense<0.000000e+00> : vector<2x8x32xf32>
    %171 = tpu.matmul %170, %152, %cst_47 {dimension_numbers = #tpu.dot_dimension_numbers<[2], [1], [1], [2], [0, 0, 0, 1, 1, 2], [0], [0]>} : vector<2x8x8xbf16>, vector<2x8x32xbf16>, vector<2x8x32xf32> -> vector<2x8x32xf32>
    "tpu.trace_stop"() : () -> ()
    %172 = vector.shape_cast %171 : vector<2x8x32xf32> to vector<16x32xf32>
    %173 = tpu.concatenate %85, %114, %143, %172 in 1 : vector<16x32xf32>, vector<16x32xf32>, vector<16x32xf32>, vector<16x32xf32> -> vector<16x128xf32>
    %174 = arith.truncf %173 : vector<16x128xf32> to vector<16x128xbf16>
    %c0_48 = arith.constant 0 : index
    %c0_49 = arith.constant 0 : index
    %c0_50 = arith.constant 0 : index
    %175 = vector.load %arg10[%c0_48, %c0_49, %c0_50] : memref<2x128x128xbf16, #tpu.memory_space<vmem>>, vector<1x128x128xbf16>
    %176 = vector.shape_cast %175 : vector<1x128x128xbf16> to vector<128x128xbf16>
    %cst_51 = arith.constant dense<0.000000e+00> : vector<16x128xf32>
    %177 = tpu.matmul %174, %176, %cst_51 {dimension_numbers = #tpu.dot_dimension_numbers<[1], [0], [0], [1], [0, 0, 1, 1], [], []>} : vector<16x128xbf16>, vector<128x128xbf16>, vector<16x128xf32> -> vector<16x128xf32>
    %c0_52 = arith.constant 0 : index
    %c0_53 = arith.constant 0 : index
    %c0_54 = arith.constant 0 : index
    %178 = vector.load %arg11[%c0_52, %c0_53, %c0_54] : memref<2x1x128xf32, #tpu.memory_space<vmem>>, vector<1x1x128xf32>
    %179 = vector.shape_cast %178 : vector<1x1x128xf32> to vector<1x128xf32>
    %180 = vector.broadcast %179 : vector<1x128xf32> to vector<16x128xf32>
    %181 = arith.addf %177, %180 : vector<16x128xf32>
    %182 = arith.addf %181, %41 : vector<16x128xf32>
    %c0_55 = arith.constant 0 : index
    %c0_56 = arith.constant 0 : index
    %c0_57 = arith.constant 0 : index
    %183 = vector.load %arg12[%c0_55, %c0_56, %c0_57] : memref<2x1x128xf32, #tpu.memory_space<vmem>>, vector<1x1x128xf32>
    %184 = vector.shape_cast %183 : vector<1x1x128xf32> to vector<1x128xf32>
    %c0_58 = arith.constant 0 : index
    %c0_59 = arith.constant 0 : index
    %c0_60 = arith.constant 0 : index
    %185 = vector.load %arg13[%c0_58, %c0_59, %c0_60] : memref<2x1x128xf32, #tpu.memory_space<vmem>>, vector<1x1x128xf32>
    %186 = vector.shape_cast %185 : vector<1x1x128xf32> to vector<1x128xf32>
    %cst_61 = arith.constant dense<0.000000e+00> : vector<16xf32>
    %187 = vector.multi_reduction <add>, %182, %cst_61 [1] : vector<16x128xf32> to vector<16xf32>
    %188 = vector.shape_cast %187 : vector<16xf32> to vector<16x1xf32>
    %cst_62 = arith.constant 1.280000e+02 : f32
    %189 = vector.broadcast %cst_62 : f32 to vector<16x1xf32>
    %190 = arith.divf %188, %189 : vector<16x1xf32>
    %191 = vector.broadcast %190 : vector<16x1xf32> to vector<16x128xf32>
    %192 = arith.subf %182, %191 : vector<16x128xf32>
    %193 = vector.broadcast %190 : vector<16x1xf32> to vector<16x128xf32>
    %194 = arith.subf %182, %193 : vector<16x128xf32>
    %195 = arith.mulf %192, %194 : vector<16x128xf32>
    %cst_63 = arith.constant dense<0.000000e+00> : vector<16xf32>
    %196 = vector.multi_reduction <add>, %195, %cst_63 [1] : vector<16x128xf32> to vector<16xf32>
    %197 = vector.shape_cast %196 : vector<16xf32> to vector<16x1xf32>
    %cst_64 = arith.constant 1.280000e+02 : f32
    %198 = vector.broadcast %cst_64 : f32 to vector<16x1xf32>
    %199 = arith.divf %197, %198 : vector<16x1xf32>
    %200 = vector.broadcast %190 : vector<16x1xf32> to vector<16x128xf32>
    %201 = arith.subf %182, %200 : vector<16x128xf32>
    %cst_65 = arith.constant 9.99999996E-13 : f32
    %202 = vector.broadcast %cst_65 : f32 to vector<16x1xf32>
    %203 = arith.addf %199, %202 : vector<16x1xf32>
    %204 = math.rsqrt %203 : vector<16x1xf32>
    %205 = vector.broadcast %204 : vector<16x1xf32> to vector<16x128xf32>
    %206 = arith.mulf %201, %205 : vector<16x128xf32>
    %207 = vector.broadcast %184 : vector<1x128xf32> to vector<16x128xf32>
    %208 = arith.mulf %206, %207 : vector<16x128xf32>
    %209 = vector.broadcast %186 : vector<1x128xf32> to vector<16x128xf32>
    %210 = arith.addf %208, %209 : vector<16x128xf32>
    %211 = arith.truncf %210 : vector<16x128xf32> to vector<16x128xbf16>
    %c0_66 = arith.constant 0 : index
    %c0_67 = arith.constant 0 : index
    %c0_68 = arith.constant 0 : index
    %212 = vector.load %arg14[%c0_66, %c0_67, %c0_68] : memref<2x128x256xbf16, #tpu.memory_space<vmem>>, vector<1x128x256xbf16>
    %213 = vector.shape_cast %212 : vector<1x128x256xbf16> to vector<128x256xbf16>
    %cst_69 = arith.constant dense<0.000000e+00> : vector<16x256xf32>
    %214 = tpu.matmul %211, %213, %cst_69 {dimension_numbers = #tpu.dot_dimension_numbers<[1], [0], [0], [1], [0, 0, 1, 1], [], []>} : vector<16x128xbf16>, vector<128x256xbf16>, vector<16x256xf32> -> vector<16x256xf32>
    %c0_70 = arith.constant 0 : index
    %c0_71 = arith.constant 0 : index
    %c0_72 = arith.constant 0 : index
    %215 = vector.load %arg15[%c0_70, %c0_71, %c0_72] : memref<2x1x256xf32, #tpu.memory_space<vmem>>, vector<1x1x256xf32>
    %216 = vector.shape_cast %215 : vector<1x1x256xf32> to vector<1x256xf32>
    %217 = vector.broadcast %216 : vector<1x256xf32> to vector<16x256xf32>
    %218 = arith.addf %214, %217 : vector<16x256xf32>
    %cst_73 = arith.constant 5.000000e-01 : f32
    %219 = vector.broadcast %cst_73 : f32 to vector<16x256xf32>
    %220 = arith.mulf %219, %218 : vector<16x256xf32>
    %cst_74 = arith.constant 4.471500e-02 : f32
    %221 = vector.broadcast %cst_74 : f32 to vector<16x256xf32>
    %222 = arith.mulf %221, %218 : vector<16x256xf32>
    %223 = arith.mulf %222, %218 : vector<16x256xf32>
    %224 = arith.mulf %223, %218 : vector<16x256xf32>
    %225 = arith.addf %218, %224 : vector<16x256xf32>
    %cst_75 = arith.constant 0.797884583 : f32
    %226 = vector.broadcast %cst_75 : f32 to vector<16x256xf32>
    %227 = arith.mulf %226, %225 : vector<16x256xf32>
    %228 = math.tanh %227 : vector<16x256xf32>
    %cst_76 = arith.constant 1.000000e+00 : f32
    %229 = vector.broadcast %cst_76 : f32 to vector<16x256xf32>
    %230 = arith.addf %229, %228 : vector<16x256xf32>
    %231 = arith.mulf %220, %230 : vector<16x256xf32>
    %232 = arith.truncf %231 : vector<16x256xf32> to vector<16x256xbf16>
    %c0_77 = arith.constant 0 : index
    %c0_78 = arith.constant 0 : index
    %c0_79 = arith.constant 0 : index
    %233 = vector.load %arg16[%c0_77, %c0_78, %c0_79] : memref<2x256x128xbf16, #tpu.memory_space<vmem>>, vector<1x256x128xbf16>
    %234 = vector.shape_cast %233 : vector<1x256x128xbf16> to vector<256x128xbf16>
    %cst_80 = arith.constant dense<0.000000e+00> : vector<16x128xf32>
    %235 = tpu.matmul %232, %234, %cst_80 {dimension_numbers = #tpu.dot_dimension_numbers<[1], [0], [0], [1], [0, 0, 1, 1], [], []>} : vector<16x256xbf16>, vector<256x128xbf16>, vector<16x128xf32> -> vector<16x128xf32>
    %c0_81 = arith.constant 0 : index
    %c0_82 = arith.constant 0 : index
    %c0_83 = arith.constant 0 : index
    %236 = vector.load %arg17[%c0_81, %c0_82, %c0_83] : memref<2x1x128xf32, #tpu.memory_space<vmem>>, vector<1x1x128xf32>
    %237 = vector.shape_cast %236 : vector<1x1x128xf32> to vector<1x128xf32>
    %238 = vector.broadcast %237 : vector<1x128xf32> to vector<16x128xf32>
    %239 = arith.addf %235, %238 : vector<16x128xf32>
    %240 = arith.addf %239, %210 : vector<16x128xf32>
    %c0_84 = arith.constant 0 : index
    %c0_85 = arith.constant 0 : index
    %c0_86 = arith.constant 0 : index
    %241 = vector.load %arg18[%c0_84, %c0_85, %c0_86] : memref<2x1x128xf32, #tpu.memory_space<vmem>>, vector<1x1x128xf32>
    %242 = vector.shape_cast %241 : vector<1x1x128xf32> to vector<1x128xf32>
    %c0_87 = arith.constant 0 : index
    %c0_88 = arith.constant 0 : index
    %c0_89 = arith.constant 0 : index
    %243 = vector.load %arg19[%c0_87, %c0_88, %c0_89] : memref<2x1x128xf32, #tpu.memory_space<vmem>>, vector<1x1x128xf32>
    %244 = vector.shape_cast %243 : vector<1x1x128xf32> to vector<1x128xf32>
    %cst_90 = arith.constant dense<0.000000e+00> : vector<16xf32>
    %245 = vector.multi_reduction <add>, %240, %cst_90 [1] : vector<16x128xf32> to vector<16xf32>
    %246 = vector.shape_cast %245 : vector<16xf32> to vector<16x1xf32>
    %cst_91 = arith.constant 1.280000e+02 : f32
    %247 = vector.broadcast %cst_91 : f32 to vector<16x1xf32>
    %248 = arith.divf %246, %247 : vector<16x1xf32>
    %249 = vector.broadcast %248 : vector<16x1xf32> to vector<16x128xf32>
    %250 = arith.subf %240, %249 : vector<16x128xf32>
    %251 = vector.broadcast %248 : vector<16x1xf32> to vector<16x128xf32>
    %252 = arith.subf %240, %251 : vector<16x128xf32>
    %253 = arith.mulf %250, %252 : vector<16x128xf32>
    %cst_92 = arith.constant dense<0.000000e+00> : vector<16xf32>
    %254 = vector.multi_reduction <add>, %253, %cst_92 [1] : vector<16x128xf32> to vector<16xf32>
    %255 = vector.shape_cast %254 : vector<16xf32> to vector<16x1xf32>
    %cst_93 = arith.constant 1.280000e+02 : f32
    %256 = vector.broadcast %cst_93 : f32 to vector<16x1xf32>
    %257 = arith.divf %255, %256 : vector<16x1xf32>
    %258 = vector.broadcast %248 : vector<16x1xf32> to vector<16x128xf32>
    %259 = arith.subf %240, %258 : vector<16x128xf32>
    %cst_94 = arith.constant 9.99999996E-13 : f32
    %260 = vector.broadcast %cst_94 : f32 to vector<16x1xf32>
    %261 = arith.addf %257, %260 : vector<16x1xf32>
    %262 = math.rsqrt %261 : vector<16x1xf32>
    %263 = vector.broadcast %262 : vector<16x1xf32> to vector<16x128xf32>
    %264 = arith.mulf %259, %263 : vector<16x128xf32>
    %265 = vector.broadcast %242 : vector<1x128xf32> to vector<16x128xf32>
    %266 = arith.mulf %264, %265 : vector<16x128xf32>
    %267 = vector.broadcast %244 : vector<1x128xf32> to vector<16x128xf32>
    %268 = arith.addf %266, %267 : vector<16x128xf32>
    %269 = arith.truncf %268 : vector<16x128xf32> to vector<16x128xbf16>
    %c1 = arith.constant 1 : index
    %c0_95 = arith.constant 0 : index
    %c0_96 = arith.constant 0 : index
    %270 = vector.load %arg8[%c1, %c0_95, %c0_96] : memref<2x128x384xbf16, #tpu.memory_space<vmem>>, vector<1x128x384xbf16>
    %271 = vector.shape_cast %270 : vector<1x128x384xbf16> to vector<128x384xbf16>
    %cst_97 = arith.constant dense<0.000000e+00> : vector<16x384xf32>
    %272 = tpu.matmul %269, %271, %cst_97 {dimension_numbers = #tpu.dot_dimension_numbers<[1], [0], [0], [1], [0, 0, 1, 1], [], []>} : vector<16x128xbf16>, vector<128x384xbf16>, vector<16x384xf32> -> vector<16x384xf32>
    %c1_98 = arith.constant 1 : index
    %c0_99 = arith.constant 0 : index
    %c0_100 = arith.constant 0 : index
    %273 = vector.load %arg9[%c1_98, %c0_99, %c0_100] : memref<2x1x384xf32, #tpu.memory_space<vmem>>, vector<1x1x384xf32>
    %274 = vector.shape_cast %273 : vector<1x1x384xf32> to vector<1x384xf32>
    %275 = vector.broadcast %274 : vector<1x384xf32> to vector<16x384xf32>
    %276 = arith.addf %272, %275 : vector<16x384xf32>
    %277 = vector.extract_strided_slice %276 {offsets = [0, 0], sizes = [16, 128], strides = [1, 1]} : vector<16x384xf32> to vector<16x128xf32>
    %278 = vector.extract_strided_slice %276 {offsets = [0, 128], sizes = [16, 128], strides = [1, 1]} : vector<16x384xf32> to vector<16x128xf32>
    %279 = vector.extract_strided_slice %276 {offsets = [0, 256], sizes = [16, 128], strides = [1, 1]} : vector<16x384xf32> to vector<16x128xf32>
    %280 = vector.extract_strided_slice %277 {offsets = [0, 0], sizes = [16, 32], strides = [1, 1]} : vector<16x128xf32> to vector<16x32xf32>
    %281 = vector.shape_cast %280 : vector<16x32xf32> to vector<2x8x32xf32>
    %282 = arith.truncf %281 : vector<2x8x32xf32> to vector<2x8x32xbf16>
    %283 = vector.extract_strided_slice %278 {offsets = [0, 0], sizes = [16, 32], strides = [1, 1]} : vector<16x128xf32> to vector<16x32xf32>
    %284 = vector.shape_cast %283 : vector<16x32xf32> to vector<2x8x32xf32>
    %285 = arith.truncf %284 : vector<2x8x32xf32> to vector<2x8x32xbf16>
    %286 = vector.extract_strided_slice %279 {offsets = [0, 0], sizes = [16, 32], strides = [1, 1]} : vector<16x128xf32> to vector<16x32xf32>
    %287 = vector.shape_cast %286 : vector<16x32xf32> to vector<2x8x32xf32>
    %288 = arith.truncf %287 : vector<2x8x32xf32> to vector<2x8x32xbf16>
    "tpu.trace_start"() <{level = 10 : i32, message = "bqd,bkd->bqk"}> : () -> ()
    %cst_101 = arith.constant dense<0.000000e+00> : vector<2x8x8xf32>
    %289 = tpu.matmul %282, %285, %cst_101 {dimension_numbers = #tpu.dot_dimension_numbers<[2], [2], [1], [1], [0, 0, 0, 1, 1, 1], [0], [0]>} : vector<2x8x32xbf16>, vector<2x8x32xbf16>, vector<2x8x8xf32> -> vector<2x8x8xf32>
    "tpu.trace_stop"() : () -> ()
    %cst_102 = arith.constant 0.176776692 : f32
    %290 = vector.broadcast %cst_102 : f32 to vector<2x8x8xf32>
    %291 = arith.mulf %289, %290 : vector<2x8x8xf32>
    %cst_103 = arith.constant -1.000000e+30 : f32
    %292 = vector.shape_cast %45 : vector<1x1x8xi1> to vector<1x1x8xi1>
    %293 = vector.broadcast %292 : vector<1x1x8xi1> to vector<2x8x8xi1>
    %294 = vector.broadcast %cst_103 : f32 to vector<2x8x8xf32>
    %295 = arith.select %293, %291, %294 : vector<2x8x8xi1>, vector<2x8x8xf32>
    %cst_104 = arith.constant dense<0xFF800000> : vector<2x8xf32>
    %296 = vector.multi_reduction <maximumf>, %295, %cst_104 [2] : vector<2x8x8xf32> to vector<2x8xf32>
    %297 = vector.shape_cast %296 : vector<2x8xf32> to vector<2x8x1xf32>
    %298 = vector.broadcast %297 : vector<2x8x1xf32> to vector<2x8x8xf32>
    %299 = arith.subf %295, %298 : vector<2x8x8xf32>
    %300 = math.exp %299 : vector<2x8x8xf32>
    %cst_105 = arith.constant dense<0.000000e+00> : vector<2x8xf32>
    %301 = vector.multi_reduction <add>, %300, %cst_105 [2] : vector<2x8x8xf32> to vector<2x8xf32>
    %302 = vector.shape_cast %301 : vector<2x8xf32> to vector<2x8x1xf32>
    %303 = tpu.reciprocal %302 {approx = true} : vector<2x8x1xf32> -> vector<2x8x1xf32>
    %304 = vector.broadcast %303 : vector<2x8x1xf32> to vector<2x8x8xf32>
    %305 = arith.mulf %300, %304 : vector<2x8x8xf32>
    %306 = arith.truncf %305 : vector<2x8x8xf32> to vector<2x8x8xbf16>
    "tpu.trace_start"() <{level = 10 : i32, message = "bqk,bkd->bqd"}> : () -> ()
    %cst_106 = arith.constant dense<0.000000e+00> : vector<2x8x32xf32>
    %307 = tpu.matmul %306, %288, %cst_106 {dimension_numbers = #tpu.dot_dimension_numbers<[2], [1], [1], [2], [0, 0, 0, 1, 1, 2], [0], [0]>} : vector<2x8x8xbf16>, vector<2x8x32xbf16>, vector<2x8x32xf32> -> vector<2x8x32xf32>
    "tpu.trace_stop"() : () -> ()
    %308 = vector.shape_cast %307 : vector<2x8x32xf32> to vector<16x32xf32>
    %309 = vector.extract_strided_slice %277 {offsets = [0, 32], sizes = [16, 32], strides = [1, 1]} : vector<16x128xf32> to vector<16x32xf32>
    %310 = vector.shape_cast %309 : vector<16x32xf32> to vector<2x8x32xf32>
    %311 = arith.truncf %310 : vector<2x8x32xf32> to vector<2x8x32xbf16>
    %312 = vector.extract_strided_slice %278 {offsets = [0, 32], sizes = [16, 32], strides = [1, 1]} : vector<16x128xf32> to vector<16x32xf32>
    %313 = vector.shape_cast %312 : vector<16x32xf32> to vector<2x8x32xf32>
    %314 = arith.truncf %313 : vector<2x8x32xf32> to vector<2x8x32xbf16>
    %315 = vector.extract_strided_slice %279 {offsets = [0, 32], sizes = [16, 32], strides = [1, 1]} : vector<16x128xf32> to vector<16x32xf32>
    %316 = vector.shape_cast %315 : vector<16x32xf32> to vector<2x8x32xf32>
    %317 = arith.truncf %316 : vector<2x8x32xf32> to vector<2x8x32xbf16>
    "tpu.trace_start"() <{level = 10 : i32, message = "bqd,bkd->bqk"}> : () -> ()
    %cst_107 = arith.constant dense<0.000000e+00> : vector<2x8x8xf32>
    %318 = tpu.matmul %311, %314, %cst_107 {dimension_numbers = #tpu.dot_dimension_numbers<[2], [2], [1], [1], [0, 0, 0, 1, 1, 1], [0], [0]>} : vector<2x8x32xbf16>, vector<2x8x32xbf16>, vector<2x8x8xf32> -> vector<2x8x8xf32>
    "tpu.trace_stop"() : () -> ()
    %cst_108 = arith.constant 0.176776692 : f32
    %319 = vector.broadcast %cst_108 : f32 to vector<2x8x8xf32>
    %320 = arith.mulf %318, %319 : vector<2x8x8xf32>
    %cst_109 = arith.constant -1.000000e+30 : f32
    %321 = vector.shape_cast %45 : vector<1x1x8xi1> to vector<1x1x8xi1>
    %322 = vector.broadcast %321 : vector<1x1x8xi1> to vector<2x8x8xi1>
    %323 = vector.broadcast %cst_109 : f32 to vector<2x8x8xf32>
    %324 = arith.select %322, %320, %323 : vector<2x8x8xi1>, vector<2x8x8xf32>
    %cst_110 = arith.constant dense<0xFF800000> : vector<2x8xf32>
    %325 = vector.multi_reduction <maximumf>, %324, %cst_110 [2] : vector<2x8x8xf32> to vector<2x8xf32>
    %326 = vector.shape_cast %325 : vector<2x8xf32> to vector<2x8x1xf32>
    %327 = vector.broadcast %326 : vector<2x8x1xf32> to vector<2x8x8xf32>
    %328 = arith.subf %324, %327 : vector<2x8x8xf32>
    %329 = math.exp %328 : vector<2x8x8xf32>
    %cst_111 = arith.constant dense<0.000000e+00> : vector<2x8xf32>
    %330 = vector.multi_reduction <add>, %329, %cst_111 [2] : vector<2x8x8xf32> to vector<2x8xf32>
    %331 = vector.shape_cast %330 : vector<2x8xf32> to vector<2x8x1xf32>
    %332 = tpu.reciprocal %331 {approx = true} : vector<2x8x1xf32> -> vector<2x8x1xf32>
    %333 = vector.broadcast %332 : vector<2x8x1xf32> to vector<2x8x8xf32>
    %334 = arith.mulf %329, %333 : vector<2x8x8xf32>
    %335 = arith.truncf %334 : vector<2x8x8xf32> to vector<2x8x8xbf16>
    "tpu.trace_start"() <{level = 10 : i32, message = "bqk,bkd->bqd"}> : () -> ()
    %cst_112 = arith.constant dense<0.000000e+00> : vector<2x8x32xf32>
    %336 = tpu.matmul %335, %317, %cst_112 {dimension_numbers = #tpu.dot_dimension_numbers<[2], [1], [1], [2], [0, 0, 0, 1, 1, 2], [0], [0]>} : vector<2x8x8xbf16>, vector<2x8x32xbf16>, vector<2x8x32xf32> -> vector<2x8x32xf32>
    "tpu.trace_stop"() : () -> ()
    %337 = vector.shape_cast %336 : vector<2x8x32xf32> to vector<16x32xf32>
    %338 = vector.extract_strided_slice %277 {offsets = [0, 64], sizes = [16, 32], strides = [1, 1]} : vector<16x128xf32> to vector<16x32xf32>
    %339 = vector.shape_cast %338 : vector<16x32xf32> to vector<2x8x32xf32>
    %340 = arith.truncf %339 : vector<2x8x32xf32> to vector<2x8x32xbf16>
    %341 = vector.extract_strided_slice %278 {offsets = [0, 64], sizes = [16, 32], strides = [1, 1]} : vector<16x128xf32> to vector<16x32xf32>
    %342 = vector.shape_cast %341 : vector<16x32xf32> to vector<2x8x32xf32>
    %343 = arith.truncf %342 : vector<2x8x32xf32> to vector<2x8x32xbf16>
    %344 = vector.extract_strided_slice %279 {offsets = [0, 64], sizes = [16, 32], strides = [1, 1]} : vector<16x128xf32> to vector<16x32xf32>
    %345 = vector.shape_cast %344 : vector<16x32xf32> to vector<2x8x32xf32>
    %346 = arith.truncf %345 : vector<2x8x32xf32> to vector<2x8x32xbf16>
    "tpu.trace_start"() <{level = 10 : i32, message = "bqd,bkd->bqk"}> : () -> ()
    %cst_113 = arith.constant dense<0.000000e+00> : vector<2x8x8xf32>
    %347 = tpu.matmul %340, %343, %cst_113 {dimension_numbers = #tpu.dot_dimension_numbers<[2], [2], [1], [1], [0, 0, 0, 1, 1, 1], [0], [0]>} : vector<2x8x32xbf16>, vector<2x8x32xbf16>, vector<2x8x8xf32> -> vector<2x8x8xf32>
    "tpu.trace_stop"() : () -> ()
    %cst_114 = arith.constant 0.176776692 : f32
    %348 = vector.broadcast %cst_114 : f32 to vector<2x8x8xf32>
    %349 = arith.mulf %347, %348 : vector<2x8x8xf32>
    %cst_115 = arith.constant -1.000000e+30 : f32
    %350 = vector.shape_cast %45 : vector<1x1x8xi1> to vector<1x1x8xi1>
    %351 = vector.broadcast %350 : vector<1x1x8xi1> to vector<2x8x8xi1>
    %352 = vector.broadcast %cst_115 : f32 to vector<2x8x8xf32>
    %353 = arith.select %351, %349, %352 : vector<2x8x8xi1>, vector<2x8x8xf32>
    %cst_116 = arith.constant dense<0xFF800000> : vector<2x8xf32>
    %354 = vector.multi_reduction <maximumf>, %353, %cst_116 [2] : vector<2x8x8xf32> to vector<2x8xf32>
    %355 = vector.shape_cast %354 : vector<2x8xf32> to vector<2x8x1xf32>
    %356 = vector.broadcast %355 : vector<2x8x1xf32> to vector<2x8x8xf32>
    %357 = arith.subf %353, %356 : vector<2x8x8xf32>
    %358 = math.exp %357 : vector<2x8x8xf32>
    %cst_117 = arith.constant dense<0.000000e+00> : vector<2x8xf32>
    %359 = vector.multi_reduction <add>, %358, %cst_117 [2] : vector<2x8x8xf32> to vector<2x8xf32>
    %360 = vector.shape_cast %359 : vector<2x8xf32> to vector<2x8x1xf32>
    %361 = tpu.reciprocal %360 {approx = true} : vector<2x8x1xf32> -> vector<2x8x1xf32>
    %362 = vector.broadcast %361 : vector<2x8x1xf32> to vector<2x8x8xf32>
    %363 = arith.mulf %358, %362 : vector<2x8x8xf32>
    %364 = arith.truncf %363 : vector<2x8x8xf32> to vector<2x8x8xbf16>
    "tpu.trace_start"() <{level = 10 : i32, message = "bqk,bkd->bqd"}> : () -> ()
    %cst_118 = arith.constant dense<0.000000e+00> : vector<2x8x32xf32>
    %365 = tpu.matmul %364, %346, %cst_118 {dimension_numbers = #tpu.dot_dimension_numbers<[2], [1], [1], [2], [0, 0, 0, 1, 1, 2], [0], [0]>} : vector<2x8x8xbf16>, vector<2x8x32xbf16>, vector<2x8x32xf32> -> vector<2x8x32xf32>
    "tpu.trace_stop"() : () -> ()
    %366 = vector.shape_cast %365 : vector<2x8x32xf32> to vector<16x32xf32>
    %367 = vector.extract_strided_slice %277 {offsets = [0, 96], sizes = [16, 32], strides = [1, 1]} : vector<16x128xf32> to vector<16x32xf32>
    %368 = vector.shape_cast %367 : vector<16x32xf32> to vector<2x8x32xf32>
    %369 = arith.truncf %368 : vector<2x8x32xf32> to vector<2x8x32xbf16>
    %370 = vector.extract_strided_slice %278 {offsets = [0, 96], sizes = [16, 32], strides = [1, 1]} : vector<16x128xf32> to vector<16x32xf32>
    %371 = vector.shape_cast %370 : vector<16x32xf32> to vector<2x8x32xf32>
    %372 = arith.truncf %371 : vector<2x8x32xf32> to vector<2x8x32xbf16>
    %373 = vector.extract_strided_slice %279 {offsets = [0, 96], sizes = [16, 32], strides = [1, 1]} : vector<16x128xf32> to vector<16x32xf32>
    %374 = vector.shape_cast %373 : vector<16x32xf32> to vector<2x8x32xf32>
    %375 = arith.truncf %374 : vector<2x8x32xf32> to vector<2x8x32xbf16>
    "tpu.trace_start"() <{level = 10 : i32, message = "bqd,bkd->bqk"}> : () -> ()
    %cst_119 = arith.constant dense<0.000000e+00> : vector<2x8x8xf32>
    %376 = tpu.matmul %369, %372, %cst_119 {dimension_numbers = #tpu.dot_dimension_numbers<[2], [2], [1], [1], [0, 0, 0, 1, 1, 1], [0], [0]>} : vector<2x8x32xbf16>, vector<2x8x32xbf16>, vector<2x8x8xf32> -> vector<2x8x8xf32>
    "tpu.trace_stop"() : () -> ()
    %cst_120 = arith.constant 0.176776692 : f32
    %377 = vector.broadcast %cst_120 : f32 to vector<2x8x8xf32>
    %378 = arith.mulf %376, %377 : vector<2x8x8xf32>
    %cst_121 = arith.constant -1.000000e+30 : f32
    %379 = vector.shape_cast %45 : vector<1x1x8xi1> to vector<1x1x8xi1>
    %380 = vector.broadcast %379 : vector<1x1x8xi1> to vector<2x8x8xi1>
    %381 = vector.broadcast %cst_121 : f32 to vector<2x8x8xf32>
    %382 = arith.select %380, %378, %381 : vector<2x8x8xi1>, vector<2x8x8xf32>
    %cst_122 = arith.constant dense<0xFF800000> : vector<2x8xf32>
    %383 = vector.multi_reduction <maximumf>, %382, %cst_122 [2] : vector<2x8x8xf32> to vector<2x8xf32>
    %384 = vector.shape_cast %383 : vector<2x8xf32> to vector<2x8x1xf32>
    %385 = vector.broadcast %384 : vector<2x8x1xf32> to vector<2x8x8xf32>
    %386 = arith.subf %382, %385 : vector<2x8x8xf32>
    %387 = math.exp %386 : vector<2x8x8xf32>
    %cst_123 = arith.constant dense<0.000000e+00> : vector<2x8xf32>
    %388 = vector.multi_reduction <add>, %387, %cst_123 [2] : vector<2x8x8xf32> to vector<2x8xf32>
    %389 = vector.shape_cast %388 : vector<2x8xf32> to vector<2x8x1xf32>
    %390 = tpu.reciprocal %389 {approx = true} : vector<2x8x1xf32> -> vector<2x8x1xf32>
    %391 = vector.broadcast %390 : vector<2x8x1xf32> to vector<2x8x8xf32>
    %392 = arith.mulf %387, %391 : vector<2x8x8xf32>
    %393 = arith.truncf %392 : vector<2x8x8xf32> to vector<2x8x8xbf16>
    "tpu.trace_start"() <{level = 10 : i32, message = "bqk,bkd->bqd"}> : () -> ()
    %cst_124 = arith.constant dense<0.000000e+00> : vector<2x8x32xf32>
    %394 = tpu.matmul %393, %375, %cst_124 {dimension_numbers = #tpu.dot_dimension_numbers<[2], [1], [1], [2], [0, 0, 0, 1, 1, 2], [0], [0]>} : vector<2x8x8xbf16>, vector<2x8x32xbf16>, vector<2x8x32xf32> -> vector<2x8x32xf32>
    "tpu.trace_stop"() : () -> ()
    %395 = vector.shape_cast %394 : vector<2x8x32xf32> to vector<16x32xf32>
    %396 = tpu.concatenate %308, %337, %366, %395 in 1 : vector<16x32xf32>, vector<16x32xf32>, vector<16x32xf32>, vector<16x32xf32> -> vector<16x128xf32>
    %397 = arith.truncf %396 : vector<16x128xf32> to vector<16x128xbf16>
    %c1_125 = arith.constant 1 : index
    %c0_126 = arith.constant 0 : index
    %c0_127 = arith.constant 0 : index
    %398 = vector.load %arg10[%c1_125, %c0_126, %c0_127] : memref<2x128x128xbf16, #tpu.memory_space<vmem>>, vector<1x128x128xbf16>
    %399 = vector.shape_cast %398 : vector<1x128x128xbf16> to vector<128x128xbf16>
    %cst_128 = arith.constant dense<0.000000e+00> : vector<16x128xf32>
    %400 = tpu.matmul %397, %399, %cst_128 {dimension_numbers = #tpu.dot_dimension_numbers<[1], [0], [0], [1], [0, 0, 1, 1], [], []>} : vector<16x128xbf16>, vector<128x128xbf16>, vector<16x128xf32> -> vector<16x128xf32>
    %c1_129 = arith.constant 1 : index
    %c0_130 = arith.constant 0 : index
    %c0_131 = arith.constant 0 : index
    %401 = vector.load %arg11[%c1_129, %c0_130, %c0_131] : memref<2x1x128xf32, #tpu.memory_space<vmem>>, vector<1x1x128xf32>
    %402 = vector.shape_cast %401 : vector<1x1x128xf32> to vector<1x128xf32>
    %403 = vector.broadcast %402 : vector<1x128xf32> to vector<16x128xf32>
    %404 = arith.addf %400, %403 : vector<16x128xf32>
    %405 = arith.addf %404, %268 : vector<16x128xf32>
    %c1_132 = arith.constant 1 : index
    %c0_133 = arith.constant 0 : index
    %c0_134 = arith.constant 0 : index
    %406 = vector.load %arg12[%c1_132, %c0_133, %c0_134] : memref<2x1x128xf32, #tpu.memory_space<vmem>>, vector<1x1x128xf32>
    %407 = vector.shape_cast %406 : vector<1x1x128xf32> to vector<1x128xf32>
    %c1_135 = arith.constant 1 : index
    %c0_136 = arith.constant 0 : index
    %c0_137 = arith.constant 0 : index
    %408 = vector.load %arg13[%c1_135, %c0_136, %c0_137] : memref<2x1x128xf32, #tpu.memory_space<vmem>>, vector<1x1x128xf32>
    %409 = vector.shape_cast %408 : vector<1x1x128xf32> to vector<1x128xf32>
    %cst_138 = arith.constant dense<0.000000e+00> : vector<16xf32>
    %410 = vector.multi_reduction <add>, %405, %cst_138 [1] : vector<16x128xf32> to vector<16xf32>
    %411 = vector.shape_cast %410 : vector<16xf32> to vector<16x1xf32>
    %cst_139 = arith.constant 1.280000e+02 : f32
    %412 = vector.broadcast %cst_139 : f32 to vector<16x1xf32>
    %413 = arith.divf %411, %412 : vector<16x1xf32>
    %414 = vector.broadcast %413 : vector<16x1xf32> to vector<16x128xf32>
    %415 = arith.subf %405, %414 : vector<16x128xf32>
    %416 = vector.broadcast %413 : vector<16x1xf32> to vector<16x128xf32>
    %417 = arith.subf %405, %416 : vector<16x128xf32>
    %418 = arith.mulf %415, %417 : vector<16x128xf32>
    %cst_140 = arith.constant dense<0.000000e+00> : vector<16xf32>
    %419 = vector.multi_reduction <add>, %418, %cst_140 [1] : vector<16x128xf32> to vector<16xf32>
    %420 = vector.shape_cast %419 : vector<16xf32> to vector<16x1xf32>
    %cst_141 = arith.constant 1.280000e+02 : f32
    %421 = vector.broadcast %cst_141 : f32 to vector<16x1xf32>
    %422 = arith.divf %420, %421 : vector<16x1xf32>
    %423 = vector.broadcast %413 : vector<16x1xf32> to vector<16x128xf32>
    %424 = arith.subf %405, %423 : vector<16x128xf32>
    %cst_142 = arith.constant 9.99999996E-13 : f32
    %425 = vector.broadcast %cst_142 : f32 to vector<16x1xf32>
    %426 = arith.addf %422, %425 : vector<16x1xf32>
    %427 = math.rsqrt %426 : vector<16x1xf32>
    %428 = vector.broadcast %427 : vector<16x1xf32> to vector<16x128xf32>
    %429 = arith.mulf %424, %428 : vector<16x128xf32>
    %430 = vector.broadcast %407 : vector<1x128xf32> to vector<16x128xf32>
    %431 = arith.mulf %429, %430 : vector<16x128xf32>
    %432 = vector.broadcast %409 : vector<1x128xf32> to vector<16x128xf32>
    %433 = arith.addf %431, %432 : vector<16x128xf32>
    %434 = arith.truncf %433 : vector<16x128xf32> to vector<16x128xbf16>
    %c1_143 = arith.constant 1 : index
    %c0_144 = arith.constant 0 : index
    %c0_145 = arith.constant 0 : index
    %435 = vector.load %arg14[%c1_143, %c0_144, %c0_145] : memref<2x128x256xbf16, #tpu.memory_space<vmem>>, vector<1x128x256xbf16>
    %436 = vector.shape_cast %435 : vector<1x128x256xbf16> to vector<128x256xbf16>
    %cst_146 = arith.constant dense<0.000000e+00> : vector<16x256xf32>
    %437 = tpu.matmul %434, %436, %cst_146 {dimension_numbers = #tpu.dot_dimension_numbers<[1], [0], [0], [1], [0, 0, 1, 1], [], []>} : vector<16x128xbf16>, vector<128x256xbf16>, vector<16x256xf32> -> vector<16x256xf32>
    %c1_147 = arith.constant 1 : index
    %c0_148 = arith.constant 0 : index
    %c0_149 = arith.constant 0 : index
    %438 = vector.load %arg15[%c1_147, %c0_148, %c0_149] : memref<2x1x256xf32, #tpu.memory_space<vmem>>, vector<1x1x256xf32>
    %439 = vector.shape_cast %438 : vector<1x1x256xf32> to vector<1x256xf32>
    %440 = vector.broadcast %439 : vector<1x256xf32> to vector<16x256xf32>
    %441 = arith.addf %437, %440 : vector<16x256xf32>
    %cst_150 = arith.constant 5.000000e-01 : f32
    %442 = vector.broadcast %cst_150 : f32 to vector<16x256xf32>
    %443 = arith.mulf %442, %441 : vector<16x256xf32>
    %cst_151 = arith.constant 4.471500e-02 : f32
    %444 = vector.broadcast %cst_151 : f32 to vector<16x256xf32>
    %445 = arith.mulf %444, %441 : vector<16x256xf32>
    %446 = arith.mulf %445, %441 : vector<16x256xf32>
    %447 = arith.mulf %446, %441 : vector<16x256xf32>
    %448 = arith.addf %441, %447 : vector<16x256xf32>
    %cst_152 = arith.constant 0.797884583 : f32
    %449 = vector.broadcast %cst_152 : f32 to vector<16x256xf32>
    %450 = arith.mulf %449, %448 : vector<16x256xf32>
    %451 = math.tanh %450 : vector<16x256xf32>
    %cst_153 = arith.constant 1.000000e+00 : f32
    %452 = vector.broadcast %cst_153 : f32 to vector<16x256xf32>
    %453 = arith.addf %452, %451 : vector<16x256xf32>
    %454 = arith.mulf %443, %453 : vector<16x256xf32>
    %455 = arith.truncf %454 : vector<16x256xf32> to vector<16x256xbf16>
    %c1_154 = arith.constant 1 : index
    %c0_155 = arith.constant 0 : index
    %c0_156 = arith.constant 0 : index
    %456 = vector.load %arg16[%c1_154, %c0_155, %c0_156] : memref<2x256x128xbf16, #tpu.memory_space<vmem>>, vector<1x256x128xbf16>
    %457 = vector.shape_cast %456 : vector<1x256x128xbf16> to vector<256x128xbf16>
    %cst_157 = arith.constant dense<0.000000e+00> : vector<16x128xf32>
    %458 = tpu.matmul %455, %457, %cst_157 {dimension_numbers = #tpu.dot_dimension_numbers<[1], [0], [0], [1], [0, 0, 1, 1], [], []>} : vector<16x256xbf16>, vector<256x128xbf16>, vector<16x128xf32> -> vector<16x128xf32>
    %c1_158 = arith.constant 1 : index
    %c0_159 = arith.constant 0 : index
    %c0_160 = arith.constant 0 : index
    %459 = vector.load %arg17[%c1_158, %c0_159, %c0_160] : memref<2x1x128xf32, #tpu.memory_space<vmem>>, vector<1x1x128xf32>
    %460 = vector.shape_cast %459 : vector<1x1x128xf32> to vector<1x128xf32>
    %461 = vector.broadcast %460 : vector<1x128xf32> to vector<16x128xf32>
    %462 = arith.addf %458, %461 : vector<16x128xf32>
    %463 = arith.addf %462, %433 : vector<16x128xf32>
    %c1_161 = arith.constant 1 : index
    %c0_162 = arith.constant 0 : index
    %c0_163 = arith.constant 0 : index
    %464 = vector.load %arg18[%c1_161, %c0_162, %c0_163] : memref<2x1x128xf32, #tpu.memory_space<vmem>>, vector<1x1x128xf32>
    %465 = vector.shape_cast %464 : vector<1x1x128xf32> to vector<1x128xf32>
    %c1_164 = arith.constant 1 : index
    %c0_165 = arith.constant 0 : index
    %c0_166 = arith.constant 0 : index
    %466 = vector.load %arg19[%c1_164, %c0_165, %c0_166] : memref<2x1x128xf32, #tpu.memory_space<vmem>>, vector<1x1x128xf32>
    %467 = vector.shape_cast %466 : vector<1x1x128xf32> to vector<1x128xf32>
    %cst_167 = arith.constant dense<0.000000e+00> : vector<16xf32>
    %468 = vector.multi_reduction <add>, %463, %cst_167 [1] : vector<16x128xf32> to vector<16xf32>
    %469 = vector.shape_cast %468 : vector<16xf32> to vector<16x1xf32>
    %cst_168 = arith.constant 1.280000e+02 : f32
    %470 = vector.broadcast %cst_168 : f32 to vector<16x1xf32>
    %471 = arith.divf %469, %470 : vector<16x1xf32>
    %472 = vector.broadcast %471 : vector<16x1xf32> to vector<16x128xf32>
    %473 = arith.subf %463, %472 : vector<16x128xf32>
    %474 = vector.broadcast %471 : vector<16x1xf32> to vector<16x128xf32>
    %475 = arith.subf %463, %474 : vector<16x128xf32>
    %476 = arith.mulf %473, %475 : vector<16x128xf32>
    %cst_169 = arith.constant dense<0.000000e+00> : vector<16xf32>
    %477 = vector.multi_reduction <add>, %476, %cst_169 [1] : vector<16x128xf32> to vector<16xf32>
    %478 = vector.shape_cast %477 : vector<16xf32> to vector<16x1xf32>
    %cst_170 = arith.constant 1.280000e+02 : f32
    %479 = vector.broadcast %cst_170 : f32 to vector<16x1xf32>
    %480 = arith.divf %478, %479 : vector<16x1xf32>
    %481 = vector.broadcast %471 : vector<16x1xf32> to vector<16x128xf32>
    %482 = arith.subf %463, %481 : vector<16x128xf32>
    %cst_171 = arith.constant 9.99999996E-13 : f32
    %483 = vector.broadcast %cst_171 : f32 to vector<16x1xf32>
    %484 = arith.addf %480, %483 : vector<16x1xf32>
    %485 = math.rsqrt %484 : vector<16x1xf32>
    %486 = vector.broadcast %485 : vector<16x1xf32> to vector<16x128xf32>
    %487 = arith.mulf %482, %486 : vector<16x128xf32>
    %488 = vector.broadcast %465 : vector<1x128xf32> to vector<16x128xf32>
    %489 = arith.mulf %487, %488 : vector<16x128xf32>
    %490 = vector.broadcast %467 : vector<1x128xf32> to vector<16x128xf32>
    %491 = arith.addf %489, %490 : vector<16x128xf32>
    %492 = arith.truncf %491 : vector<16x128xf32> to vector<16x128xbf16>
    %c0_172 = arith.constant 0 : index
    %c0_173 = arith.constant 0 : index
    %493 = vector.load %arg20[%c0_172, %c0_173] : memref<128x128xbf16, #tpu.memory_space<vmem>>, vector<128x128xbf16>
    %cst_174 = arith.constant dense<0.000000e+00> : vector<16x128xf32>
    %494 = tpu.matmul %492, %493, %cst_174 {dimension_numbers = #tpu.dot_dimension_numbers<[1], [0], [0], [1], [0, 0, 1, 1], [], []>} : vector<16x128xbf16>, vector<128x128xbf16>, vector<16x128xf32> -> vector<16x128xf32>
    %c0_175 = arith.constant 0 : index
    %c0_176 = arith.constant 0 : index
    %495 = vector.load %arg21[%c0_175, %c0_176] : memref<1x128xf32, #tpu.memory_space<vmem>>, vector<1x128xf32>
    %496 = vector.broadcast %495 : vector<1x128xf32> to vector<16x128xf32>
    %497 = arith.addf %494, %496 : vector<16x128xf32>
    %498 = vector.shape_cast %497 : vector<16x128xf32> to vector<2x8x128xf32>
    %c0_177 = arith.constant 0 : index
    %c0_178 = arith.constant 0 : index
    %c0_179 = arith.constant 0 : index
    %499 = vector.load %arg22[%c0_177, %c0_178, %c0_179] : memref<2x8x128xf32, #tpu.memory_space<vmem>>, vector<2x8x128xf32>
    tpu.vector_store %arg22[%c0_177, %c0_178, %c0_179], %498 {strides = array<i32>} : memref<2x8x128xf32, #tpu.memory_space<vmem>>, vector<2x8x128xf32>,
    return
  }
  func.func @transform_0(%arg0: i32, %arg1: memref<1xi32, #tpu.memory_space<smem>>) -> (i32, i32, i32) {
    %c0_i32 = arith.constant 0 : i32
    %c0_i32_0 = arith.constant 0 : i32
    %c0_i32_1 = arith.constant 0 : i32
    return %c0_i32, %arg0, %c0_i32_0 : i32, i32, i32
  }
  func.func @transform_1(%arg0: i32, %arg1: memref<1xi32, #tpu.memory_space<smem>>) -> (i32, i32) {
    %c0_i32 = arith.constant 0 : i32
    %c0_i32_0 = arith.constant 0 : i32
    return %arg0, %c0_i32 : i32, i32
  }
  func.func @transform_2(%arg0: i32, %arg1: memref<1xi32, #tpu.memory_space<smem>>) -> (i32, i32) {
    %c0_i32 = arith.constant 0 : i32
    %c0_i32_0 = arith.constant 0 : i32
    %c0_i32_1 = arith.constant 0 : i32
    return %c0_i32, %c0_i32_0 : i32, i32
  }
  func.func @transform_3(%arg0: i32, %arg1: memref<1xi32, #tpu.memory_space<smem>>) -> (i32, i32) {
    %c0_i32 = arith.constant 0 : i32
    %c0_i32_0 = arith.constant 0 : i32
    %c0_i32_1 = arith.constant 0 : i32
    return %c0_i32, %c0_i32_0 : i32, i32
  }
  func.func @transform_4(%arg0: i32, %arg1: memref<1xi32, #tpu.memory_space<smem>>) -> (i32, i32) {
    %c0_i32 = arith.constant 0 : i32
    %c0_i32_0 = arith.constant 0 : i32
    %c0_i32_1 = arith.constant 0 : i32
    return %c0_i32, %c0_i32_0 : i32, i32
  }
  func.func @transform_5(%arg0: i32, %arg1: memref<1xi32, #tpu.memory_space<smem>>) -> (i32, i32) {
    %c0_i32 = arith.constant 0 : i32
    %c0_i32_0 = arith.constant 0 : i32
    %c0_i32_1 = arith.constant 0 : i32
    return %c0_i32, %c0_i32_0 : i32, i32
  }
  func.func @transform_6(%arg0: i32, %arg1: memref<1xi32, #tpu.memory_space<smem>>) -> (i32, i32, i32) {
    %c0_i32 = arith.constant 0 : i32
    %c0_i32_0 = arith.constant 0 : i32
    %c0_i32_1 = arith.constant 0 : i32
    %c0_i32_2 = arith.constant 0 : i32
    return %c0_i32, %c0_i32_0, %c0_i32_1 : i32, i32, i32
  }
  func.func @transform_7(%arg0: i32, %arg1: memref<1xi32, #tpu.memory_space<smem>>) -> (i32, i32, i32) {
    %c0_i32 = arith.constant 0 : i32
    %c0_i32_0 = arith.constant 0 : i32
    %c0_i32_1 = arith.constant 0 : i32
    %c0_i32_2 = arith.constant 0 : i32
    return %c0_i32, %c0_i32_0, %c0_i32_1 : i32, i32, i32
  }
  func.func @transform_8(%arg0: i32, %arg1: memref<1xi32, #tpu.memory_space<smem>>) -> (i32, i32, i32) {
    %c0_i32 = arith.constant 0 : i32
    %c0_i32_0 = arith.constant 0 : i32
    %c0_i32_1 = arith.constant 0 : i32
    %c0_i32_2 = arith.constant 0 : i32
    return %c0_i32, %c0_i32_0, %c0_i32_1 : i32, i32, i32
  }
  func.func @transform_9(%arg0: i32, %arg1: memref<1xi32, #tpu.memory_space<smem>>) -> (i32, i32, i32) {
    %c0_i32 = arith.constant 0 : i32
    %c0_i32_0 = arith.constant 0 : i32
    %c0_i32_1 = arith.constant 0 : i32
    %c0_i32_2 = arith.constant 0 : i32
    return %c0_i32, %c0_i32_0, %c0_i32_1 : i32, i32, i32
  }
  func.func @transform_10(%arg0: i32, %arg1: memref<1xi32, #tpu.memory_space<smem>>) -> (i32, i32, i32) {
    %c0_i32 = arith.constant 0 : i32
    %c0_i32_0 = arith.constant 0 : i32
    %c0_i32_1 = arith.constant 0 : i32
    %c0_i32_2 = arith.constant 0 : i32
    return %c0_i32, %c0_i32_0, %c0_i32_1 : i32, i32, i32
  }
  func.func @transform_11(%arg0: i32, %arg1: memref<1xi32, #tpu.memory_space<smem>>) -> (i32, i32, i32) {
    %c0_i32 = arith.constant 0 : i32
    %c0_i32_0 = arith.constant 0 : i32
    %c0_i32_1 = arith.constant 0 : i32
    %c0_i32_2 = arith.constant 0 : i32
    return %c0_i32, %c0_i32_0, %c0_i32_1 : i32, i32, i32
  }
  func.func @transform_12(%arg0: i32, %arg1: memref<1xi32, #tpu.memory_space<smem>>) -> (i32, i32, i32) {
    %c0_i32 = arith.constant 0 : i32
    %c0_i32_0 = arith.constant 0 : i32
    %c0_i32_1 = arith.constant 0 : i32
    %c0_i32_2 = arith.constant 0 : i32
    return %c0_i32, %c0_i32_0, %c0_i32_1 : i32, i32, i32
  }
  func.func @transform_13(%arg0: i32, %arg1: memref<1xi32, #tpu.memory_space<smem>>) -> (i32, i32, i32) {
    %c0_i32 = arith.constant 0 : i32
    %c0_i32_0 = arith.constant 0 : i32
    %c0_i32_1 = arith.constant 0 : i32
    %c0_i32_2 = arith.constant 0 : i32
    return %c0_i32, %c0_i32_0, %c0_i32_1 : i32, i32, i32
  }
  func.func @transform_14(%arg0: i32, %arg1: memref<1xi32, #tpu.memory_space<smem>>) -> (i32, i32, i32) {
    %c0_i32 = arith.constant 0 : i32
    %c0_i32_0 = arith.constant 0 : i32
    %c0_i32_1 = arith.constant 0 : i32
    %c0_i32_2 = arith.constant 0 : i32
    return %c0_i32, %c0_i32_0, %c0_i32_1 : i32, i32, i32
  }
  func.func @transform_15(%arg0: i32, %arg1: memref<1xi32, #tpu.memory_space<smem>>) -> (i32, i32, i32) {
    %c0_i32 = arith.constant 0 : i32
    %c0_i32_0 = arith.constant 0 : i32
    %c0_i32_1 = arith.constant 0 : i32
    %c0_i32_2 = arith.constant 0 : i32
    return %c0_i32, %c0_i32_0, %c0_i32_1 : i32, i32, i32
  }
  func.func @transform_16(%arg0: i32, %arg1: memref<1xi32, #tpu.memory_space<smem>>) -> (i32, i32, i32) {
    %c0_i32 = arith.constant 0 : i32
    %c0_i32_0 = arith.constant 0 : i32
    %c0_i32_1 = arith.constant 0 : i32
    %c0_i32_2 = arith.constant 0 : i32
    return %c0_i32, %c0_i32_0, %c0_i32_1 : i32, i32, i32
  }
  func.func @transform_17(%arg0: i32, %arg1: memref<1xi32, #tpu.memory_space<smem>>) -> (i32, i32, i32) {
    %c0_i32 = arith.constant 0 : i32
    %c0_i32_0 = arith.constant 0 : i32
    %c0_i32_1 = arith.constant 0 : i32
    %c0_i32_2 = arith.constant 0 : i32
    return %c0_i32, %c0_i32_0, %c0_i32_1 : i32, i32, i32
  }
  func.func @transform_18(%arg0: i32, %arg1: memref<1xi32, #tpu.memory_space<smem>>) -> (i32, i32) {
    %c0_i32 = arith.constant 0 : i32
    %c0_i32_0 = arith.constant 0 : i32
    %c0_i32_1 = arith.constant 0 : i32
    return %c0_i32, %c0_i32_0 : i32, i32
  }
  func.func @transform_19(%arg0: i32, %arg1: memref<1xi32, #tpu.memory_space<smem>>) -> (i32, i32) {
    %c0_i32 = arith.constant 0 : i32
    %c0_i32_0 = arith.constant 0 : i32
    %c0_i32_1 = arith.constant 0 : i32
    return %c0_i32, %c0_i32_0 : i32, i32
  }
  func.func @transform_20(%arg0: i32, %arg1: memref<1xi32, #tpu.memory_space<smem>>) -> (i32, i32, i32) {
    %c0_i32 = arith.constant 0 : i32
    %c0_i32_0 = arith.constant 0 : i32
    %c0_i32_1 = arith.constant 0 : i32
    return %c0_i32, %arg0, %c0_i32_0 : i32, i32, i32
  }
}

</mosaic_0001>

<bundles_post_ra>
// kernel: geneformer_encoder_forward.1
= control target key start
LH: loop header
LB: loop body
LE: loop exit
PB: predicated region body
PF: predicated region fallthrough
CT: control target
= control target key end

     0   :  { %s5899_s0 = inlined_call_operand.<no memory space> [shape: s32[1], index: 0, kind: input, shape index: {}]   ;;  %s5900_s1 = inlined_call_operand.vmem [shape: f32[2,8,6], index: 1, kind: input, shape index: {}]   ;;  %s5901_s2 = inlined_call_operand.vmem [shape: f32[8,128], index: 2, kind: input, shape index: {}]   ;;  %s5902_s3 = inlined_call_operand.vmem [shape: bf16[6,128], index: 3, kind: input, shape index: {}]   ;;  %s5903_s4 = inlined_call_operand.vmem [shape: f32[1,128], index: 4, kind: input, shape index: {}]   ;;  %s5904_s5 = inlined_call_operand.vmem [shape: f32[1,128], index: 5, kind: input, shape index: {}]   ;;  %s5905_s6 = inlined_call_operand.hbm [shape: f32[1,128], index: 6, kind: input, shape index: {}]   ;;  %s5906_s7 = inlined_call_operand.hbm [shape: bf16[2,128,384], index: 7, kind: input, shape index: {}]   ;;  %s5907_s8 = inlined_call_operand.vmem [shape: f32[2,1,384], index: 8, kind: input, shape index: {}]   ;;  %s5908_s9 = inlined_call_operand.hbm [shape: bf16[2,128,128], index: 9, kind: input, shape index: {}]   ;;  %s5909_s10 = inlined_call_operand.vmem [shape: f32[2,1,128], index: 10, kind: input, shape index: {}]   ;;  %s5910_s11 = inlined_call_operand.vmem [shape: f32[2,1,128], index: 11, kind: input, shape index: {}]   ;;  %s5911_s12 = inlined_call_operand.vmem [shape: f32[2,1,128], index: 12, kind: input, shape index: {}]   ;;  %s5912_s13 = inlined_call_operand.vmem [shape: bf16[2,128,256], index: 13, kind: input, shape index: {}]   ;;  %s5913_s14 = inlined_call_operand.vmem [shape: f32[2,1,256], index: 14, kind: input, shape index: {}]   ;;  %s5914_s15 = inlined_call_operand.hbm [shape: bf16[2,256,128], index: 15, kind: input, shape index: {}]   ;;  %s5915_s16 = inlined_call_operand.vmem [shape: f32[2,1,128], index: 16, kind: input, shape index: {}]   ;;  %s5916_s17 = inlined_call_operand.vmem [shape: f32[2,1,128], index: 17, kind: input, shape index: {}]   ;;  %s5917_s18 = inlined_call_operand.vmem [shape: f32[2,1,128], index: 18, kind: input, shape index: {}]   ;;  %s5918_s19 = inlined_call_operand.hbm [shape: bf16[128,128], index: 19, kind: input, shape index: {}]   ;;  %s5919_s20 = inlined_call_operand.hbm [shape: f32[1,128], index: 20, kind: input, shape index: {}]   ;;  %s5920_s21 = inlined_call_operand.vmem [shape: f32[2,8,128], index: 21, kind: output, shape index: {}]  }
   0x1   :  { %5923 = sst [smem:[#allocation18_spill]] %s5899_s0 }
   0x2   :  { %5924 = sst [smem:[#allocation19_spill]] %s5900_s1 }
   0x3   :  { %5925 = sst [smem:[#allocation20_spill]] %s5901_s2 }
   0x4   :  { %5926 = sst [smem:[#allocation21_spill]] %s5902_s3 }
   0x5   :  { %5927 = sst [smem:[#allocation22_spill]] %s5903_s4 }
   0x6   :  { %5928 = sst [smem:[#allocation23_spill]] %s5904_s5 }
   0x7   :  { %5929 = sst [smem:[#allocation24_spill]] %s5920_s21 }
   0x8   :  { %27 = vsyncpa [#allocation5], 0 }
   0x9   :  { %28 = vsyncpa [#allocation7], 0 }
   0xa   :  { %29 = vsyncpa [#allocation10], 0 }
   0xb   :  { %30 = vsyncpa [#allocation13], 0  ;;  %s5014_s2 = smov [#allocation6]   ;;  %s4874_s3 = scalar_lea.hbm %s5906_s7, 6144 }
   0xc   :  { %s56_s25 = sshll.u32 %s5014_s2, 4  ;;  %p4875_p0 = scmp.ne.s32.totalorder %s5906_s7, %s4874_s3  ;;  %s57_s25 = int_to_ptr.vmem [resolvable:$true] %s56_s25 }
   0xd   :  { %p4878_p1 = scmp.lt.u32.totalorder %s4874_s3, %s5906_s7 }
   0xf   :  { %p4880_p2 = pnand %p4878_p1, %p4875_p0 }
  0x11   :  { %4883 = shalt.err (!%p4880_p2)
}
  0x12   :  { %s4884_s30 = scalar_lea.vmem %s57_s25, 6144  ;;  %p4889_p4 = scmp.lt.s32.totalorder %s57_s25, %s57_s25 }
  0x13   :  { %p4885_p3 = scmp.ne.s32.totalorder %s57_s25, %s4884_s30  ;;  %p4890_p5 = scmp.lt.s32.totalorder %s4884_s30, %s4884_s30 }
  0x15   :  { %p4891_p6 = por %p4890_p5, %p4889_p4 }
  0x17   :  { %p4892_p7 = pnand %p4891_p6, %p4885_p3 }
  0x19   :  { %4895 = shalt.err (!%p4892_p7)
}
  0x1a   :  { %s5015_s5 = smov 192   ;;  %s5016_s22 = smov 12  }
  0x1b   :  { %62 = dma.hbm_to_vmem [thread:$0]  %s5906_s7, 6144, %s57_s25, [#allocation7], %s5015_s5, %s5015_s5, %s5016_s22  }
  0x1c   :  { %s5017_s24 = smov [#allocation9]   ;;  %s5018_s26 = smov [#allocation4]  }
  0x1d   :  { %s92_s2 = sshll.u32 %s5017_s24, 4  ;;  %s47_s27 = sshll.u32 %s5018_s26, 4  ;;  %s93_s2 = int_to_ptr.vmem [resolvable:$true] %s92_s2  ;;  %s48_s27 = int_to_ptr.vmem [resolvable:$true] %s47_s27 }
  0x1e   :  { %s4896_s29 = scalar_lea.hbm %s5914_s15, 4096 }
  0x1f   :  { %p4897_p8 = scmp.ne.s32.totalorder %s5914_s15, %s4896_s29  ;;  %p4900_p9 = scmp.lt.u32.totalorder %s4896_s29, %s5914_s15 }
  0x21   :  { %p4902_p10 = pnand %p4900_p9, %p4897_p8 }
  0x23   :  { %4905 = shalt.err (!%p4902_p10)
}
  0x24   :  { %s4906_s7 = scalar_lea.vmem %s93_s2, 4096  ;;  %p4911_p12 = scmp.lt.s32.totalorder %s93_s2, %s93_s2 }
  0x25   :  { %p4907_p11 = scmp.ne.s32.totalorder %s93_s2, %s4906_s7  ;;  %p4912_p13 = scmp.lt.s32.totalorder %s4906_s7, %s4906_s7 }
  0x27   :  { %p4913_p0 = por %p4912_p13, %p4911_p12 }
  0x29   :  { %p4914_p1 = pnand %p4913_p0, %p4907_p11 }
  0x2b   :  { %4917 = shalt.err (!%p4914_p1)
}
  0x2c   :  { %s5019_s25 = smov 64   ;;  %s5020_s5 = smov 4  }
  0x2d   :  { %98 = dma.hbm_to_vmem [thread:$0]  %s5914_s15, 4096, %s93_s2, [#allocation10], %s5019_s25, %s5019_s25, %s5020_s5  }
  0x2e   :  { %s4918_s24 = scalar_lea.hbm %s5905_s6, 16 }
  0x2f   :  { %p4919_p2 = scmp.ne.s32.totalorder %s5905_s6, %s4918_s24  ;;  %p4922_p3 = scmp.lt.u32.totalorder %s4918_s24, %s5905_s6 }
  0x31   :  { %p4924_p4 = pnand %p4922_p3, %p4919_p2 }
  0x33   :  { %4927 = shalt.err (!%p4924_p4)
}
  0x34   :  { %s4928_s0 = scalar_lea.vmem %s48_s27, 16  ;;  %s4932_s4 = scalar_lea.vmem %s48_s27, 32 }
  0x35   :  { %p4929_p5 = scmp.ne.s32.totalorder %s48_s27, %s4928_s0  ;;  %p4933_p6 = scmp.lt.s32.totalorder %s48_s27, %s48_s27 }
  0x36   :  { %p4934_p7 = scmp.lt.s32.totalorder %s4932_s4, %s4928_s0 }
  0x38   :  { %p4935_p8 = por %p4934_p7, %p4933_p6 }
  0x3a   :  { %p4936_p9 = pnand %p4935_p8, %p4929_p5 }
  0x3c   :  { %4939 = shalt.err (!%p4936_p9)
}
  0x3d   :  { %50 = dma.hbm_to_vmem [thread:$0]  %s5905_s6, 16, %s48_s27, [#allocation5]  }
  0x3e   :  { %s5021_s30 = smov [#allocation8]   ;;  %s5022_s22 = smov [#allocation11]  }
  0x3f   :  { %s70_s7 = sshll.u32 %s5021_s30, 4  ;;  %s110_s23 = sshll.u32 %s5022_s22, 4  ;;  %s71_s7 = int_to_ptr.vmem [resolvable:$true] %s70_s7  ;;  %s111_s23 = int_to_ptr.vmem [resolvable:$true] %s110_s23 }
  0x40   :  { %s4940_s24 = scalar_lea.hbm %s5908_s9, 2048 }
  0x41   :  { %p4941_p10 = scmp.ne.s32.totalorder %s5908_s9, %s4940_s24  ;;  %p4944_p11 = scmp.lt.u32.totalorder %s4940_s24, %s5908_s9 }
  0x43   :  { %p4946_p12 = pnand %p4944_p11, %p4941_p10 }
  0x45   :  { %4949 = shalt.err (!%p4946_p12)
}
  0x46   :  { %s4950_s6 = scalar_lea.vmem %s71_s7, 2048  ;;  %p4955_p0 = scmp.lt.s32.totalorder %s71_s7, %s71_s7 }
  0x47   :  { %p4951_p13 = scmp.ne.s32.totalorder %s71_s7, %s4950_s6  ;;  %p4956_p1 = scmp.lt.s32.totalorder %s4950_s6, %s4950_s6 }
  0x49   :  { %p4957_p2 = por %p4956_p1, %p4955_p0 }
  0x4b   :  { %p4958_p3 = pnand %p4957_p2, %p4951_p13 }
  0x4d   :  { %4961 = shalt.err (!%p4958_p3)
}
  0x4e   :  { %76 = dma.hbm_to_vmem [thread:$0]  %s5908_s9, 2048, %s71_s7, [#allocation7], %s5019_s25, %s5019_s25, %s5020_s5  }
  0x4f   :  { %s4962_s2 = scalar_lea.hbm %s5918_s19, 1024 }
  0x50   :  { %p4963_p4 = scmp.ne.s32.totalorder %s5918_s19, %s4962_s2  ;;  %p4966_p5 = scmp.lt.u32.totalorder %s4962_s2, %s5918_s19 }
  0x52   :  { %p4968_p6 = pnand %p4966_p5, %p4963_p4 }
  0x54   :  { %4971 = shalt.err (!%p4968_p6)
}
  0x55   :  { %s4972_s24 = scalar_lea.vmem %s111_s23, 1024  ;;  %p4977_p8 = scmp.lt.s32.totalorder %s111_s23, %s111_s23 }
  0x56   :  { %p4973_p7 = scmp.ne.s32.totalorder %s111_s23, %s4972_s24  ;;  %p4978_p9 = scmp.lt.s32.totalorder %s4972_s24, %s4972_s24 }
  0x58   :  { %p4979_p10 = por %p4978_p9, %p4977_p8 }
  0x5a   :  { %p4980_p11 = pnand %p4979_p10, %p4973_p7 }
  0x5c   :  { %4983 = shalt.err (!%p4980_p11)
}
  0x5d   :  { %116 = dma.hbm_to_vmem [thread:$0]  %s5918_s19, 1024, %s111_s23, [#allocation10], %s5019_s25, %s5019_s25, %s5020_s5  }
  0x5e   :  { %s5023_s26 = smov [#allocation12]   ;;  %s4984_s6 = scalar_lea.hbm %s5919_s20, 16 }
  0x5f   :  { %s123_s3 = sshll.u32 %s5023_s26, 4  ;;  %p4985_p12 = scmp.ne.s32.totalorder %s5919_s20, %s4984_s6  ;;  %s124_s3 = int_to_ptr.vmem [resolvable:$true] %s123_s3 }
  0x60   :  { %p4988_p13 = scmp.lt.u32.totalorder %s4984_s6, %s5919_s20 }
  0x62   :  { %p4990_p0 = pnand %p4988_p13, %p4985_p12 }
  0x64   :  { %4993 = shalt.err (!%p4990_p0)
}
  0x65   :  { %s4994_s2 = scalar_lea.vmem %s124_s3, 16  ;;  %s4998_s19 = scalar_lea.vmem %s124_s3, 32 }
  0x66   :  { %p4995_p1 = scmp.ne.s32.totalorder %s124_s3, %s4994_s2  ;;  %p4999_p2 = scmp.lt.s32.totalorder %s124_s3, %s124_s3 }
  0x67   :  { %p5000_p3 = scmp.lt.s32.totalorder %s4998_s19, %s4994_s2 }
  0x69   :  { %p5001_p4 = por %p5000_p3, %p4999_p2 }
  0x6b   :  { %p5002_p5 = pnand %p5001_p4, %p4995_p1 }
  0x6d   :  { %5005 = shalt.err (!%p5002_p5)
}
  0x6e   :  { %126 = dma.hbm_to_vmem [thread:$0]  %s5919_s20, 16, %s124_s3, [#allocation13]  }
  0x6f   :  { %5006 = dma.done.wait [#allocation5], 16  }
  0x70   :  { %5007 = vsyncadd [#allocation5], 4294967280 }
  0x71   :  { %5008 = dma.done.wait [#allocation7], 8192  }
  0x72   :  { %5009 = vsyncadd [#allocation7], 4294959104 }
  0x73   :  { %5010 = dma.done.wait [#allocation10], 5120  }
  0x74   :  { %5011 = vsyncadd [#allocation10], 4294962176 }
  0x75   :  { %5012 = dma.done.wait [#allocation13], 16  }
  0x76   :  { %5013 = vsyncadd [#allocation13], 4294967280  ;;  %v5024_v0 = vmov 0.0   ;;  %vm5025_vm0 = vmmov 0   ;;  %vm162_vm1 = vcmask 1042432   ;;  %s5930_s21 = sld [smem:[#allocation21_spill]] }
  0x77   :  { %4263 = vmatprep.subr.bf16.mxu0 %v5024_v0  ;;  %4265 = vmatprep.mubr.msk.bf16.mxu0 %vm5025_vm0, %v5024_v0  ;;  %s5931_s24 = sld [smem:[#allocation19_spill]]  ;;  %vm158_vm2 = vcmask 48128   ;;  %s5932_s28 = sld [smem:[#allocation22_spill]]  ;;  %v4606_v16 = vld [vmem:[#allocation6 + $0x4] ss:$12 sps:$4 sm:$0xff]   ;;  %v5026_v43 = vmov 0  }
  0x78   :  { %s5933_s27 = sld [smem:[#allocation20_spill]]  ;;  %v4608_v17 = vld [vmem:[#allocation6] ss:$12 sps:$4 sm:$0xff]   ;;  %v4609_v18 = vld [vmem:[#allocation6 + $0x8] ss:$12 sps:$4 sm:$0xff]   ;;  %433 = vmatprep.subr.bf16.mxu1 %v4606_v16  ;;  %465 = vmatprep.mubr.bf16.mxu1 %v5026_v43  ;;  %s5934_s15 = sld [smem:[#allocation23_spill]] }
  0x79   :  { %v4610_v19 = vld [vmem:[#allocation6 + $0x1c] ss:$12 sps:$4 sm:$0xff]   ;;  %434 = vmatpush1.bf16.msra.mxu1 %v4608_v17  ;;  %v4612_v28 = vld [vmem:[#allocation6 + $0x18] ss:$12 sps:$4 sm:$0xff]   ;;  %v4613_v29 = vld [vmem:[#allocation6 + $0x20] ss:$12 sps:$4 sm:$0xff]  }
  0x7a   :  { %435 = vmatprep.subr.bf16.mxu1 %v4610_v19  ;;  %v4614_v30 = vld [vmem:[#allocation6 + $0x34] ss:$12 sps:$4 sm:$0xff]   ;;  %v4616_v31 = vld [vmem:[#allocation6 + $0x30] ss:$12 sps:$4 sm:$0xff]   ;;  %v4617_v32 = vld [vmem:[#allocation6 + $0x38] ss:$12 sps:$4 sm:$0xff]  }
  0x7b   :  { %v4618_v33 = vld [vmem:[#allocation6 + $0x4c] ss:$12 sps:$4 sm:$0xff]   ;;  %v4620_v34 = vld [vmem:[#allocation6 + $0x48] ss:$12 sps:$4 sm:$0xff]   ;;  %v4621_v35 = vld [vmem:[#allocation6 + $0x50] ss:$12 sps:$4 sm:$0xff]  }
  0x7c   :  { %v150_v1 = vld [vmem:[%s5930_s21] sm:$0x7]  ;;  %v4622_v36 = vld [vmem:[#allocation6 + $0x64] ss:$12 sps:$4 sm:$0xff]   ;;  %v4625_v38 = vld [vmem:[#allocation6 + $0x68] ss:$12 sps:$4 sm:$0xff]  }
  0x7d   :  { %v147_v2 = vld [vmem:[%s5931_s24] sm:$0xff]  ;;  %v148_v3 = vld [vmem:[%s5931_s24 + $0x8] sm:$0xff]  ;;  %v164_v4 = vsel %vm162_vm1, %v150_v1, 0  ;;  %436 = vmatpush1.bf16.msra.mxu1 %v4612_v28  ;;  %vm523_vm3 = vcmask 261120   ;;  %vm650_vm4 = vcmask 1043456   ;;  %s5935_s30 = sld [smem:[#allocation18_spill]] }
  0x7e   :  { %v149_v5 = vpack.c.bf16 %v148_v3, %v147_v2  ;;  %4264 = vmatpush3.bf16.msra.mxu0 %v164_v4  ;;  %v3899_v6 = vld [vmem:[%s5932_s28] ss:$0 sm:$0xff]  ;;  %437 = vmatprep.subr.bf16.mxu1 %v4614_v30  ;;  %v4624_v37 = vld [vmem:[#allocation6 + $0x60] ss:$12 sps:$4 sm:$0xff]   ;;  %v4628_v40 = vld [vmem:[#allocation6 + $0x78] ss:$12 sps:$4 sm:$0xff]   ;;  %v251_v3 = vlaneseq }
  0x7f   :  { %4269 = vmatprep.subr.bf16.mxu0 %v5024_v0  ;;  %v207_v8 = vld [vmem:[%s5933_s27] sm:$0xff]  ;;  %v4634_v46 = vld [vmem:[#allocation6 + $0xac] ss:$12 sps:$4 sm:$0xff]   ;;  %v4636_v47 = vld [vmem:[#allocation6 + $0xa8] ss:$12 sps:$4 sm:$0xff]   ;;  %vm622_vm6 = vcmask 64512  }
  0x80   :  { %v4626_v39 = vld [vmem:[#allocation6 + $0x7c] ss:$12 sps:$4 sm:$0xff]   ;;  %v4629_v41 = vld [vmem:[#allocation6 + $0x80] ss:$12 sps:$4 sm:$0xff]   ;;  %v4633_v45 = vld [vmem:[#allocation6 + $0x98] ss:$12 sps:$4 sm:$0xff]  }
  0x81   :  { %4266 = vmatmul.mubr.msk.bf16.vlgmr.msra.gmra.mrb[0].mxu0 %vm158_vm2, %v149_v5  ;;  %438 = vmatpush1.bf16.msra.mxu1 %v4616_v31  ;;  %v4630_v42 = vld [vmem:[#allocation6 + $0x94] ss:$12 sps:$4 sm:$0xff]   ;;  %v4632_v44 = vld [vmem:[#allocation6 + $0x90] ss:$12 sps:$4 sm:$0xff]   ;;  %v5274_v4 = vshrl.u32 %v251_v3, 7  ;;  %s5027_s22 = smov 96  }
  0x82   :  { %4285 = vmatprep.mubr.msk.bf16.mxu0 %vm5025_vm0, %v5024_v0  ;;  %4270 = vmatpush3.bf16.msra.mxu0 %v4609_v18  ;;  %v4637_v48 = vld [vmem:[#allocation6 + $0xb0] ss:$12 sps:$4 sm:$0xff]   ;;  %s5028_s21 = smov 32   ;;  %vm1444_vm7 = vcmask 523264   ;;  %vm1447_vm8 = vcmask 785408   ;;  %s5938_s7 = sld [smem:[#allocation24_spill]] }
  0x83   :  { %4271 = vmatprep.subr.bf16.mxu0 %v5024_v0  ;;  %439 = vmatprep.subr.bf16.mxu1 %v4618_v33  ;;  %v3901_v57 = vld [vmem:[%s5934_s15] ss:$0 sm:$0xff]  ;;  %v5277_v5 = vsub.s32 1, %v5274_v4 }
  0x84   :  { %v3902_v61 = vld [vmem:[#allocation4] ss:$0 sm:$0xff] }
  0x85   :  { %440 = vmatpush1.bf16.msra.mxu1 %v4620_v34 }
  0x86   :  { %4272 = vmatpush3.bf16.msra.mxu0 %v4613_v29  ;;  %441 = vmatprep.subr.bf16.mxu1 %v4622_v36  ;;  %v252_v36 = vand.u32 127, %v251_v3 }
  0x87   :  { %4273 = vmatprep.subr.bf16.mxu0 %v5024_v0 }
  0x89   :  { %442 = vmatpush1.bf16.msra.mxu1 %v4624_v37  ;;  %v253_v37 = vstv %s5935_s30 }
  0x8a   :  { %4274 = vmatpush3.bf16.msra.mxu0 %v4617_v32  ;;  %443 = vmatprep.subr.bf16.mxu1 %v4626_v39  ;;  %vm5325_vm5 = vcmp.lt.s32.totalorder %v252_v36, %v253_v37 }
  0x8b   :  { %4275 = vmatprep.subr.bf16.mxu0 %v5024_v0 }
  0x8d   :  { %444 = vmatpush1.bf16.msra.mxu1 %v4628_v40 }
  0x8e   :  { %4276 = vmatpush3.bf16.msra.mxu0 %v4621_v35  ;;  %445 = vmatprep.subr.bf16.mxu1 %v4630_v42 }
  0x8f   :  { %4277 = vmatprep.subr.bf16.mxu0 %v5024_v0 }
  0x91   :  { %446 = vmatpush1.bf16.msra.mxu1 %v4632_v44 }
  0x92   :  { %4278 = vmatpush3.bf16.msra.mxu0 %v4625_v38  ;;  %447 = vmatprep.subr.bf16.mxu1 %v4634_v46 }
  0x93   :  { %4279 = vmatprep.subr.bf16.mxu0 %v5024_v0 }
  0x95   :  { %448 = vmatpush1.bf16.msra.mxu1 %v4636_v47 }
  0x96   :  { %4280 = vmatpush3.bf16.msra.mxu0 %v4629_v41  ;;  %4289 = vmatprep.subr.bf16.mxu1 %v5024_v0 }
  0x97   :  { %4281 = vmatprep.subr.bf16.mxu0 %v5024_v0 }
  0x9a   :  { %4282 = vmatpush3.bf16.msra.mxu0 %v4633_v45 }
  0x9b   :  { %4283 = vmatprep.subr.bf16.mxu0 %v5024_v0 }
  0x9e   :  { %4284 = vmatpush3.bf16.msra.mxu0 %v4637_v48 }
  0x9f   :  { %4295 = vmatprep.subr.bf16.mxu0 %v5024_v0 }
 0x154   :  { %v200_v7 = vpop.f32.mrb[0].mxu0 }
 0x155   :  { %v201_v9 = vadd.f32 %v3899_v6, %v200_v7  ;;  %v4267_v10 = vpop.f32.mrb[1].mxu0  ;;  %v300_v7 = vsub.s32 2, %v5274_v4 }
 0x156   :  { %v203_v11 = vpop.f32.mrb[2].mxu0 }
 0x157   :  { %v204_v12 = vadd.f32 %v3899_v6, %v203_v11  ;;  %v4268_v13 = vpop.f32.mrb[3].mxu0  ;;  %v208_v14 = vadd.f32 %v207_v8, %v201_v9  ;;  %v288_v6 = vld [vmem:[%s5907_s8] sm:$0x7]  ;;  %v5285_v9 = vsub.s32 0, %v5274_v4 }
 0x159   :  { %212 = vadd.xlane.f32.xlu0 %v208_v14  ;;  %v209_v15 = vadd.f32 %v207_v8, %v204_v12  ;;  %v297_v8 = vrot.slane %v288_v6, %v5277_v5 }
 0x15d   :  { %214 = vadd.xlane.f32.xlu0 %v209_v15 }
 0x1e6   :  { %v213_v20 = vpop.xlane.xlu0 %212 }
 0x1e7   :  { %v217_v21 = vmul.f32 0.0078125, %v213_v20  ;;  %v293_v20 = vrot.slane %v288_v6, %v5285_v9 }
 0x1e9   :  { %v5242_v22 = vsub.f32 %v208_v14, %v217_v21  ;;  %v301_v14 = vrot.slane %v288_v6, %v300_v7 }
 0x1ea   :  { %v215_v23 = vpop.xlane.xlu0 %214 }
 0x1eb   :  { %v218_v24 = vmul.f32 0.0078125, %v215_v23  ;;  %v221_v25 = vmul.f32 %v5242_v22, %v5242_v22 }
 0x1ed   :  { %v5246_v26 = vsub.f32 %v209_v15, %v218_v24  ;;  %223 = vadd.xlane.f32.xlu1 %v221_v25 }
 0x1ef   :  { %v222_v27 = vmul.f32 %v5246_v26, %v5246_v26 }
 0x1f1   :  { %225 = vadd.xlane.f32.xlu1 %v222_v27 }
 0x27a   :  { %v224_v49 = vpop.xlane.xlu1 %223 }
 0x27b   :  { %v227_v50 = vmul.f32 0.0078125, %v224_v49 }
 0x27d   :  { %v229_v51 = vadd.f32 1e-12, %v227_v50 }
 0x27e   :  { %v226_v52 = vpop.xlane.xlu1 %225 }
 0x27f   :  { %4774 = vrsqrt.f32 %v229_v51  ;;  %v228_v53 = vmul.f32 0.0078125, %v226_v52 }
 0x281   :  { %v230_v54 = vadd.f32 1e-12, %v228_v53 }
 0x283   :  { %4776 = vrsqrt.f32 %v230_v54 }
 0x289   :  { %v4775_v55 = vpop.eup %4774 }
 0x28a   :  { %v233_v56 = vmul.f32 %v4775_v55, %v5242_v22 }
 0x28c   :  { %v241_v60 = vmul.f32 %v3901_v57, %v233_v56 }
 0x28d   :  { %v4777_v58 = vpop.eup %4776 }
 0x28e   :  { %v234_v59 = vmul.f32 %v4777_v58, %v5246_v26  ;;  %v5264_v63 = vadd.f32 %v3902_v61, %v241_v60 }
 0x290   :  { %v242_v62 = vmul.f32 %v3901_v57, %v234_v59 }
 0x292   :  { %v5266_v1 = vadd.f32 %v3902_v61, %v242_v62 }
 0x294   :  { %v255_v2 = vpack.c.bf16 %v5266_v1, %v5264_v63 }
 0x296   :  { %466 = vmatmul.mubr.bf16.vlgmr.msra.gmra.mrb[0].mxu1 %v255_v2  ;;  %4286 = vmatmul.mubr.bf16.vlgmr.msra.gmra.mrb[4].mxu0 %v255_v2 }
 0x297   :  { %4291 = vmatprep.mubr.msk.bf16.mxu1 %vm5025_vm0, %v5024_v0  ;;  %4297 = vmatprep.mubr.msk.bf16.mxu0 %vm5025_vm0, %v5024_v0 }
 0x369   :  { %v467_v10 = vpop.f32.mrb[0].mxu1  ;;  %v510_v11 = vpop.f32.mrb[4].mxu0 }
 0x36a   :  { %v469_v12 = vpop.f32.mrb[1].mxu1  ;;  %v4287_v13 = vpop.f32.mrb[5].mxu0  ;;  %v511_v23 = vadd.f32 %v510_v11, %v301_v14  ;;  %v468_v26 = vadd.f32 %v467_v10, %v293_v20 }
 0x36b   :  { %v470_v15 = vadd.f32 %v469_v12, %v297_v8  ;;  %v471_v16 = vpop.f32.mrb[2].mxu1  ;;  %v513_v17 = vpop.f32.mrb[6].mxu0 }
 0x36c   :  { %v473_v18 = vpop.f32.mrb[3].mxu1  ;;  %v4288_v19 = vpop.f32.mrb[7].mxu0  ;;  %v514_v27 = vadd.f32 %v513_v17, %v301_v14  ;;  %v5299_v29 = vpack.c.bf16 %v511_v23, %v511_v23  ;;  %v472_v30 = vadd.f32 %v471_v16, %v293_v20  ;;  %v5302_v31 = vpack.c.bf16 %v468_v26, %v468_v26 }
 0x36d   :  { %v5290_v21 = vpack.c.bf16 %v470_v15, %v470_v15  ;;  %v474_v22 = vadd.f32 %v473_v18, %v297_v8 }
 0x36e   :  { %v5304_v32 = vpack.c.bf16 %v514_v27, %v514_v27  ;;  %v5306_v33 = vpack.c.bf16 %v472_v30, %v472_v30  ;;  %v652_v34 = vsel %vm650_vm4, %v5299_v29, 0 }
 0x36f   :  { %v5292_v24 = vpack.c.bf16 %v474_v22, %v474_v22  ;;  %v528_v25 = vsel %vm523_vm3, %v5290_v21, 0 }
 0x370   :  { %4290 = vmatpush3.bf16.xpose.msra.mxu1 %v528_v25  ;;  %v698_v35 = vsel %vm650_vm4, %v5304_v32, 0 }
 0x371   :  { %v574_v28 = vsel %vm523_vm3, %v5292_v24, 0  ;;  %4301 = vmatprep.subr.bf16.mxu1 %v5024_v0 }
 0x372   :  { %4296 = vmatpush3.bf16.xpose.msra.mxu0 %v574_v28 }
 0x373   :  { %4307 = vmatprep.subr.bf16.mxu0 %v5024_v0 }
 0x377   :  { %4292 = vmatmul.mubr.msk.bf16.vlgmr.msra.gmra.mrb[4].mxu1 %vm523_vm3, %v5302_v31 }
 0x378   :  { %4302 = vmatpush3.bf16.msra.mxu1 %v652_v34  ;;  %4303 = vmatprep.mubr.msk.bf16.mxu1 %vm5025_vm0, %v5024_v0 }
 0x379   :  { %4298 = vmatmul.mubr.msk.bf16.vlgmr.msra.gmra.mrb[8].mxu0 %vm523_vm3, %v5306_v33  ;;  %4313 = vmatprep.subr.bf16.mxu1 %v5024_v0 }
 0x37a   :  { %4308 = vmatpush3.bf16.msra.mxu0 %v698_v35  ;;  %4309 = vmatprep.mubr.msk.bf16.mxu0 %vm5025_vm0, %v5024_v0 }
 0x37b   :  { %4319 = vmatprep.subr.bf16.mxu0 %v5024_v0 }
 0x44a   :  { %v564_v39 = vpop.f32.mrb[4].mxu1 }
 0x44b   :  { %v616_v40 = vmul.f32 0.17677669, %v564_v39  ;;  %v4293_v41 = vpop.f32.mrb[5].mxu1 }
 0x44c   :  { %v567_v42 = vpop.f32.mrb[6].mxu1  ;;  %v610_v44 = vpop.f32.mrb[8].mxu0 }
 0x44d   :  { %v617_v45 = vmul.f32 0.17677669, %v610_v44  ;;  %v4294_v46 = vpop.f32.mrb[7].mxu1  ;;  %v4299_v47 = vpop.f32.mrb[9].mxu0  ;;  %v620_v48 = vsel %vm5325_vm5, %v616_v40, -1e+30 }
 0x44e   :  { %v613_v49 = vpop.f32.mrb[10].mxu0  ;;  %v623_v50 = vsel %vm622_vm6, %v620_v48, -inf }
 0x44f   :  { %624 = vmax.xlane.f32.xlu0 %v623_v50  ;;  %v4300_v51 = vpop.f32.mrb[11].mxu0  ;;  %v621_v52 = vsel %vm5325_vm5, %v617_v45, -1e+30 }
 0x450   :  { %v626_v53 = vsel %vm622_vm6, %v621_v52, -inf }
 0x451   :  { %627 = vmax.xlane.f32.xlu1 %v626_v53 }
 0x462   :  { %796 = vrot.lane.b32.xlu1 %v5292_v24, %s5027_s22 }
 0x4dc   :  { %v625_v54 = vpop.xlane.xlu0 %624 }
 0x4dd   :  { %v629_v55 = vsub.f32 %v620_v48, %v625_v54 }
 0x4de   :  { %v628_v56 = vpop.xlane.xlu1 %627 }
 0x4df   :  { %v631_v57 = vmul.f32 1.442695, %v629_v55  ;;  %v630_v58 = vsub.f32 %v621_v52, %v628_v56 }
 0x4e1   :  { %4778 = vpow2.f32 %v631_v57  ;;  %v633_v59 = vmul.f32 1.442695, %v630_v58 }
 0x4e2   :  { %v797_v3 = vpop.permute.xlu1 %796 }
 0x4e3   :  { %4780 = vpow2.f32 %v633_v59  ;;  %v802_v18 = vsel %vm523_vm3, %v797_v3, 0 }
 0x4eb   :  { %v4779_v60 = vpop.eup %4778 }
 0x4ec   :  { %v635_v61 = vsel %vm622_vm6, %v4779_v60, 0.0 }
 0x4ed   :  { %v4781_v62 = vpop.eup %4780  ;;  %636 = vadd.xlane.f32.xlu0 %v635_v61 }
 0x4ee   :  { %v638_v2 = vsel %vm622_vm6, %v4781_v62, 0.0 }
 0x4ef   :  { %639 = vadd.xlane.f32.xlu1 %v638_v2 }
 0x500   :  { %741 = vrot.lane.b32.xlu1 %v5302_v31, %s5027_s22 }
 0x503   :  { %744 = vrot.lane.b32.xlu0 %v5290_v21, %s5027_s22 }
 0x504   :  { %793 = vrot.lane.b32.xlu1 %v5306_v33, %s5027_s22 }
 0x57a   :  { %v637_v6 = vpop.xlane.xlu0 %636 }
 0x57b   :  { %4782 = vrcp.f32 %v637_v6 }
 0x57c   :  { %v640_v8 = vpop.xlane.xlu1 %639 }
 0x57d   :  { %4784 = vrcp.f32 %v640_v8 }
 0x57e   :  { %v745_v13 = vpop.permute.xlu0 %744 }
 0x57f   :  { %v750_v16 = vsel %vm523_vm3, %v745_v13, 0 }
 0x580   :  { %v742_v19 = vpop.permute.xlu1 %741 }
 0x584   :  { %v794_v20 = vpop.permute.xlu1 %793 }
 0x585   :  { %v4783_v10 = vpop.eup %4782 }
 0x586   :  { %v643_v11 = vmul.f32 %v4783_v10, %v4779_v60 }
 0x587   :  { %v4785_v12 = vpop.eup %4784 }
 0x588   :  { %v644_v14 = vmul.f32 %v4785_v12, %v4781_v62  ;;  %v645_v15 = vpack.c.bf16 %v643_v11, %v643_v11 }
 0x58a   :  { %4304 = vmatmul.mubr.msk.bf16.vlgmr.msra.gmra.mrb[8].mxu1 %vm622_vm6, %v645_v15  ;;  %v646_v17 = vpack.c.bf16 %v644_v14, %v644_v14 }
 0x58b   :  { %4314 = vmatpush3.bf16.xpose.msra.mxu1 %v750_v16  ;;  %4315 = vmatprep.mubr.msk.bf16.mxu1 %vm5025_vm0, %v5024_v0 }
 0x58c   :  { %4310 = vmatmul.mubr.msk.bf16.vlgmr.msra.gmra.mrb[12].mxu0 %vm622_vm6, %v646_v17  ;;  %4325 = vmatprep.subr.bf16.mxu1 %v5024_v0 }
 0x58d   :  { %4320 = vmatpush3.bf16.xpose.msra.mxu0 %v802_v18  ;;  %4321 = vmatprep.mubr.msk.bf16.mxu0 %vm5025_vm0, %v5024_v0 }
 0x58e   :  { %4331 = vmatprep.subr.bf16.mxu0 %v5024_v0 }
 0x592   :  { %4316 = vmatmul.mubr.msk.bf16.vlgmr.msra.gmra.mrb[12].mxu1 %vm523_vm3, %v742_v19 }
 0x593   :  { %4327 = vmatprep.mubr.msk.bf16.mxu1 %vm5025_vm0, %v5024_v0 }
 0x594   :  { %4322 = vmatmul.mubr.msk.bf16.vlgmr.msra.gmra.mrb[16].mxu0 %vm523_vm3, %v794_v20 }
 0x595   :  { %4333 = vmatprep.mubr.msk.bf16.mxu0 %vm5025_vm0, %v5024_v0 }
 0x65d   :  { %v5361_v22 = vpop.f32.mrb[8].mxu1 }
 0x65e   :  { %v4305_v23 = vpop.f32.mrb[9].mxu1 }
 0x65f   :  { %v691_v25 = vpop.f32.mrb[10].mxu1  ;;  %v5363_v26 = vpop.f32.mrb[12].mxu0 }
 0x660   :  { %v4306_v27 = vpop.f32.mrb[11].mxu1  ;;  %v4311_v28 = vpop.f32.mrb[13].mxu0 }
 0x661   :  { %v737_v30 = vpop.f32.mrb[14].mxu0 }
 0x662   :  { %v4312_v34 = vpop.f32.mrb[15].mxu0 }
 0x665   :  { %v786_v35 = vpop.f32.mrb[12].mxu1 }
 0x666   :  { %v844_v36 = vmul.f32 0.17677669, %v786_v35  ;;  %v4317_v37 = vpop.f32.mrb[13].mxu1 }
 0x667   :  { %v789_v39 = vpop.f32.mrb[14].mxu1  ;;  %v838_v40 = vpop.f32.mrb[16].mxu0 }
 0x668   :  { %v845_v41 = vmul.f32 0.17677669, %v838_v40  ;;  %v4318_v42 = vpop.f32.mrb[15].mxu1  ;;  %v4323_v44 = vpop.f32.mrb[17].mxu0  ;;  %v846_v45 = vsel %vm5325_vm5, %v844_v36, -1e+30 }
 0x669   :  { %v841_v46 = vpop.f32.mrb[18].mxu0  ;;  %v848_v47 = vsel %vm622_vm6, %v846_v45, -inf }
 0x66a   :  { %849 = vmax.xlane.f32.xlu0 %v848_v47  ;;  %v4324_v48 = vpop.f32.mrb[19].mxu0  ;;  %v847_v49 = vsel %vm5325_vm5, %v845_v41, -1e+30 }
 0x66b   :  { %v851_v50 = vsel %vm622_vm6, %v847_v49, -inf }
 0x66c   :  { %852 = vmax.xlane.f32.xlu1 %v851_v50 }
 0x67d   :  { %922 = vrot.lane.b32.xlu1 %v5304_v32, %s5027_s22 }
 0x681   :  { %972 = vrot.lane.b32.xlu1 %v5290_v21, %s5019_s25 }
 0x685   :  { %1022 = vrot.lane.b32.xlu1 %v5292_v24, %s5019_s25 }
 0x689   :  { %1020 = vrot.lane.b32.xlu1 %v5306_v33, %s5019_s25 }
 0x6f7   :  { %v850_v51 = vpop.xlane.xlu0 %849 }
 0x6f8   :  { %v854_v52 = vsub.f32 %v846_v45, %v850_v51 }
 0x6f9   :  { %v853_v53 = vpop.xlane.xlu1 %852 }
 0x6fa   :  { %v856_v54 = vmul.f32 1.442695, %v854_v52  ;;  %v855_v55 = vsub.f32 %v847_v49, %v853_v53 }
 0x6fc   :  { %4786 = vpow2.f32 %v856_v54  ;;  %v858_v56 = vmul.f32 1.442695, %v855_v55 }
 0x6fd   :  { %v923_v57 = vpop.permute.xlu1 %922 }
 0x6fe   :  { %4788 = vpow2.f32 %v858_v56  ;;  %v928_v58 = vsel %vm650_vm4, %v923_v57, 0 }
 0x6ff   :  { %4332 = vmatpush3.bf16.msra.mxu0 %v928_v58 }
 0x700   :  { %4343 = vmatprep.subr.bf16.mxu0 %v5024_v0 }
 0x701   :  { %v973_v11 = vpop.permute.xlu1 %972 }
 0x702   :  { %v978_v17 = vsel %vm523_vm3, %v973_v11, 0 }
 0x705   :  { %v1023_v16 = vpop.permute.xlu1 %1022 }
 0x706   :  { %v4787_v59 = vpop.eup %4786  ;;  %v1028_v19 = vsel %vm523_vm3, %v1023_v16, 0 }
 0x707   :  { %v860_v60 = vsel %vm622_vm6, %v4787_v59, 0.0 }
 0x708   :  { %v4789_v61 = vpop.eup %4788  ;;  %861 = vadd.xlane.f32.xlu0 %v860_v60 }
 0x709   :  { %v863_v62 = vsel %vm622_vm6, %v4789_v61, 0.0  ;;  %v1021_v23 = vpop.permute.xlu1 %1020 }
 0x70c   :  { %864 = vadd.xlane.f32.xlu0 %v863_v62 }
 0x722   :  { %873 = vrot.lane.b32.xlu0 %v5299_v29, %s5027_s22 }
 0x726   :  { %970 = vrot.lane.b32.xlu0 %v5302_v31, %s5019_s25 }
 0x795   :  { %v862_v2 = vpop.xlane.xlu0 %861 }
 0x796   :  { %4790 = vrcp.f32 %v862_v2 }
 0x799   :  { %v865_v3 = vpop.xlane.xlu0 %864 }
 0x79a   :  { %4792 = vrcp.f32 %v865_v3 }
 0x79d   :  { %v874_v6 = vpop.permute.xlu0 %873 }
 0x79e   :  { %v879_v8 = vsel %vm650_vm4, %v874_v6, 0 }
 0x79f   :  { %4326 = vmatpush3.bf16.msra.mxu1 %v879_v8 }
 0x7a0   :  { %v4791_v10 = vpop.eup %4790  ;;  %4337 = vmatprep.subr.bf16.mxu1 %v5024_v0 }
 0x7a1   :  { %v868_v12 = vmul.f32 %v4791_v10, %v4787_v59  ;;  %v971_v20 = vpop.permute.xlu0 %970 }
 0x7a3   :  { %v870_v13 = vpack.c.bf16 %v868_v12, %v868_v12 }
 0x7a4   :  { %v4793_v14 = vpop.eup %4792 }
 0x7a5   :  { %v869_v15 = vmul.f32 %v4793_v14, %v4789_v61  ;;  %4328 = vmatmul.mubr.msk.bf16.vlgmr.msra.gmra.mrb[16].mxu1 %vm622_vm6, %v870_v13 }
 0x7a6   :  { %4339 = vmatprep.mubr.msk.bf16.mxu1 %vm5025_vm0, %v5024_v0 }
 0x7a7   :  { %v871_v18 = vpack.c.bf16 %v869_v15, %v869_v15 }
 0x7a8   :  { %4338 = vmatpush3.bf16.xpose.msra.mxu1 %v978_v17 }
 0x7a9   :  { %4334 = vmatmul.mubr.msk.bf16.vlgmr.msra.gmra.mrb[20].mxu0 %vm622_vm6, %v871_v18  ;;  %4349 = vmatprep.subr.bf16.mxu1 %v5024_v0 }
 0x7aa   :  { %4344 = vmatpush3.bf16.xpose.msra.mxu0 %v1028_v19  ;;  %4345 = vmatprep.mubr.msk.bf16.mxu0 %vm5025_vm0, %v5024_v0 }
 0x7ab   :  { %4355 = vmatprep.subr.bf16.mxu0 %v5024_v0 }
 0x7af   :  { %4340 = vmatmul.mubr.msk.bf16.vlgmr.msra.gmra.mrb[20].mxu1 %vm523_vm3, %v971_v20 }
 0x7b0   :  { %4351 = vmatprep.mubr.msk.bf16.mxu1 %vm5025_vm0, %v5024_v0 }
 0x7b1   :  { %4346 = vmatmul.mubr.msk.bf16.vlgmr.msra.gmra.mrb[24].mxu0 %vm523_vm3, %v1021_v23 }
 0x7b2   :  { %4357 = vmatprep.mubr.msk.bf16.mxu0 %vm5025_vm0, %v5024_v0 }
 0x878   :  { %v5405_v25 = vpop.f32.mrb[16].mxu1 }
 0x879   :  { %v4329_v27 = vpop.f32.mrb[17].mxu1 }
 0x87a   :  { %v918_v28 = vpop.f32.mrb[18].mxu1 }
 0x87b   :  { %v4330_v30 = vpop.f32.mrb[19].mxu1 }
 0x87c   :  { %v5407_v34 = vpop.f32.mrb[20].mxu0 }
 0x87d   :  { %v4576_v35 = vpack.i.bf16 %v5407_v34, %v5405_v25  ;;  %v4335_v36 = vpop.f32.mrb[21].mxu0 }
 0x87e   :  { %v967_v37 = vpop.f32.mrb[22].mxu0 }
 0x87f   :  { %v4336_v39 = vpop.f32.mrb[23].mxu0 }
 0x882   :  { %v1014_v40 = vpop.f32.mrb[20].mxu1 }
 0x883   :  { %v1070_v41 = vmul.f32 0.17677669, %v1014_v40  ;;  %v4341_v42 = vpop.f32.mrb[21].mxu1 }
 0x884   :  { %v1017_v44 = vpop.f32.mrb[22].mxu1  ;;  %v1064_v45 = vpop.f32.mrb[24].mxu0 }
 0x885   :  { %v1071_v46 = vmul.f32 0.17677669, %v1064_v45  ;;  %v4342_v47 = vpop.f32.mrb[23].mxu1  ;;  %v4347_v48 = vpop.f32.mrb[25].mxu0  ;;  %v1072_v49 = vsel %vm5325_vm5, %v1070_v41, -1e+30 }
 0x886   :  { %v1067_v50 = vpop.f32.mrb[26].mxu0  ;;  %v1074_v51 = vsel %vm622_vm6, %v1072_v49, -inf }
 0x887   :  { %1075 = vmax.xlane.f32.xlu0 %v1074_v51  ;;  %v4348_v52 = vpop.f32.mrb[27].mxu0  ;;  %v1073_v53 = vsel %vm5325_vm5, %v1071_v46, -1e+30 }
 0x888   :  { %v1077_v54 = vsel %vm622_vm6, %v1073_v53, -inf }
 0x889   :  { %1078 = vmax.xlane.f32.xlu1 %v1077_v54 }
 0x89a   :  { %1146 = vrot.lane.b32.xlu1 %v5304_v32, %s5019_s25 }
 0x89e   :  { %1196 = vrot.lane.b32.xlu1 %v5290_v21, %s5028_s21 }
 0x8a2   :  { %1246 = vrot.lane.b32.xlu1 %v5292_v24, %s5028_s21 }
 0x8a6   :  { %1244 = vrot.lane.b32.xlu1 %v5306_v33, %s5028_s21 }
 0x914   :  { %v1076_v55 = vpop.xlane.xlu0 %1075 }
 0x915   :  { %v1080_v56 = vsub.f32 %v1072_v49, %v1076_v55 }
 0x916   :  { %v1079_v57 = vpop.xlane.xlu1 %1078 }
 0x917   :  { %v1082_v58 = vmul.f32 1.442695, %v1080_v56  ;;  %v1081_v59 = vsub.f32 %v1073_v53, %v1079_v57 }
 0x919   :  { %4794 = vpow2.f32 %v1082_v58  ;;  %v1084_v60 = vmul.f32 1.442695, %v1081_v59 }
 0x91a   :  { %v1147_v61 = vpop.permute.xlu1 %1146 }
 0x91b   :  { %4796 = vpow2.f32 %v1084_v60  ;;  %v1152_v62 = vsel %vm650_vm4, %v1147_v61, 0 }
 0x91c   :  { %4356 = vmatpush3.bf16.msra.mxu0 %v1152_v62 }
 0x91d   :  { %4367 = vmatprep.subr.bf16.mxu0 %v5024_v0 }
 0x91e   :  { %v1197_v12 = vpop.permute.xlu1 %1196 }
 0x922   :  { %v1247_v17 = vpop.permute.xlu1 %1246 }
 0x923   :  { %v4795_v21 = vpop.eup %4794  ;;  %v1252_v19 = vsel %vm523_vm3, %v1247_v17, 0  ;;  %v4640_v17 = vld [vmem:[#allocation8 + $0x10] sm:$0xff]  }
 0x924   :  { %v1086_v24 = vsel %vm622_vm6, %v4795_v21, 0.0 }
 0x925   :  { %v4797_v2 = vpop.eup %4796  ;;  %1087 = vadd.xlane.f32.xlu0 %v1086_v24 }
 0x926   :  { %v1089_v33 = vsel %vm622_vm6, %v4797_v2, 0.0  ;;  %v1245_v23 = vpop.permute.xlu1 %1244 }
 0x929   :  { %1090 = vadd.xlane.f32.xlu0 %v1089_v33 }
 0x93f   :  { %1098 = vrot.lane.b32.xlu0 %v5299_v29, %s5019_s25 }
 0x943   :  { %1194 = vrot.lane.b32.xlu0 %v5302_v31, %s5028_s21  ;;  %v1202_v31 = vsel %vm523_vm3, %v1197_v12, 0 }
 0x9b2   :  { %v1088_v3 = vpop.xlane.xlu0 %1087 }
 0x9b3   :  { %4798 = vrcp.f32 %v1088_v3 }
 0x9b6   :  { %v1091_v6 = vpop.xlane.xlu0 %1090 }
 0x9b7   :  { %4800 = vrcp.f32 %v1091_v6 }
 0x9ba   :  { %v1099_v8 = vpop.permute.xlu0 %1098 }
 0x9bb   :  { %v1104_v10 = vsel %vm650_vm4, %v1099_v8, 0 }
 0x9bc   :  { %4350 = vmatpush3.bf16.msra.mxu1 %v1104_v10 }
 0x9bd   :  { %v4799_v11 = vpop.eup %4798  ;;  %4361 = vmatprep.subr.bf16.mxu1 %v5024_v0 }
 0x9be   :  { %v1094_v13 = vmul.f32 %v4799_v11, %v4795_v21  ;;  %v1195_v20 = vpop.permute.xlu0 %1194 }
 0x9c0   :  { %v1096_v14 = vpack.c.bf16 %v1094_v13, %v1094_v13 }
 0x9c1   :  { %v4801_v15 = vpop.eup %4800 }
 0x9c2   :  { %v1095_v16 = vmul.f32 %v4801_v15, %v4797_v2  ;;  %4352 = vmatmul.mubr.msk.bf16.vlgmr.msra.gmra.mrb[24].mxu1 %vm622_vm6, %v1096_v14  ;;  %v4638_v15 = vld [vmem:[#allocation8] sm:$0xff]  }
 0x9c3   :  { %4363 = vmatprep.mubr.msk.bf16.mxu1 %vm5025_vm0, %v5024_v0 }
 0x9c4   :  { %v1097_v18 = vpack.c.bf16 %v1095_v16, %v1095_v16  ;;  %v4639_v16 = vld [vmem:[#allocation8 + $0x8] sm:$0xff]  }
 0x9c5   :  { %4362 = vmatpush3.bf16.xpose.msra.mxu1 %v1202_v31  ;;  %v4641_v31 = vld [vmem:[#allocation8 + $0x18] sm:$0xff]  }
 0x9c6   :  { %4358 = vmatmul.mubr.msk.bf16.vlgmr.msra.gmra.mrb[28].mxu0 %vm622_vm6, %v1097_v18  ;;  %4373 = vmatprep.subr.bf16.mxu1 %v5024_v0  ;;  %v4642_v18 = vld [vmem:[#allocation8 + $0x20] sm:$0xff]  }
 0x9c7   :  { %4368 = vmatpush3.bf16.xpose.msra.mxu0 %v1252_v19  ;;  %4369 = vmatprep.mubr.msk.bf16.mxu0 %vm5025_vm0, %v5024_v0  ;;  %v4643_v19 = vld [vmem:[#allocation8 + $0x28] sm:$0xff]  }
 0x9c8   :  { %4379 = vmatprep.subr.bf16.mxu0 %v5024_v0 }
 0x9cc   :  { %4364 = vmatmul.mubr.msk.bf16.vlgmr.msra.gmra.mrb[28].mxu1 %vm523_vm3, %v1195_v20  ;;  %v4644_v20 = vld [vmem:[#allocation8 + $0x30] sm:$0xff]  }
 0x9cd   :  { %4375 = vmatprep.mubr.msk.bf16.mxu1 %vm5025_vm0, %v5024_v0 }
 0x9ce   :  { %4370 = vmatmul.mubr.msk.bf16.vlgmr.msra.gmra.mrb[32].mxu0 %vm523_vm3, %v1245_v23  ;;  %v4645_v23 = vld [vmem:[#allocation8 + $0x38] sm:$0xff]  }
 0x9cf   :  { %4381 = vmatprep.mubr.msk.bf16.mxu0 %vm5025_vm0, %v5024_v0 }
 0xa95   :  { %v1140_v27 = vpop.f32.mrb[24].mxu1 }
 0xa96   :  { %v4353_v28 = vpop.f32.mrb[25].mxu1 }
 0xa97   :  { %v1143_v30 = vpop.f32.mrb[26].mxu1 }
 0xa98   :  { %v4354_v36 = vpop.f32.mrb[27].mxu1 }
 0xa99   :  { %v1188_v37 = vpop.f32.mrb[28].mxu0 }
 0xa9a   :  { %v4581_v39 = vpack.i.bf16 %v1188_v37, %v1140_v27  ;;  %v4359_v40 = vpop.f32.mrb[29].mxu0 }
 0xa9b   :  { %v1191_v41 = vpop.f32.mrb[30].mxu0 }
 0xa9c   :  { %v4360_v42 = vpop.f32.mrb[31].mxu0 }
 0xa9f   :  { %v1238_v44 = vpop.f32.mrb[28].mxu1 }
 0xaa0   :  { %v1294_v45 = vmul.f32 0.17677669, %v1238_v44  ;;  %v4365_v46 = vpop.f32.mrb[29].mxu1 }
 0xaa1   :  { %v1241_v47 = vpop.f32.mrb[30].mxu1  ;;  %v1288_v48 = vpop.f32.mrb[32].mxu0 }
 0xaa2   :  { %v1295_v49 = vmul.f32 0.17677669, %v1288_v48  ;;  %v4366_v50 = vpop.f32.mrb[31].mxu1  ;;  %v4371_v51 = vpop.f32.mrb[33].mxu0  ;;  %v1296_v52 = vsel %vm5325_vm5, %v1294_v45, -1e+30 }
 0xaa3   :  { %v1291_v53 = vpop.f32.mrb[34].mxu0  ;;  %v1298_v54 = vsel %vm622_vm6, %v1296_v52, -inf }
 0xaa4   :  { %1299 = vmax.xlane.f32.xlu0 %v1298_v54  ;;  %v4372_v55 = vpop.f32.mrb[35].mxu0  ;;  %v1297_v56 = vsel %vm5325_vm5, %v1295_v49, -1e+30 }
 0xaa5   :  { %v1301_v57 = vsel %vm622_vm6, %v1297_v56, -inf }
 0xaa6   :  { %1302 = vmax.xlane.f32.xlu1 %v1301_v57 }
 0xab7   :  { %1370 = vrot.lane.b32.xlu1 %v5304_v32, %s5028_s21 }
 0xabb   :  { %4577 = vrot.lane.b32.xlu1 %v4576_v35, %s5028_s21 }
 0xabf   :  { %4582 = vrot.lane.b32.xlu1 %v4581_v39, %s5019_s25 }
 0xb31   :  { %v1300_v58 = vpop.xlane.xlu0 %1299 }
 0xb32   :  { %v1304_v59 = vsub.f32 %v1296_v52, %v1300_v58 }
 0xb33   :  { %v1303_v60 = vpop.xlane.xlu1 %1302 }
 0xb34   :  { %v1306_v61 = vmul.f32 1.442695, %v1304_v59  ;;  %v1305_v62 = vsub.f32 %v1297_v56, %v1303_v60  ;;  %v3943_v60 = vld [vmem:[%s5909_s10] ss:$0 sm:$0xff] }
 0xb36   :  { %4802 = vpow2.f32 %v1306_v61  ;;  %v1308_v21 = vmul.f32 1.442695, %v1305_v62 }
 0xb37   :  { %v1371_v24 = vpop.permute.xlu1 %1370 }
 0xb38   :  { %4804 = vpow2.f32 %v1308_v21  ;;  %v1376_v2 = vsel %vm650_vm4, %v1371_v24, 0 }
 0xb39   :  { %4380 = vmatpush3.bf16.msra.mxu0 %v1376_v2 }
 0xb3b   :  { %v4578_v44 = vpop.permute.xlu1 %4577 }
 0xb3c   :  { %v4580_v46 = vunpack.i.h.bf16 %v4578_v44  ;;  %v4579_v47 = vunpack.i.l.bf16 %v4578_v44  ;;  %v3952_v44 = vld [vmem:[%s5910_s11] ss:$0 sm:$0xff] }
 0xb3e   :  { %v1443_v51 = vsel %vm523_vm3, %v5363_v26, %v4580_v46  ;;  %v1442_v52 = vsel %vm523_vm3, %v5361_v22, %v4579_v47 }
 0xb3f   :  { %v4583_v45 = vpop.permute.xlu1 %4582 }
 0xb40   :  { %v4803_v32 = vpop.eup %4802  ;;  %v4585_v48 = vunpack.i.h.bf16 %v4583_v45  ;;  %v4584_v49 = vunpack.i.l.bf16 %v4583_v45 }
 0xb41   :  { %v1310_v33 = vsel %vm622_vm6, %v4803_v32, 0.0 }
 0xb42   :  { %v4805_v3 = vpop.eup %4804  ;;  %1311 = vadd.xlane.f32.xlu0 %v1310_v33  ;;  %v1445_v55 = vsel %vm1444_vm7, %v1442_v52, %v4584_v49  ;;  %v1446_v56 = vsel %vm1444_vm7, %v1443_v51, %v4585_v48  ;;  %v4646_v33 = vld [vmem:[%s5912_s13] ss:$8 sps:$4 sm:$0xff]  }
 0xb43   :  { %v1313_v25 = vsel %vm622_vm6, %v4805_v3, 0.0  ;;  %v3953_v48 = vld [vmem:[%s5911_s12] ss:$0 sm:$0xff] }
 0xb46   :  { %1314 = vadd.xlane.f32.xlu0 %v1313_v25  ;;  %v4651_v25 = vld [vmem:[%s5912_s13 + $0x14] ss:$8 sps:$4 sm:$0xff]  }
 0xb5c   :  { %1322 = vrot.lane.b32.xlu0 %v5299_v29, %s5028_s21 }
 0xbcf   :  { %v1312_v34 = vpop.xlane.xlu0 %1311 }
 0xbd0   :  { %4806 = vrcp.f32 %v1312_v34 }
 0xbd3   :  { %v1315_v35 = vpop.xlane.xlu0 %1314 }
 0xbd4   :  { %4808 = vrcp.f32 %v1315_v35 }
 0xbd7   :  { %v1323_v6 = vpop.permute.xlu0 %1322 }
 0xbd8   :  { %v1328_v8 = vsel %vm650_vm4, %v1323_v6, 0 }
 0xbd9   :  { %4374 = vmatpush3.bf16.msra.mxu1 %v1328_v8 }
 0xbda   :  { %v4807_v10 = vpop.eup %4806  ;;  %4385 = vmatprep.subr.bf16.mxu1 %v5024_v0 }
 0xbdb   :  { %v1318_v11 = vmul.f32 %v4807_v10, %v4803_v32 }
 0xbdd   :  { %v1320_v12 = vpack.c.bf16 %v1318_v11, %v1318_v11 }
 0xbde   :  { %v4809_v13 = vpop.eup %4808 }
 0xbdf   :  { %v1319_v14 = vmul.f32 %v4809_v13, %v4805_v3  ;;  %4376 = vmatmul.mubr.msk.bf16.vlgmr.msra.gmra.mrb[32].mxu1 %vm622_vm6, %v1320_v12  ;;  %v4648_v3 = vld [vmem:[%s5912_s13 + $0x4] ss:$8 sps:$4 sm:$0xff]  }
 0xbe0   :  { %4401 = vmatprep.mubr.msk.bf16.mxu1 %vm5025_vm0, %v5024_v0  ;;  %4386 = vmatpush3.bf16.msra.mxu1 %v4638_v15  ;;  %v4654_v13 = vld [vmem:[%s5912_s13 + $0x24] ss:$8 sps:$4 sm:$0xff]   ;;  %v4655_v15 = vld [vmem:[%s5912_s13 + $0x30] ss:$8 sps:$4 sm:$0xff]  }
 0xbe1   :  { %v1321_v29 = vpack.c.bf16 %v1319_v14, %v1319_v14  ;;  %4387 = vmatprep.subr.bf16.mxu1 %v5024_v0  ;;  %1714 = vmatprep.subr.bf16.mxu0 %v4648_v3  ;;  %v4652_v14 = vld [vmem:[%s5912_s13 + $0x20] ss:$8 sps:$4 sm:$0xff]  }
 0xbe3   :  { %4382 = vmatmul.mubr.msk.bf16.vlgmr.msra.gmra.mrb[36].mxu0 %vm622_vm6, %v1321_v29  ;;  %v4657_v29 = vld [vmem:[%s5912_s13 + $0x34] ss:$8 sps:$4 sm:$0xff]  }
 0xbe4   :  { %1746 = vmatprep.mubr.bf16.mxu0 %v5026_v43  ;;  %4388 = vmatpush3.bf16.msra.mxu1 %v4639_v16  ;;  %v4660_v16 = vld [vmem:[%s5912_s13 + $0x44] ss:$8 sps:$4 sm:$0xff]  }
 0xbe5   :  { %4389 = vmatprep.subr.bf16.mxu1 %v5024_v0  ;;  %1715 = vmatpush1.bf16.msra.mxu0 %v4646_v33  ;;  %v1622_v33 = vld [vmem:[%s5913_s14] sm:$0x3] }
 0xbe6   :  { %1716 = vmatprep.subr.bf16.mxu0 %v4651_v25  ;;  %v1627_v3 = vrot.slane %v1622_v33, %v5285_v9  ;;  %v1631_v25 = vrot.slane %v1622_v33, %v5277_v5 }
 0xbe8   :  { %4390 = vmatpush3.bf16.msra.mxu1 %v4640_v17  ;;  %v4658_v17 = vld [vmem:[%s5912_s13 + $0x40] ss:$8 sps:$4 sm:$0xff]  }
 0xbe9   :  { %4391 = vmatprep.subr.bf16.mxu1 %v5024_v0 }
 0xbec   :  { %4392 = vmatpush3.bf16.msra.mxu1 %v4641_v31  ;;  %v4663_v31 = vld [vmem:[%s5912_s13 + $0x54] ss:$8 sps:$4 sm:$0xff]  }
 0xbed   :  { %4393 = vmatprep.subr.bf16.mxu1 %v5024_v0 }
 0xbf0   :  { %4394 = vmatpush3.bf16.msra.mxu1 %v4642_v18  ;;  %v4661_v18 = vld [vmem:[%s5912_s13 + $0x50] ss:$8 sps:$4 sm:$0xff]  }
 0xbf1   :  { %4395 = vmatprep.subr.bf16.mxu1 %v5024_v0 }
 0xbf4   :  { %4396 = vmatpush3.bf16.msra.mxu1 %v4643_v19  ;;  %v4666_v19 = vld [vmem:[%s5912_s13 + $0x64] ss:$8 sps:$4 sm:$0xff]  }
 0xbf5   :  { %4397 = vmatprep.subr.bf16.mxu1 %v5024_v0 }
 0xbf8   :  { %4398 = vmatpush3.bf16.msra.mxu1 %v4644_v20  ;;  %v4664_v20 = vld [vmem:[%s5912_s13 + $0x60] ss:$8 sps:$4 sm:$0xff]  }
 0xbf9   :  { %4399 = vmatprep.subr.bf16.mxu1 %v5024_v0 }
 0xbfc   :  { %4400 = vmatpush3.bf16.msra.mxu1 %v4645_v23  ;;  %v4669_v23 = vld [vmem:[%s5912_s13 + $0x74] ss:$8 sps:$4 sm:$0xff]  }
 0xcb2   :  { %v1364_v27 = vpop.f32.mrb[32].mxu1 }
 0xcb3   :  { %v4377_v28 = vpop.f32.mrb[33].mxu1 }
 0xcb4   :  { %v1367_v30 = vpop.f32.mrb[34].mxu1 }
 0xcb5   :  { %v4378_v36 = vpop.f32.mrb[35].mxu1 }
 0xcb6   :  { %v1412_v37 = vpop.f32.mrb[36].mxu0 }
 0xcb7   :  { %v4586_v39 = vpack.i.bf16 %v1412_v37, %v1364_v27  ;;  %v4383_v40 = vpop.f32.mrb[37].mxu0  ;;  %v4667_v27 = vld [vmem:[%s5912_s13 + $0x70] ss:$8 sps:$4 sm:$0xff]  }
 0xcb8   :  { %v1415_v41 = vpop.f32.mrb[38].mxu0 }
 0xcb9   :  { %4587 = vrot.lane.b32.xlu0 %v4586_v39, %s5027_s22  ;;  %v4384_v42 = vpop.f32.mrb[39].mxu0 }
 0xd2b   :  { %v4588_v50 = vpop.permute.xlu0 %4587 }
 0xd2c   :  { %v4590_v53 = vunpack.i.h.bf16 %v4588_v50  ;;  %v4589_v54 = vunpack.i.l.bf16 %v4588_v50 }
 0xd2e   :  { %v1449_v57 = vsel %vm1447_vm8, %v1446_v56, %v4590_v53  ;;  %v1448_v58 = vsel %vm1447_vm8, %v1445_v55, %v4589_v54  ;;  %v4670_v53 = vld [vmem:[#allocation9 + $0x40] sm:$0xff]   ;;  %v4672_v55 = vld [vmem:[#allocation9 + $0x48] sm:$0xff]  }
 0xd2f   :  { %v1450_v59 = vpack.c.bf16 %v1449_v57, %v1448_v58  ;;  %v4671_v54 = vld [vmem:[#allocation9] sm:$0xff]   ;;  %4160 = vmatprep.subr.bf16.mxu1 %v4670_v53  ;;  %v4673_v56 = vld [vmem:[#allocation9 + $0x8] sm:$0xff]   ;;  %v4674_v57 = vld [vmem:[#allocation9 + $0x50] sm:$0xff]  }
 0xd30   :  { %v4675_v58 = vld [vmem:[#allocation9 + $0x10] sm:$0xff]  }
 0xd31   :  { %4402 = vmatmul.mubr.bf16.vlgmr.msra.gmra.mrb[36].mxu1 %v1450_v59  ;;  %v4676_v59 = vld [vmem:[#allocation9 + $0x58] sm:$0xff]  }
 0xd32   :  { %4161 = vmatpush3.bf16.msra.mxu1 %v4671_v54 }
 0xd33   :  { %4162 = vmatprep.subr.bf16.mxu1 %v4672_v55 }
 0xd36   :  { %4163 = vmatpush3.bf16.msra.mxu1 %v4673_v56 }
 0xd37   :  { %4164 = vmatprep.subr.bf16.mxu1 %v4674_v57 }
 0xd3a   :  { %4165 = vmatpush3.bf16.msra.mxu1 %v4675_v58 }
 0xd3b   :  { %4166 = vmatprep.subr.bf16.mxu1 %v4676_v59 }
 0xe04   :  { %v1556_v26 = vpop.f32.mrb[36].mxu1 }
 0xe05   :  { %v1557_v61 = vadd.f32 %v3943_v60, %v1556_v26  ;;  %v4403_v62 = vpop.f32.mrb[37].mxu1  ;;  %v4678_v26 = vld [vmem:[#allocation9 + $0x60] sm:$0xff]  }
 0xe06   :  { %v1559_v22 = vpop.f32.mrb[38].mxu1  ;;  %v4680_v62 = vld [vmem:[#allocation9 + $0x68] sm:$0xff]  }
 0xe07   :  { %v1560_v21 = vadd.f32 %v3943_v60, %v1559_v22  ;;  %v4404_v24 = vpop.f32.mrb[39].mxu1  ;;  %v1563_v2 = vadd.f32 %v1557_v61, %v5264_v63  ;;  %v4649_v63 = vld [vmem:[%s5912_s13 + $0x10] ss:$8 sps:$4 sm:$0xff]   ;;  %v4679_v61 = vld [vmem:[#allocation9 + $0x20] sm:$0xff]  }
 0xe08   :  { %1717 = vmatpush1.bf16.msra.mxu0 %v4649_v63  ;;  %v4677_v60 = vld [vmem:[#allocation9 + $0x18] sm:$0xff]   ;;  %v4681_v22 = vld [vmem:[#allocation9 + $0x28] sm:$0xff]   ;;  %v4683_v24 = vld [vmem:[#allocation9 + $0x30] sm:$0xff]  }
 0xe09   :  { %1567 = vadd.xlane.f32.xlu1 %v1563_v2  ;;  %v1564_v32 = vadd.f32 %v1560_v21, %v5266_v1  ;;  %1718 = vmatprep.subr.bf16.mxu0 %v4654_v13  ;;  %v4682_v21 = vld [vmem:[#allocation9 + $0x70] sm:$0xff]  }
 0xe0a   :  { %4167 = vmatpush3.bf16.msra.mxu1 %v4677_v60 }
 0xe0b   :  { %1569 = vadd.xlane.f32.xlu0 %v1564_v32  ;;  %4168 = vmatprep.subr.bf16.mxu1 %v4678_v26 }
 0xe0c   :  { %1719 = vmatpush1.bf16.msra.mxu0 %v4652_v14 }
 0xe0d   :  { %1720 = vmatprep.subr.bf16.mxu0 %v4657_v29 }
 0xe0e   :  { %4169 = vmatpush3.bf16.msra.mxu1 %v4679_v61 }
 0xe0f   :  { %4170 = vmatprep.subr.bf16.mxu1 %v4680_v62 }
 0xe10   :  { %1721 = vmatpush1.bf16.msra.mxu0 %v4655_v15 }
 0xe11   :  { %1722 = vmatprep.subr.bf16.mxu0 %v4660_v16 }
 0xe12   :  { %4171 = vmatpush3.bf16.msra.mxu1 %v4681_v22  ;;  %v3970_v22 = vld [vmem:[%s5915_s16] ss:$0 sm:$0xff] }
 0xe13   :  { %4172 = vmatprep.subr.bf16.mxu1 %v4682_v21 }
 0xe14   :  { %1723 = vmatpush1.bf16.msra.mxu0 %v4658_v17 }
 0xe15   :  { %1724 = vmatprep.subr.bf16.mxu0 %v4663_v31 }
 0xe16   :  { %4173 = vmatpush3.bf16.msra.mxu1 %v4683_v24 }
 0xe18   :  { %1725 = vmatpush1.bf16.msra.mxu0 %v4661_v18 }
 0xe19   :  { %1726 = vmatprep.subr.bf16.mxu0 %v4666_v19 }
 0xe1c   :  { %1727 = vmatpush1.bf16.msra.mxu0 %v4664_v20 }
 0xe1d   :  { %1728 = vmatprep.subr.bf16.mxu0 %v4669_v23 }
 0xe20   :  { %1729 = vmatpush1.bf16.msra.mxu0 %v4667_v27 }
 0xe96   :  { %v1568_v1 = vpop.xlane.xlu1 %1567 }
 0xe97   :  { %v1571_v34 = vmul.f32 0.0078125, %v1568_v1 }
 0xe98   :  { %v1570_v35 = vpop.xlane.xlu0 %1569 }
 0xe99   :  { %v1573_v6 = vsub.f32 %v1563_v2, %v1571_v34  ;;  %v1572_v8 = vmul.f32 0.0078125, %v1570_v35  ;;  %v4684_v2 = vld [vmem:[#allocation9 + $0x78] sm:$0xff]  }
 0xe9a   :  { %4174 = vmatprep.subr.bf16.mxu1 %v4684_v2 }
 0xe9b   :  { %v1574_v10 = vsub.f32 %v1564_v32, %v1572_v8  ;;  %v1575_v11 = vmul.f32 %v1573_v6, %v1573_v6  ;;  %v4685_v32 = vld [vmem:[#allocation9 + $0x38] sm:$0xff]  }
 0xe9c   :  { %4175 = vmatpush3.bf16.msra.mxu1 %v4685_v32 }
 0xe9d   :  { %1577 = vadd.xlane.f32.xlu0 %v1575_v11  ;;  %v1576_v12 = vmul.f32 %v1574_v10, %v1574_v10  ;;  %4405 = vmatprep.subr.bf16.mxu1 %v5024_v0 }
 0xea1   :  { %1579 = vadd.xlane.f32.xlu0 %v1576_v12 }
 0xf2a   :  { %v1578_v28 = vpop.xlane.xlu0 %1577 }
 0xf2b   :  { %v1581_v30 = vmul.f32 0.0078125, %v1578_v28 }
 0xf2d   :  { %v1583_v36 = vadd.f32 1e-12, %v1581_v30 }
 0xf2e   :  { %v1580_v37 = vpop.xlane.xlu0 %1579 }
 0xf2f   :  { %4810 = vrsqrt.f32 %v1583_v36  ;;  %v1582_v39 = vmul.f32 0.0078125, %v1580_v37 }
 0xf31   :  { %v1584_v40 = vadd.f32 1e-12, %v1582_v39 }
 0xf33   :  { %4812 = vrsqrt.f32 %v1584_v40 }
 0xf39   :  { %v4811_v41 = vpop.eup %4810 }
 0xf3a   :  { %v1587_v42 = vmul.f32 %v4811_v41, %v1573_v6 }
 0xf3c   :  { %v1595_v47 = vmul.f32 %v3952_v44, %v1587_v42 }
 0xf3d   :  { %v4813_v45 = vpop.eup %4812 }
 0xf3e   :  { %v1588_v46 = vmul.f32 %v4813_v45, %v1574_v10  ;;  %v5551_v50 = vadd.f32 %v3953_v48, %v1595_v47 }
 0xf40   :  { %v1596_v49 = vmul.f32 %v3952_v44, %v1588_v46 }
 0xf42   :  { %v5553_v51 = vadd.f32 %v3953_v48, %v1596_v49 }
 0xf44   :  { %v1605_v52 = vpack.c.bf16 %v5553_v51, %v5551_v50 }
 0xf46   :  { %1747 = vmatmul.mubr.bf16.vlgmr.msra.gmra.mrb[40].mxu0 %v1605_v52 }
 0xf47   :  { %2225 = vmatprep.mubr.bf16.mxu0 %v5026_v43 }
0x1019   :  { %v1748_v63 = vpop.f32.mrb[40].mxu0 }
0x101a   :  { %v1749_v1 = vadd.f32 %v1748_v63, %v1627_v3  ;;  %v1750_v34 = vpop.f32.mrb[41].mxu0 }
0x101b   :  { %v1751_v35 = vadd.f32 %v1750_v34, %v1631_v25  ;;  %v1752_v6 = vpop.f32.mrb[42].mxu0  ;;  %v4686_v34 = vld [vmem:[#allocation6 + $0xc0] ss:$12 sps:$4 sm:$0xff]  }
0x101c   :  { %v1761_v8 = vmul.f32 0.044715, %v1749_v1  ;;  %v1753_v10 = vadd.f32 %v1752_v6, %v1627_v3  ;;  %v1754_v11 = vpop.f32.mrb[43].mxu0  ;;  %v1757_v49 = vmul.f32 0.5, %v1749_v1  ;;  %v4689_v6 = vld [vmem:[#allocation6 + $0xc8] ss:$12 sps:$4 sm:$0xff]  }
0x101d   :  { %v1762_v12 = vmul.f32 0.044715, %v1751_v35  ;;  %v1755_v13 = vadd.f32 %v1754_v11, %v1631_v25  ;;  %v1758_v54 = vmul.f32 0.5, %v1751_v35  ;;  %v4690_v11 = vld [vmem:[#allocation6 + $0xd8] ss:$12 sps:$4 sm:$0xff]  }
0x101e   :  { %v1765_v14 = vmul.f32 %v1761_v8, %v1749_v1  ;;  %v1763_v29 = vmul.f32 0.044715, %v1753_v10  ;;  %v1759_v52 = vmul.f32 0.5, %v1753_v10  ;;  %v4692_v8 = vld [vmem:[#allocation6 + $0xdc] ss:$12 sps:$4 sm:$0xff]  }
0x101f   :  { %v1766_v15 = vmul.f32 %v1762_v12, %v1751_v35  ;;  %v1764_v16 = vmul.f32 0.044715, %v1755_v13  ;;  %v1760_v55 = vmul.f32 0.5, %v1755_v13 }
0x1020   :  { %v1769_v17 = vmul.f32 %v1765_v14, %v1749_v1  ;;  %v1767_v31 = vmul.f32 %v1763_v29, %v1753_v10 }
0x1021   :  { %v1770_v18 = vmul.f32 %v1766_v15, %v1751_v35  ;;  %v1768_v19 = vmul.f32 %v1764_v16, %v1755_v13 }
0x1022   :  { %v1773_v20 = vadd.f32 %v1769_v17, %v1749_v1  ;;  %v1771_v23 = vmul.f32 %v1767_v31, %v1753_v10  ;;  %v4696_v17 = vld [vmem:[#allocation6 + $0xf4] ss:$12 sps:$4 sm:$0xff]   ;;  %v4694_v31 = vld [vmem:[#allocation6 + $0xf0] ss:$12 sps:$4 sm:$0xff]  }
0x1023   :  { %v1772_v27 = vmul.f32 %v1768_v19, %v1755_v13  ;;  %v1774_v28 = vadd.f32 %v1770_v18, %v1751_v35  ;;  %v4688_v35 = vld [vmem:[#allocation6 + $0xc4] ss:$12 sps:$4 sm:$0xff]   ;;  %v4700_v19 = vld [vmem:[#allocation6 + $0x10c] ss:$12 sps:$4 sm:$0xff]  }
0x1024   :  { %v1777_v30 = vmul.f32 0.7978846, %v1773_v20  ;;  %v1775_v36 = vadd.f32 %v1771_v23, %v1753_v10  ;;  %2193 = vmatprep.subr.bf16.mxu0 %v4688_v35  ;;  %v4693_v10 = vld [vmem:[#allocation6 + $0xe0] ss:$12 sps:$4 sm:$0xff]   ;;  %v4697_v18 = vld [vmem:[#allocation6 + $0xf8] ss:$12 sps:$4 sm:$0xff]  }
0x1025   :  { %v1776_v37 = vadd.f32 %v1772_v27, %v1755_v13  ;;  %v1778_v39 = vmul.f32 0.7978846, %v1774_v28  ;;  %2194 = vmatpush1.bf16.msra.mxu0 %v4686_v34  ;;  %v4698_v20 = vld [vmem:[#allocation6 + $0x108] ss:$12 sps:$4 sm:$0xff]   ;;  %v4701_v23 = vld [vmem:[#allocation6 + $0x110] ss:$12 sps:$4 sm:$0xff]  }
0x1026   :  { %4814 = vtanh.f32 %v1777_v30  ;;  %v1779_v40 = vmul.f32 0.7978846, %v1775_v36  ;;  %2195 = vmatprep.subr.bf16.mxu0 %v4692_v8  ;;  %v4704_v27 = vld [vmem:[#allocation6 + $0x124] ss:$12 sps:$4 sm:$0xff]   ;;  %v4702_v28 = vld [vmem:[#allocation6 + $0x120] ss:$12 sps:$4 sm:$0xff]  }
0x1027   :  { %v1780_v41 = vmul.f32 0.7978846, %v1776_v37  ;;  %4816 = vtanh.f32 %v1778_v39  ;;  %v4705_v30 = vld [vmem:[#allocation6 + $0x128] ss:$12 sps:$4 sm:$0xff]   ;;  %v4706_v37 = vld [vmem:[#allocation6 + $0x138] ss:$12 sps:$4 sm:$0xff]  }
0x1028   :  { %4818 = vtanh.f32 %v1779_v40  ;;  %v4708_v36 = vld [vmem:[#allocation6 + $0x13c] ss:$12 sps:$4 sm:$0xff]   ;;  %v4709_v39 = vld [vmem:[#allocation6 + $0x140] ss:$12 sps:$4 sm:$0xff]  }
0x1029   :  { %4820 = vtanh.f32 %v1780_v41  ;;  %2196 = vmatpush1.bf16.msra.mxu0 %v4690_v11  ;;  %v4712_v40 = vld [vmem:[#allocation6 + $0x154] ss:$12 sps:$4 sm:$0xff]   ;;  %v4710_v41 = vld [vmem:[#allocation6 + $0x150] ss:$12 sps:$4 sm:$0xff]  }
0x102a   :  { %2197 = vmatprep.subr.bf16.mxu0 %v4696_v17 }
0x102d   :  { %2198 = vmatpush1.bf16.msra.mxu0 %v4694_v31 }
0x102e   :  { %2199 = vmatprep.subr.bf16.mxu0 %v4700_v19 }
0x1030   :  { %v4815_v42 = vpop.eup %4814 }
0x1031   :  { %v4817_v44 = vpop.eup %4816  ;;  %v1785_v45 = vadd.f32 1.0, %v4815_v42  ;;  %2200 = vmatpush1.bf16.msra.mxu0 %v4698_v20  ;;  %v4713_v42 = vld [vmem:[#allocation6 + $0x158] ss:$12 sps:$4 sm:$0xff]  }
0x1032   :  { %v4819_v46 = vpop.eup %4818  ;;  %v1786_v47 = vadd.f32 1.0, %v4817_v44  ;;  %2201 = vmatprep.subr.bf16.mxu0 %v4704_v27  ;;  %v4716_v44 = vld [vmem:[#allocation6 + $0x16c] ss:$12 sps:$4 sm:$0xff]  }
0x1033   :  { %v4821_v48 = vpop.eup %4820  ;;  %v1787_v53 = vadd.f32 1.0, %v4819_v46  ;;  %v1789_v57 = vmul.f32 %v1785_v45, %v1757_v49  ;;  %v4714_v45 = vld [vmem:[#allocation6 + $0x168] ss:$12 sps:$4 sm:$0xff]   ;;  %v4717_v46 = vld [vmem:[#allocation6 + $0x170] ss:$12 sps:$4 sm:$0xff]  }
0x1034   :  { %v1788_v56 = vadd.f32 1.0, %v4821_v48  ;;  %v1790_v59 = vmul.f32 %v1786_v47, %v1758_v54 }
0x1035   :  { %v1791_v58 = vmul.f32 %v1787_v53, %v1759_v52  ;;  %2202 = vmatpush1.bf16.msra.mxu0 %v4702_v28 }
0x1036   :  { %v1792_v60 = vmul.f32 %v1788_v56, %v1760_v55  ;;  %2203 = vmatprep.subr.bf16.mxu0 %v4708_v36  ;;  %v3987_v56 = vld [vmem:[%s5916_s17] ss:$0 sm:$0xff] }
0x1037   :  { %v1793_v26 = vpack.c.bf16 %v1791_v58, %v1789_v57 }
0x1038   :  { %v1794_v61 = vpack.c.bf16 %v1792_v60, %v1790_v59 }
0x1039   :  { %2204 = vmatpush1.bf16.msra.mxu0 %v4706_v37 }
0x103a   :  { %1962 = vmatprep.mubr.bf16.mxu1 %v1794_v61  ;;  %2205 = vmatprep.subr.bf16.mxu0 %v4712_v40 }
0x103b   :  { %1963 = vmatmul.mubr.bf16.vlgmr.msra.gmra.mrb[40].mxu1 %v1793_v26  ;;  %v3988_v26 = vld [vmem:[%s5917_s18] ss:$0 sm:$0xff] }
0x103c   :  { %4421 = vmatprep.mubr.msk.bf16.mxu1 %vm5025_vm0, %v5024_v0  ;;  %4406 = vmatpush3.bf16.msra.mxu1 %v4689_v6 }
0x103d   :  { %4407 = vmatprep.subr.bf16.mxu1 %v5024_v0  ;;  %2206 = vmatpush1.bf16.msra.mxu0 %v4710_v41 }
0x103e   :  { %2207 = vmatprep.subr.bf16.mxu0 %v4716_v44 }
0x1040   :  { %4408 = vmatpush3.bf16.msra.mxu1 %v4693_v10 }
0x1041   :  { %4409 = vmatprep.subr.bf16.mxu1 %v5024_v0  ;;  %2208 = vmatpush1.bf16.msra.mxu0 %v4714_v45 }
0x1042   :  { %4425 = vmatprep.subr.bf16.mxu0 %v5024_v0 }
0x1044   :  { %4410 = vmatpush3.bf16.msra.mxu1 %v4697_v18 }
0x1045   :  { %4411 = vmatprep.subr.bf16.mxu1 %v5024_v0 }
0x1048   :  { %4412 = vmatpush3.bf16.msra.mxu1 %v4701_v23 }
0x1049   :  { %4413 = vmatprep.subr.bf16.mxu1 %v5024_v0 }
0x104c   :  { %4414 = vmatpush3.bf16.msra.mxu1 %v4705_v30 }
0x104d   :  { %4415 = vmatprep.subr.bf16.mxu1 %v5024_v0 }
0x1050   :  { %4416 = vmatpush3.bf16.msra.mxu1 %v4709_v39 }
0x1051   :  { %4417 = vmatprep.subr.bf16.mxu1 %v5024_v0 }
0x1054   :  { %4418 = vmatpush3.bf16.msra.mxu1 %v4713_v42 }
0x1055   :  { %4419 = vmatprep.subr.bf16.mxu1 %v5024_v0 }
0x1058   :  { %4420 = vmatpush3.bf16.msra.mxu1 %v4717_v46 }
0x1059   :  { %4449 = vmatprep.subr.bf16.mxu1 %v5024_v0 }
0x110e   :  { %v4176_v62 = vpop.f32.mrb[40].mxu1 }
0x110f   :  { %v4177_v21 = vpop.f32.mrb[41].mxu1 }
0x1110   :  { %v4178_v24 = vadd.f32 %v4177_v21, %v4176_v62  ;;  %v4179_v2 = vpop.f32.mrb[42].mxu1 }
0x1111   :  { %v4180_v32 = vpop.f32.mrb[43].mxu1 }
0x1112   :  { %v1965_v33 = vadd.f32 %v4178_v24, %v3970_v22  ;;  %v4181_v3 = vadd.f32 %v4180_v32, %v4179_v2  ;;  %v3989_v24 = vld [vmem:[%s5907_s8 + $0x3] sm:$0x7] }
0x1113   :  { %v2057_v2 = vrot.slane %v3989_v24, %v5277_v5  ;;  %v2053_v11 = vrot.slane %v3989_v24, %v5285_v9 }
0x1114   :  { %v1968_v25 = vadd.f32 %v4181_v3, %v3970_v22  ;;  %v1971_v63 = vadd.f32 %v1965_v33, %v5551_v50  ;;  %v2061_v3 = vrot.slane %v3989_v24, %v300_v7 }
0x1116   :  { %1975 = vadd.xlane.f32.xlu1 %v1971_v63  ;;  %v1972_v1 = vadd.f32 %v1968_v25, %v5553_v51 }
0x1118   :  { %1977 = vadd.xlane.f32.xlu0 %v1972_v1 }
0x11a3   :  { %v1976_v50 = vpop.xlane.xlu1 %1975 }
0x11a4   :  { %v1979_v12 = vmul.f32 0.0078125, %v1976_v50 }
0x11a5   :  { %v1978_v51 = vpop.xlane.xlu0 %1977 }
0x11a6   :  { %v1981_v13 = vsub.f32 %v1971_v63, %v1979_v12  ;;  %v1980_v14 = vmul.f32 0.0078125, %v1978_v51 }
0x11a8   :  { %v1982_v29 = vsub.f32 %v1972_v1, %v1980_v14  ;;  %v1983_v15 = vmul.f32 %v1981_v13, %v1981_v13 }
0x11aa   :  { %1985 = vadd.xlane.f32.xlu1 %v1983_v15  ;;  %v1984_v16 = vmul.f32 %v1982_v29, %v1982_v29 }
0x11ac   :  { %1987 = vadd.xlane.f32.xlu0 %v1984_v16 }
0x1237   :  { %v1986_v47 = vpop.xlane.xlu1 %1985 }
0x1238   :  { %v1989_v48 = vmul.f32 0.0078125, %v1986_v47 }
0x1239   :  { %v1988_v49 = vpop.xlane.xlu0 %1987 }
0x123a   :  { %v1991_v52 = vadd.f32 1e-12, %v1989_v48  ;;  %v1990_v53 = vmul.f32 0.0078125, %v1988_v49 }
0x123c   :  { %4822 = vrsqrt.f32 %v1991_v52  ;;  %v1992_v54 = vadd.f32 1e-12, %v1990_v53 }
0x123e   :  { %4824 = vrsqrt.f32 %v1992_v54 }
0x1246   :  { %v4823_v55 = vpop.eup %4822 }
0x1247   :  { %v1995_v57 = vmul.f32 %v4823_v55, %v1981_v13 }
0x1248   :  { %v4825_v58 = vpop.eup %4824 }
0x1249   :  { %v1996_v59 = vmul.f32 %v4825_v58, %v1982_v29  ;;  %v2003_v60 = vmul.f32 %v3987_v56, %v1995_v57 }
0x124b   :  { %v2004_v61 = vmul.f32 %v3987_v56, %v1996_v59  ;;  %v5586_v62 = vadd.f32 %v3988_v26, %v2003_v60 }
0x124d   :  { %v5588_v22 = vadd.f32 %v3988_v26, %v2004_v61 }
0x124f   :  { %v2013_v21 = vpack.c.bf16 %v5588_v22, %v5586_v62 }
0x1251   :  { %2226 = vmatmul.mubr.bf16.vlgmr.msra.gmra.mrb[44].mxu0 %v2013_v21  ;;  %4422 = vmatmul.mubr.bf16.vlgmr.msra.gmra.mrb[44].mxu1 %v2013_v21 }
0x1252   :  { %4427 = vmatprep.mubr.msk.bf16.mxu0 %vm5025_vm0, %v5024_v0  ;;  %4451 = vmatprep.mubr.msk.bf16.mxu1 %vm5025_vm0, %v5024_v0 }
0x1324   :  { %v2227_v32 = vpop.f32.mrb[44].mxu0  ;;  %v2270_v33 = vpop.f32.mrb[44].mxu1 }
0x1325   :  { %v2229_v25 = vpop.f32.mrb[45].mxu0  ;;  %v4423_v63 = vpop.f32.mrb[45].mxu1  ;;  %v2228_v4 = vadd.f32 %v2227_v32, %v2053_v11  ;;  %v2271_v14 = vadd.f32 %v2270_v33, %v2061_v3 }
0x1326   :  { %v2230_v1 = vadd.f32 %v2229_v25, %v2057_v2  ;;  %v2231_v34 = vpop.f32.mrb[46].mxu0  ;;  %v2273_v35 = vpop.f32.mrb[46].mxu1 }
0x1327   :  { %v5602_v6 = vadd.f32 %v2273_v35, %v2061_v3  ;;  %v2233_v8 = vpop.f32.mrb[47].mxu0  ;;  %v4424_v10 = vpop.f32.mrb[47].mxu1  ;;  %v5612_v13 = vpack.c.bf16 %v2228_v4, %v2228_v4  ;;  %v2232_v15 = vadd.f32 %v2231_v34, %v2053_v11  ;;  %v5621_v16 = vpack.c.bf16 %v2271_v14, %v2271_v14 }
0x1328   :  { %v5605_v50 = vpack.c.bf16 %v2230_v1, %v2230_v1  ;;  %v2234_v12 = vadd.f32 %v2233_v8, %v2057_v2 }
0x1329   :  { %v5623_v17 = vpack.c.bf16 %v2232_v15, %v2232_v15  ;;  %v2407_v31 = vsel %vm650_vm4, %v5621_v16, 0  ;;  %v5652_v61 = vpack.c.bf16 %v5602_v6, %v5602_v6 }
0x132a   :  { %v2287_v51 = vsel %vm523_vm3, %v5605_v50, 0  ;;  %v5610_v7 = vpack.c.bf16 %v2234_v12, %v2234_v12 }
0x132b   :  { %4426 = vmatpush3.bf16.xpose.msra.mxu0 %v2287_v51  ;;  %v2453_v32 = vsel %vm650_vm4, %v5652_v61, 0 }
0x132c   :  { %4431 = vmatprep.subr.bf16.mxu0 %v5024_v0  ;;  %v2333_v29 = vsel %vm523_vm3, %v5610_v7, 0 }
0x1332   :  { %4428 = vmatmul.mubr.msk.bf16.vlgmr.msra.gmra.mrb[48].mxu0 %vm523_vm3, %v5612_v13 }
0x1333   :  { %4432 = vmatpush3.bf16.xpose.msra.mxu0 %v2333_v29  ;;  %4433 = vmatprep.mubr.msk.bf16.mxu0 %vm5025_vm0, %v5024_v0 }
0x1334   :  { %4437 = vmatprep.subr.bf16.mxu0 %v5024_v0 }
0x133a   :  { %4434 = vmatmul.mubr.msk.bf16.vlgmr.msra.gmra.mrb[52].mxu0 %vm523_vm3, %v5623_v17 }
0x133b   :  { %4438 = vmatpush3.bf16.msra.mxu0 %v2407_v31  ;;  %4439 = vmatprep.mubr.msk.bf16.mxu0 %vm5025_vm0, %v5024_v0 }
0x133c   :  { %4443 = vmatprep.subr.bf16.mxu0 %v5024_v0 }
0x1405   :  { %v2323_v18 = vpop.f32.mrb[48].mxu0 }
0x1406   :  { %v2375_v19 = vmul.f32 0.17677669, %v2323_v18  ;;  %v4429_v20 = vpop.f32.mrb[49].mxu0 }
0x1407   :  { %v2326_v23 = vpop.f32.mrb[50].mxu0 }
0x1408   :  { %v4430_v27 = vpop.f32.mrb[51].mxu0  ;;  %v2377_v28 = vsel %vm5325_vm5, %v2375_v19, -1e+30 }
0x1409   :  { %v2379_v30 = vsel %vm622_vm6, %v2377_v28, -inf }
0x140a   :  { %2380 = vmax.xlane.f32.xlu1 %v2379_v30 }
0x140d   :  { %v2369_v36 = vpop.f32.mrb[52].mxu0 }
0x140e   :  { %v2376_v37 = vmul.f32 0.17677669, %v2369_v36  ;;  %v4435_v39 = vpop.f32.mrb[53].mxu0 }
0x140f   :  { %v2372_v40 = vpop.f32.mrb[54].mxu0 }
0x1410   :  { %v4436_v41 = vpop.f32.mrb[55].mxu0  ;;  %v2378_v42 = vsel %vm5325_vm5, %v2376_v37, -1e+30 }
0x1411   :  { %v2382_v44 = vsel %vm622_vm6, %v2378_v42, -inf }
0x1412   :  { %2383 = vmax.xlane.f32.xlu0 %v2382_v44 }
0x1497   :  { %v2381_v45 = vpop.xlane.xlu1 %2380 }
0x1498   :  { %v2385_v46 = vsub.f32 %v2377_v28, %v2381_v45 }
0x149a   :  { %v2387_v47 = vmul.f32 1.442695, %v2385_v46 }
0x149c   :  { %4826 = vpow2.f32 %v2387_v47 }
0x149f   :  { %v2384_v48 = vpop.xlane.xlu0 %2383 }
0x14a0   :  { %v2386_v49 = vsub.f32 %v2378_v42, %v2384_v48 }
0x14a2   :  { %v2389_v52 = vmul.f32 1.442695, %v2386_v49 }
0x14a4   :  { %4828 = vpow2.f32 %v2389_v52 }
0x14a6   :  { %v4827_v53 = vpop.eup %4826 }
0x14a7   :  { %v2391_v54 = vsel %vm622_vm6, %v4827_v53, 0.0 }
0x14a8   :  { %2392 = vadd.xlane.f32.xlu1 %v2391_v54 }
0x14ae   :  { %v4829_v55 = vpop.eup %4828 }
0x14af   :  { %v2394_v56 = vsel %vm622_vm6, %v4829_v55, 0.0 }
0x14b0   :  { %2395 = vadd.xlane.f32.xlu0 %v2394_v56 }
0x14b9   :  { %2499 = vrot.lane.b32.xlu1 %v5605_v50, %s5027_s22 }
0x14bd   :  { %2496 = vrot.lane.b32.xlu1 %v5612_v13, %s5027_s22 }
0x14c1   :  { %2548 = vrot.lane.b32.xlu1 %v5623_v17, %s5027_s22 }
0x14c6   :  { %2551 = vrot.lane.b32.xlu0 %v5610_v7, %s5027_s22 }
0x1535   :  { %v2393_v57 = vpop.xlane.xlu1 %2392 }
0x1536   :  { %4830 = vrcp.f32 %v2393_v57 }
0x1539   :  { %v2500_v58 = vpop.permute.xlu1 %2499 }
0x153a   :  { %v2505_v59 = vsel %vm523_vm3, %v2500_v58, 0 }
0x153b   :  { %4450 = vmatpush3.bf16.xpose.msra.mxu1 %v2505_v59 }
0x153c   :  { %4461 = vmatprep.subr.bf16.mxu1 %v5024_v0 }
0x153d   :  { %v2396_v60 = vpop.xlane.xlu0 %2395  ;;  %v2497_v24 = vpop.permute.xlu1 %2496 }
0x153e   :  { %4832 = vrcp.f32 %v2396_v60 }
0x1540   :  { %v4831_v26 = vpop.eup %4830 }
0x1541   :  { %v2399_v21 = vmul.f32 %v4831_v26, %v4827_v53  ;;  %v2552_v25 = vpop.permute.xlu0 %2551  ;;  %v2549_v34 = vpop.permute.xlu1 %2548 }
0x1542   :  { %4452 = vmatmul.mubr.msk.bf16.vlgmr.msra.gmra.mrb[48].mxu1 %vm523_vm3, %v2497_v24  ;;  %v2557_v1 = vsel %vm523_vm3, %v2552_v25, 0 }
0x1543   :  { %v2401_v2 = vpack.c.bf16 %v2399_v21, %v2399_v21  ;;  %4463 = vmatprep.mubr.msk.bf16.mxu1 %vm5025_vm0, %v5024_v0 }
0x1545   :  { %4440 = vmatmul.mubr.msk.bf16.vlgmr.msra.gmra.mrb[56].mxu0 %vm622_vm6, %v2401_v2 }
0x1546   :  { %4444 = vmatpush3.bf16.msra.mxu0 %v2453_v32  ;;  %4445 = vmatprep.mubr.msk.bf16.mxu0 %vm5025_vm0, %v5024_v0 }
0x1547   :  { %4455 = vmatprep.subr.bf16.mxu0 %v5024_v0 }
0x1548   :  { %v4833_v33 = vpop.eup %4832 }
0x1549   :  { %v2400_v3 = vmul.f32 %v4833_v33, %v4829_v55 }
0x154b   :  { %v2402_v63 = vpack.c.bf16 %v2400_v3, %v2400_v3 }
0x154d   :  { %4446 = vmatmul.mubr.msk.bf16.vlgmr.msra.gmra.mrb[60].mxu0 %vm622_vm6, %v2402_v63 }
0x154e   :  { %4457 = vmatprep.mubr.msk.bf16.mxu0 %vm5025_vm0, %v5024_v0 }
0x154f   :  { %4456 = vmatpush3.bf16.xpose.msra.mxu0 %v2557_v1 }
0x1550   :  { %4467 = vmatprep.subr.bf16.mxu0 %v5024_v0 }
0x1556   :  { %4458 = vmatmul.mubr.msk.bf16.vlgmr.msra.gmra.mrb[64].mxu0 %vm523_vm3, %v2549_v34 }
0x1557   :  { %4469 = vmatprep.mubr.msk.bf16.mxu0 %vm5025_vm0, %v5024_v0 }
0x1615   :  { %v2541_v35 = vpop.f32.mrb[48].mxu1 }
0x1616   :  { %v2599_v6 = vmul.f32 0.17677669, %v2541_v35  ;;  %v4453_v8 = vpop.f32.mrb[49].mxu1 }
0x1617   :  { %v2544_v10 = vpop.f32.mrb[50].mxu1 }
0x1618   :  { %v5671_v11 = vpop.f32.mrb[56].mxu0  ;;  %v4454_v12 = vpop.f32.mrb[51].mxu1  ;;  %v2601_v51 = vsel %vm5325_vm5, %v2599_v6, -1e+30 }
0x1619   :  { %v4441_v4 = vpop.f32.mrb[57].mxu0  ;;  %v2603_v14 = vsel %vm622_vm6, %v2601_v51, -inf }
0x161a   :  { %2604 = vmax.xlane.f32.xlu1 %v2603_v14  ;;  %v2446_v29 = vpop.f32.mrb[58].mxu0 }
0x161b   :  { %v4442_v15 = vpop.f32.mrb[59].mxu0 }
0x1620   :  { %v5676_v31 = vpop.f32.mrb[60].mxu0 }
0x1621   :  { %v4447_v18 = vpop.f32.mrb[61].mxu0 }
0x1622   :  { %v2492_v19 = vpop.f32.mrb[62].mxu0 }
0x1623   :  { %v4448_v20 = vpop.f32.mrb[63].mxu0 }
0x1629   :  { %v2593_v23 = vpop.f32.mrb[64].mxu0 }
0x162a   :  { %v2600_v27 = vmul.f32 0.17677669, %v2593_v23  ;;  %v4459_v28 = vpop.f32.mrb[65].mxu0 }
0x162b   :  { %v2596_v30 = vpop.f32.mrb[66].mxu0  ;;  %2628 = vrot.lane.b32.xlu1 %v5621_v16, %s5027_s22 }
0x162c   :  { %v4460_v36 = vpop.f32.mrb[67].mxu0  ;;  %v2602_v37 = vsel %vm5325_vm5, %v2600_v27, -1e+30 }
0x162d   :  { %v2606_v39 = vsel %vm622_vm6, %v2602_v37, -inf }
0x162e   :  { %2607 = vmax.xlane.f32.xlu0 %v2606_v39 }
0x162f   :  { %2727 = vrot.lane.b32.xlu1 %v5605_v50, %s5019_s25 }
0x1633   :  { %2777 = vrot.lane.b32.xlu1 %v5610_v7, %s5019_s25 }
0x1637   :  { %2725 = vrot.lane.b32.xlu1 %v5612_v13, %s5019_s25 }
0x16a7   :  { %v2605_v40 = vpop.xlane.xlu1 %2604 }
0x16a8   :  { %v2609_v41 = vsub.f32 %v2601_v51, %v2605_v40 }
0x16aa   :  { %v2611_v42 = vmul.f32 1.442695, %v2609_v41 }
0x16ab   :  { %v2629_v44 = vpop.permute.xlu1 %2628 }
0x16ac   :  { %4834 = vpow2.f32 %v2611_v42  ;;  %v2634_v45 = vsel %vm650_vm4, %v2629_v44, 0 }
0x16ad   :  { %4462 = vmatpush3.bf16.msra.mxu1 %v2634_v45 }
0x16ae   :  { %4473 = vmatprep.subr.bf16.mxu1 %v5024_v0 }
0x16af   :  { %v2728_v57 = vpop.permute.xlu1 %2727 }
0x16b0   :  { %v2733_v60 = vsel %vm523_vm3, %v2728_v57, 0 }
0x16b3   :  { %v2778_v26 = vpop.permute.xlu1 %2777 }
0x16b4   :  { %v2783_v63 = vsel %vm523_vm3, %v2778_v26, 0 }
0x16b6   :  { %v4835_v46 = vpop.eup %4834 }
0x16b7   :  { %v2615_v47 = vsel %vm622_vm6, %v4835_v46, 0.0  ;;  %v2726_v24 = vpop.permute.xlu1 %2725 }
0x16b8   :  { %2616 = vadd.xlane.f32.xlu0 %v2615_v47 }
0x16bb   :  { %v2608_v48 = vpop.xlane.xlu0 %2607 }
0x16bc   :  { %v2610_v49 = vsub.f32 %v2602_v37, %v2608_v48 }
0x16be   :  { %v2613_v52 = vmul.f32 1.442695, %v2610_v49 }
0x16c0   :  { %4836 = vpow2.f32 %v2613_v52 }
0x16ca   :  { %v4837_v53 = vpop.eup %4836 }
0x16cb   :  { %v2618_v54 = vsel %vm622_vm6, %v4837_v53, 0.0 }
0x16cc   :  { %2619 = vadd.xlane.f32.xlu0 %v2618_v54 }
0x16e2   :  { %2677 = vrot.lane.b32.xlu0 %v5652_v61, %s5027_s22 }
0x16e6   :  { %2775 = vrot.lane.b32.xlu0 %v5623_v17, %s5019_s25 }
0x1745   :  { %v2617_v55 = vpop.xlane.xlu0 %2616 }
0x1746   :  { %4838 = vrcp.f32 %v2617_v55 }
0x1750   :  { %v4839_v56 = vpop.eup %4838 }
0x1751   :  { %v2623_v58 = vmul.f32 %v4839_v56, %v4835_v46 }
0x1753   :  { %v2625_v59 = vpack.c.bf16 %v2623_v58, %v2623_v58 }
0x1755   :  { %4464 = vmatmul.mubr.msk.bf16.vlgmr.msra.gmra.mrb[52].mxu1 %vm622_vm6, %v2625_v59 }
0x1756   :  { %4474 = vmatpush3.bf16.xpose.msra.mxu1 %v2733_v60  ;;  %4475 = vmatprep.mubr.msk.bf16.mxu1 %vm5025_vm0, %v5024_v0 }
0x1757   :  { %4485 = vmatprep.subr.bf16.mxu1 %v5024_v0 }
0x1759   :  { %v2620_v21 = vpop.xlane.xlu0 %2619 }
0x175a   :  { %4840 = vrcp.f32 %v2620_v21 }
0x175d   :  { %v2678_v2 = vpop.permute.xlu0 %2677  ;;  %4476 = vmatmul.mubr.msk.bf16.vlgmr.msra.gmra.mrb[56].mxu1 %vm523_vm3, %v2726_v24 }
0x175e   :  { %v2683_v32 = vsel %vm650_vm4, %v2678_v2, 0  ;;  %4487 = vmatprep.mubr.msk.bf16.mxu1 %vm5025_vm0, %v5024_v0 }
0x175f   :  { %4468 = vmatpush3.bf16.msra.mxu0 %v2683_v32 }
0x1760   :  { %4479 = vmatprep.subr.bf16.mxu0 %v5024_v0 }
0x1761   :  { %v2776_v1 = vpop.permute.xlu0 %2775 }
0x1764   :  { %v4841_v33 = vpop.eup %4840 }
0x1765   :  { %v2624_v3 = vmul.f32 %v4841_v33, %v4837_v53 }
0x1767   :  { %v2626_v25 = vpack.c.bf16 %v2624_v3, %v2624_v3 }
0x1769   :  { %4470 = vmatmul.mubr.msk.bf16.vlgmr.msra.gmra.mrb[68].mxu0 %vm622_vm6, %v2626_v25 }
0x176a   :  { %4480 = vmatpush3.bf16.xpose.msra.mxu0 %v2783_v63  ;;  %4481 = vmatprep.mubr.msk.bf16.mxu0 %vm5025_vm0, %v5024_v0 }
0x176b   :  { %4491 = vmatprep.subr.bf16.mxu0 %v5024_v0 }
0x1771   :  { %4482 = vmatmul.mubr.msk.bf16.vlgmr.msra.gmra.mrb[72].mxu0 %vm523_vm3, %v2776_v1 }
0x1772   :  { %4493 = vmatprep.mubr.msk.bf16.mxu0 %vm5025_vm0, %v5024_v0 }
0x1828   :  { %v5715_v34 = vpop.f32.mrb[52].mxu1 }
0x1829   :  { %v4465_v35 = vpop.f32.mrb[53].mxu1 }
0x182a   :  { %v2673_v6 = vpop.f32.mrb[54].mxu1 }
0x182b   :  { %v4466_v8 = vpop.f32.mrb[55].mxu1 }
0x1830   :  { %v2769_v10 = vpop.f32.mrb[56].mxu1 }
0x1831   :  { %v2825_v12 = vmul.f32 0.17677669, %v2769_v10  ;;  %v4477_v51 = vpop.f32.mrb[57].mxu1 }
0x1832   :  { %v2772_v4 = vpop.f32.mrb[58].mxu1 }
0x1833   :  { %v4478_v14 = vpop.f32.mrb[59].mxu1  ;;  %v2827_v29 = vsel %vm5325_vm5, %v2825_v12, -1e+30 }
0x1834   :  { %v2829_v15 = vsel %vm622_vm6, %v2827_v29, -inf }
0x1835   :  { %2830 = vmax.xlane.f32.xlu1 %v2829_v15 }
0x183c   :  { %v5720_v18 = vpop.f32.mrb[68].mxu0 }
0x183d   :  { %v4591_v19 = vpack.i.bf16 %v5720_v18, %v5715_v34  ;;  %v4471_v20 = vpop.f32.mrb[69].mxu0 }
0x183e   :  { %v2722_v23 = vpop.f32.mrb[70].mxu0 }
0x183f   :  { %v4472_v27 = vpop.f32.mrb[71].mxu0 }
0x1844   :  { %v2819_v28 = vpop.f32.mrb[72].mxu0 }
0x1845   :  { %v2826_v30 = vmul.f32 0.17677669, %v2819_v28  ;;  %v4483_v36 = vpop.f32.mrb[73].mxu0 }
0x1846   :  { %v2822_v37 = vpop.f32.mrb[74].mxu0  ;;  %2853 = vrot.lane.b32.xlu1 %v5621_v16, %s5019_s25 }
0x1847   :  { %v4484_v39 = vpop.f32.mrb[75].mxu0  ;;  %v2828_v40 = vsel %vm5325_vm5, %v2826_v30, -1e+30 }
0x1848   :  { %v2832_v41 = vsel %vm622_vm6, %v2828_v40, -inf }
0x1849   :  { %2833 = vmax.xlane.f32.xlu0 %v2832_v41 }
0x184a   :  { %2951 = vrot.lane.b32.xlu1 %v5605_v50, %s5028_s21 }
0x184e   :  { %3001 = vrot.lane.b32.xlu1 %v5610_v7, %s5028_s21 }
0x1852   :  { %2949 = vrot.lane.b32.xlu1 %v5612_v13, %s5028_s21 }
0x18c2   :  { %v2831_v42 = vpop.xlane.xlu1 %2830 }
0x18c3   :  { %v2835_v44 = vsub.f32 %v2827_v29, %v2831_v42 }
0x18c5   :  { %v2837_v45 = vmul.f32 1.442695, %v2835_v44 }
0x18c6   :  { %v2854_v46 = vpop.permute.xlu1 %2853 }
0x18c7   :  { %4842 = vpow2.f32 %v2837_v45  ;;  %v2859_v47 = vsel %vm650_vm4, %v2854_v46, 0 }
0x18c8   :  { %4486 = vmatpush3.bf16.msra.mxu1 %v2859_v47 }
0x18c9   :  { %4497 = vmatprep.subr.bf16.mxu1 %v5024_v0 }
0x18ca   :  { %v2952_v56 = vpop.permute.xlu1 %2951 }
0x18cb   :  { %v2957_v59 = vsel %vm523_vm3, %v2952_v56, 0 }
0x18ce   :  { %v3002_v60 = vpop.permute.xlu1 %3001 }
0x18cf   :  { %v3007_v3 = vsel %vm523_vm3, %v3002_v60, 0  ;;  %v4719_v60 = vld [vmem:[#allocation8 + $0x48] sm:$0xff]  }
0x18d1   :  { %v4843_v48 = vpop.eup %4842 }
0x18d2   :  { %v2841_v49 = vsel %vm622_vm6, %v4843_v48, 0.0 }
0x18d3   :  { %2842 = vadd.xlane.f32.xlu0 %v2841_v49 }
0x18d6   :  { %v2834_v50 = vpop.xlane.xlu0 %2833 }
0x18d7   :  { %v2836_v52 = vsub.f32 %v2828_v40, %v2834_v50 }
0x18d9   :  { %v2839_v7 = vmul.f32 1.442695, %v2836_v52 }
0x18db   :  { %4844 = vpow2.f32 %v2839_v7 }
0x18e5   :  { %v4845_v53 = vpop.eup %4844 }
0x18e6   :  { %v2844_v13 = vsel %vm622_vm6, %v4845_v53, 0.0 }
0x18e7   :  { %2845 = vadd.xlane.f32.xlu0 %v2844_v13 }
0x18fd   :  { %2901 = vrot.lane.b32.xlu0 %v5652_v61, %s5019_s25 }
0x1901   :  { %2999 = vrot.lane.b32.xlu0 %v5623_v17, %s5028_s21  ;;  %v2950_v17 = vpop.permute.xlu1 %2949 }
0x1960   :  { %v2843_v54 = vpop.xlane.xlu0 %2842 }
0x1961   :  { %4846 = vrcp.f32 %v2843_v54 }
0x196b   :  { %v4847_v55 = vpop.eup %4846 }
0x196c   :  { %v2849_v57 = vmul.f32 %v4847_v55, %v4843_v48 }
0x196e   :  { %v2851_v58 = vpack.c.bf16 %v2849_v57, %v2849_v57 }
0x1970   :  { %4488 = vmatmul.mubr.msk.bf16.vlgmr.msra.gmra.mrb[60].mxu1 %vm622_vm6, %v2851_v58 }
0x1971   :  { %4498 = vmatpush3.bf16.xpose.msra.mxu1 %v2957_v59  ;;  %4499 = vmatprep.mubr.msk.bf16.mxu1 %vm5025_vm0, %v5024_v0 }
0x1972   :  { %4509 = vmatprep.subr.bf16.mxu1 %v5024_v0 }
0x1974   :  { %v2846_v26 = vpop.xlane.xlu0 %2845 }
0x1975   :  { %4848 = vrcp.f32 %v2846_v26  ;;  %v4720_v26 = vld [vmem:[#allocation8 + $0x50] sm:$0xff]  }
0x1978   :  { %v2902_v21 = vpop.permute.xlu0 %2901  ;;  %4500 = vmatmul.mubr.msk.bf16.vlgmr.msra.gmra.mrb[64].mxu1 %vm523_vm3, %v2950_v17  ;;  %v4721_v17 = vld [vmem:[#allocation8 + $0x58] sm:$0xff]  }
0x1979   :  { %v2907_v24 = vsel %vm650_vm4, %v2902_v21, 0  ;;  %4511 = vmatprep.mubr.msk.bf16.mxu1 %vm5025_vm0, %v5024_v0  ;;  %v4722_v21 = vld [vmem:[#allocation8 + $0x60] sm:$0xff]  }
0x197a   :  { %4492 = vmatpush3.bf16.msra.mxu0 %v2907_v24  ;;  %v4723_v24 = vld [vmem:[#allocation8 + $0x68] sm:$0xff]  }
0x197b   :  { %4503 = vmatprep.subr.bf16.mxu0 %v5024_v0 }
0x197c   :  { %v3000_v25 = vpop.permute.xlu0 %2999 }
0x197f   :  { %v4849_v2 = vpop.eup %4848 }
0x1980   :  { %v2850_v32 = vmul.f32 %v4849_v2, %v4845_v53 }
0x1982   :  { %v2852_v33 = vpack.c.bf16 %v2850_v32, %v2850_v32 }
0x1984   :  { %4494 = vmatmul.mubr.msk.bf16.vlgmr.msra.gmra.mrb[76].mxu0 %vm622_vm6, %v2852_v33 }
0x1985   :  { %4504 = vmatpush3.bf16.xpose.msra.mxu0 %v3007_v3  ;;  %4505 = vmatprep.mubr.msk.bf16.mxu0 %vm5025_vm0, %v5024_v0 }
0x1986   :  { %4515 = vmatprep.subr.bf16.mxu0 %v5024_v0 }
0x198c   :  { %4506 = vmatmul.mubr.msk.bf16.vlgmr.msra.gmra.mrb[80].mxu0 %vm523_vm3, %v3000_v25  ;;  %v4725_v25 = vld [vmem:[#allocation8 + $0x78] sm:$0xff]  }
0x198d   :  { %4517 = vmatprep.mubr.msk.bf16.mxu0 %vm5025_vm0, %v5024_v0 }
0x1a43   :  { %v2895_v63 = vpop.f32.mrb[60].mxu1 }
0x1a44   :  { %v4489_v1 = vpop.f32.mrb[61].mxu1 }
0x1a45   :  { %v2898_v35 = vpop.f32.mrb[62].mxu1 }
0x1a46   :  { %v4490_v6 = vpop.f32.mrb[63].mxu1 }
0x1a4b   :  { %v2993_v8 = vpop.f32.mrb[64].mxu1 }
0x1a4c   :  { %v3049_v10 = vmul.f32 0.17677669, %v2993_v8  ;;  %v4501_v12 = vpop.f32.mrb[65].mxu1 }
0x1a4d   :  { %v2996_v51 = vpop.f32.mrb[66].mxu1 }
0x1a4e   :  { %v4502_v4 = vpop.f32.mrb[67].mxu1  ;;  %v3051_v14 = vsel %vm5325_vm5, %v3049_v10, -1e+30 }
0x1a4f   :  { %v3053_v29 = vsel %vm622_vm6, %v3051_v14, -inf }
0x1a50   :  { %3054 = vmax.xlane.f32.xlu1 %v3053_v29 }
0x1a57   :  { %v2943_v15 = vpop.f32.mrb[76].mxu0 }
0x1a58   :  { %v4596_v20 = vpack.i.bf16 %v2943_v15, %v2895_v63  ;;  %v4495_v23 = vpop.f32.mrb[77].mxu0 }
0x1a59   :  { %v2946_v27 = vpop.f32.mrb[78].mxu0 }
0x1a5a   :  { %v4496_v28 = vpop.f32.mrb[79].mxu0 }
0x1a5f   :  { %v3043_v30 = vpop.f32.mrb[80].mxu0 }
0x1a60   :  { %v3050_v36 = vmul.f32 0.17677669, %v3043_v30  ;;  %v4507_v37 = vpop.f32.mrb[81].mxu0 }
0x1a61   :  { %v3046_v39 = vpop.f32.mrb[82].mxu0  ;;  %3077 = vrot.lane.b32.xlu1 %v5621_v16, %s5028_s21 }
0x1a62   :  { %v4508_v40 = vpop.f32.mrb[83].mxu0  ;;  %v3052_v41 = vsel %vm5325_vm5, %v3050_v36, -1e+30 }
0x1a63   :  { %v3056_v42 = vsel %vm622_vm6, %v3052_v41, -inf }
0x1a64   :  { %3057 = vmax.xlane.f32.xlu0 %v3056_v42 }
0x1a65   :  { %4592 = vrot.lane.b32.xlu1 %v4591_v19, %s5028_s21 }
0x1a69   :  { %4597 = vrot.lane.b32.xlu1 %v4596_v20, %s5019_s25 }
0x1add   :  { %v3055_v44 = vpop.xlane.xlu1 %3054 }
0x1ade   :  { %v3059_v45 = vsub.f32 %v3051_v14, %v3055_v44 }
0x1ae0   :  { %v3061_v46 = vmul.f32 1.442695, %v3059_v45 }
0x1ae1   :  { %v3078_v47 = vpop.permute.xlu1 %3077 }
0x1ae2   :  { %4850 = vpow2.f32 %v3061_v46  ;;  %v3083_v16 = vsel %vm650_vm4, %v3078_v47, 0 }
0x1ae3   :  { %4510 = vmatpush3.bf16.msra.mxu1 %v3083_v16 }
0x1ae4   :  { %4521 = vmatprep.subr.bf16.mxu1 %v5024_v0 }
0x1ae5   :  { %v4593_v10 = vpop.permute.xlu1 %4592 }
0x1ae6   :  { %v4595_v51 = vunpack.i.h.bf16 %v4593_v10  ;;  %v4594_v4 = vunpack.i.l.bf16 %v4593_v10  ;;  %v4043_v10 = vld [vmem:[%s5911_s12 + $0x1] ss:$0 sm:$0xff] }
0x1ae8   :  { %v3198_v20 = vsel %vm523_vm3, %v5676_v31, %v4595_v51  ;;  %v3197_v23 = vsel %vm523_vm3, %v5671_v11, %v4594_v4 }
0x1ae9   :  { %v4598_v12 = vpop.permute.xlu1 %4597 }
0x1aea   :  { %v4600_v14 = vunpack.i.h.bf16 %v4598_v12  ;;  %v4599_v29 = vunpack.i.l.bf16 %v4598_v12 }
0x1aec   :  { %v4851_v38 = vpop.eup %4850  ;;  %v3200_v30 = vsel %vm1444_vm7, %v3198_v20, %v4600_v14  ;;  %v3199_v36 = vsel %vm1444_vm7, %v3197_v23, %v4599_v29  ;;  %v4750_v29 = vld [vmem:[#allocation9 + $0xc0] sm:$0xff]   ;;  %v4752_v20 = vld [vmem:[#allocation9 + $0xc8] sm:$0xff]  }
0x1aed   :  { %v3065_v48 = vsel %vm622_vm6, %v4851_v38, 0.0  ;;  %v4753_v23 = vld [vmem:[#allocation9 + $0x88] sm:$0xff]  }
0x1aee   :  { %3066 = vadd.xlane.f32.xlu0 %v3065_v48  ;;  %v4728_v48 = vld [vmem:[%s5912_s13 + $0x84] ss:$8 sps:$4 sm:$0xff]  }
0x1af1   :  { %v3058_v49 = vpop.xlane.xlu0 %3057 }
0x1af2   :  { %v3060_v50 = vsub.f32 %v3052_v41, %v3058_v49  ;;  %v4031_v41 = vld [vmem:[%s5909_s10 + $0x1] ss:$0 sm:$0xff]  ;;  %v4731_v49 = vld [vmem:[%s5912_s13 + $0x94] ss:$8 sps:$4 sm:$0xff]  }
0x1af4   :  { %v3063_v34 = vmul.f32 1.442695, %v3060_v50 }
0x1af6   :  { %4852 = vpow2.f32 %v3063_v34 }
0x1b00   :  { %v4853_v18 = vpop.eup %4852 }
0x1b01   :  { %v3068_v19 = vsel %vm622_vm6, %v4853_v18, 0.0 }
0x1b02   :  { %3069 = vadd.xlane.f32.xlu0 %v3068_v19 }
0x1b18   :  { %3125 = vrot.lane.b32.xlu0 %v5652_v61, %s5028_s21  ;;  %v4718_v61 = vld [vmem:[#allocation8 + $0x40] sm:$0xff]  }
0x1b7b   :  { %v3067_v52 = vpop.xlane.xlu0 %3066 }
0x1b7c   :  { %4854 = vrcp.f32 %v3067_v52 }
0x1b86   :  { %v4855_v7 = vpop.eup %4854 }
0x1b87   :  { %v3073_v53 = vmul.f32 %v4855_v7, %v4851_v38  ;;  %v4726_v38 = vld [vmem:[%s5912_s13 + $0x80] ss:$8 sps:$4 sm:$0xff]  }
0x1b89   :  { %v3075_v13 = vpack.c.bf16 %v3073_v53, %v3073_v53 }
0x1b8b   :  { %4512 = vmatmul.mubr.msk.bf16.vlgmr.msra.gmra.mrb[68].mxu1 %vm622_vm6, %v3075_v13  ;;  %v4734_v13 = vld [vmem:[%s5912_s13 + $0xa4] ss:$8 sps:$4 sm:$0xff]  }
0x1b8c   :  { %4537 = vmatprep.mubr.msk.bf16.mxu1 %vm5025_vm0, %v5024_v0  ;;  %4522 = vmatpush3.bf16.msra.mxu1 %v4718_v61  ;;  %v4741_v61 = vld [vmem:[%s5912_s13 + $0xd0] ss:$8 sps:$4 sm:$0xff]  }
0x1b8d   :  { %4523 = vmatprep.subr.bf16.mxu1 %v5024_v0 }
0x1b8f   :  { %v3070_v54 = vpop.xlane.xlu0 %3069 }
0x1b90   :  { %4856 = vrcp.f32 %v3070_v54  ;;  %4524 = vmatpush3.bf16.msra.mxu1 %v4719_v60  ;;  %v4732_v54 = vld [vmem:[%s5912_s13 + $0xa0] ss:$8 sps:$4 sm:$0xff]   ;;  %v4746_v60 = vld [vmem:[%s5912_s13 + $0xe4] ss:$8 sps:$4 sm:$0xff]  }
0x1b91   :  { %4525 = vmatprep.subr.bf16.mxu1 %v5024_v0 }
0x1b93   :  { %v3126_v55 = vpop.permute.xlu0 %3125 }
0x1b94   :  { %v3131_v56 = vsel %vm650_vm4, %v3126_v55, 0  ;;  %4526 = vmatpush3.bf16.msra.mxu1 %v4720_v26  ;;  %v4737_v55 = vld [vmem:[%s5912_s13 + $0xb4] ss:$8 sps:$4 sm:$0xff]   ;;  %v4744_v26 = vld [vmem:[%s5912_s13 + $0xe0] ss:$8 sps:$4 sm:$0xff]  }
0x1b95   :  { %4516 = vmatpush3.bf16.msra.mxu0 %v3131_v56  ;;  %4527 = vmatprep.subr.bf16.mxu1 %v5024_v0  ;;  %v4735_v56 = vld [vmem:[%s5912_s13 + $0xb0] ss:$8 sps:$4 sm:$0xff]  }
0x1b96   :  { %3473 = vmatprep.subr.bf16.mxu0 %v4728_v48 }
0x1b98   :  { %4528 = vmatpush3.bf16.msra.mxu1 %v4721_v17  ;;  %v4749_v17 = vld [vmem:[%s5912_s13 + $0xf4] ss:$8 sps:$4 sm:$0xff]  }
0x1b99   :  { %4529 = vmatprep.subr.bf16.mxu1 %v5024_v0 }
0x1b9a   :  { %v4857_v57 = vpop.eup %4856 }
0x1b9b   :  { %v3074_v58 = vmul.f32 %v4857_v57, %v4853_v18  ;;  %v4740_v57 = vld [vmem:[%s5912_s13 + $0xc4] ss:$8 sps:$4 sm:$0xff]  }
0x1b9c   :  { %4530 = vmatpush3.bf16.msra.mxu1 %v4722_v21  ;;  %v4747_v21 = vld [vmem:[%s5912_s13 + $0xf0] ss:$8 sps:$4 sm:$0xff]  }
0x1b9d   :  { %v3076_v59 = vpack.c.bf16 %v3074_v58, %v3074_v58  ;;  %4531 = vmatprep.subr.bf16.mxu1 %v5024_v0  ;;  %v4738_v58 = vld [vmem:[%s5912_s13 + $0xc0] ss:$8 sps:$4 sm:$0xff]  }
0x1b9f   :  { %4518 = vmatmul.mubr.msk.bf16.vlgmr.msra.gmra.mrb[84].mxu0 %vm622_vm6, %v3076_v59  ;;  %v4743_v59 = vld [vmem:[%s5912_s13 + $0xd4] ss:$8 sps:$4 sm:$0xff]  }
0x1ba0   :  { %3505 = vmatprep.mubr.bf16.mxu0 %v5026_v43  ;;  %4532 = vmatpush3.bf16.msra.mxu1 %v4723_v24  ;;  %v4724_v43 = vld [vmem:[#allocation8 + $0x70] sm:$0xff]  }
0x1ba1   :  { %4533 = vmatprep.subr.bf16.mxu1 %v5024_v0  ;;  %3474 = vmatpush1.bf16.msra.mxu0 %v4726_v38 }
0x1ba2   :  { %3475 = vmatprep.subr.bf16.mxu0 %v4731_v49 }
0x1ba4   :  { %4534 = vmatpush3.bf16.msra.mxu1 %v4724_v43 }
0x1ba5   :  { %4535 = vmatprep.subr.bf16.mxu1 %v5024_v0 }
0x1ba8   :  { %4536 = vmatpush3.bf16.msra.mxu1 %v4725_v25 }
0x1ba9   :  { %4232 = vmatprep.subr.bf16.mxu1 %v4750_v29 }
0x1c5e   :  { %v3119_v2 = vpop.f32.mrb[68].mxu1 }
0x1c5f   :  { %v4513_v32 = vpop.f32.mrb[69].mxu1 }
0x1c60   :  { %v3122_v33 = vpop.f32.mrb[70].mxu1 }
0x1c61   :  { %v4514_v3 = vpop.f32.mrb[71].mxu1 }
0x1c72   :  { %v3167_v63 = vpop.f32.mrb[84].mxu0 }
0x1c73   :  { %v4601_v1 = vpack.i.bf16 %v3167_v63, %v3119_v2  ;;  %v4519_v35 = vpop.f32.mrb[85].mxu0 }
0x1c74   :  { %v3170_v6 = vpop.f32.mrb[86].mxu0 }
0x1c75   :  { %4602 = vrot.lane.b32.xlu1 %v4601_v1, %s5027_s22  ;;  %v4520_v8 = vpop.f32.mrb[87].mxu0  ;;  %v4042_v1 = vld [vmem:[%s5910_s11 + $0x1] ss:$0 sm:$0xff] }
0x1ce7   :  { %v4603_v15 = vpop.permute.xlu1 %4602 }
0x1ce8   :  { %v4605_v27 = vunpack.i.h.bf16 %v4603_v15  ;;  %v4604_v28 = vunpack.i.l.bf16 %v4603_v15  ;;  %v4751_v15 = vld [vmem:[#allocation9 + $0x80] sm:$0xff]  }
0x1cea   :  { %v3202_v37 = vsel %vm1447_vm8, %v3200_v30, %v4605_v27  ;;  %v3201_v39 = vsel %vm1447_vm8, %v3199_v36, %v4604_v28  ;;  %v4754_v27 = vld [vmem:[#allocation9 + $0xd0] sm:$0xff]   ;;  %v4756_v30 = vld [vmem:[#allocation9 + $0xd8] sm:$0xff]  }
0x1ceb   :  { %v3203_v40 = vpack.c.bf16 %v3202_v37, %v3201_v39  ;;  %v4755_v28 = vld [vmem:[#allocation9 + $0x90] sm:$0xff]   ;;  %v4757_v36 = vld [vmem:[#allocation9 + $0x98] sm:$0xff]   ;;  %v4758_v37 = vld [vmem:[#allocation9 + $0xe0] sm:$0xff]  }
0x1cec   :  { %v4759_v39 = vld [vmem:[#allocation9 + $0xa0] sm:$0xff]  }
0x1ced   :  { %4538 = vmatmul.mubr.bf16.vlgmr.msra.gmra.mrb[72].mxu1 %v3203_v40  ;;  %v4760_v40 = vld [vmem:[#allocation9 + $0xe8] sm:$0xff]  }
0x1cee   :  { %4233 = vmatpush3.bf16.msra.mxu1 %v4751_v15 }
0x1cef   :  { %4234 = vmatprep.subr.bf16.mxu1 %v4752_v20 }
0x1cf2   :  { %4235 = vmatpush3.bf16.msra.mxu1 %v4753_v23 }
0x1cf3   :  { %4236 = vmatprep.subr.bf16.mxu1 %v4754_v27 }
0x1cf6   :  { %4237 = vmatpush3.bf16.msra.mxu1 %v4755_v28  ;;  %v4078_v28 = vld [vmem:[%s5915_s16 + $0x1] ss:$0 sm:$0xff] }
0x1cf7   :  { %4238 = vmatprep.subr.bf16.mxu1 %v4756_v30 }
0x1cfa   :  { %4239 = vmatpush3.bf16.msra.mxu1 %v4757_v36 }
0x1cfb   :  { %4240 = vmatprep.subr.bf16.mxu1 %v4758_v37 }
0x1cfe   :  { %4241 = vmatpush3.bf16.msra.mxu1 %v4759_v39 }
0x1cff   :  { %4242 = vmatprep.subr.bf16.mxu1 %v4760_v40 }
0x1dc0   :  { %v3311_v31 = vpop.f32.mrb[72].mxu1 }
0x1dc1   :  { %v3312_v42 = vadd.f32 %v4031_v41, %v3311_v31  ;;  %v4539_v44 = vpop.f32.mrb[73].mxu1  ;;  %v4762_v31 = vld [vmem:[#allocation9 + $0xf0] sm:$0xff]  }
0x1dc2   :  { %v3314_v11 = vpop.f32.mrb[74].mxu1  ;;  %v4764_v44 = vld [vmem:[#allocation9 + $0xf8] sm:$0xff]  }
0x1dc3   :  { %v3315_v45 = vadd.f32 %v4031_v41, %v3314_v11  ;;  %v4540_v46 = vpop.f32.mrb[75].mxu1  ;;  %v3318_v47 = vadd.f32 %v3312_v42, %v5586_v62  ;;  %v4729_v62 = vld [vmem:[%s5912_s13 + $0x90] ss:$8 sps:$4 sm:$0xff]  }
0x1dc4   :  { %3476 = vmatpush1.bf16.msra.mxu0 %v4729_v62  ;;  %v4761_v41 = vld [vmem:[#allocation9 + $0xa8] sm:$0xff]   ;;  %v4763_v42 = vld [vmem:[#allocation9 + $0xb0] sm:$0xff]   ;;  %v4765_v11 = vld [vmem:[#allocation9 + $0xb8] sm:$0xff]  }
0x1dc5   :  { %3324 = vadd.xlane.f32.xlu0 %v3318_v47  ;;  %v3319_v16 = vadd.f32 %v3315_v45, %v5588_v22  ;;  %3477 = vmatprep.subr.bf16.mxu0 %v4734_v13  ;;  %v4060_v45 = vld [vmem:[%s5913_s14 + $0x2] sm:$0x3] }
0x1dc6   :  { %4243 = vmatpush3.bf16.msra.mxu1 %v4761_v41  ;;  %v3386_v46 = vrot.slane %v4060_v45, %v5285_v9 }
0x1dc7   :  { %3326 = vadd.xlane.f32.xlu1 %v3319_v16  ;;  %4244 = vmatprep.subr.bf16.mxu1 %v4762_v31 }
0x1dc8   :  { %3478 = vmatpush1.bf16.msra.mxu0 %v4732_v54 }
0x1dc9   :  { %3479 = vmatprep.subr.bf16.mxu0 %v4737_v55 }
0x1dca   :  { %4245 = vmatpush3.bf16.msra.mxu1 %v4763_v42 }
0x1dcb   :  { %4246 = vmatprep.subr.bf16.mxu1 %v4764_v44 }
0x1dcc   :  { %3480 = vmatpush1.bf16.msra.mxu0 %v4735_v56 }
0x1dcd   :  { %3481 = vmatprep.subr.bf16.mxu0 %v4740_v57 }
0x1dce   :  { %4247 = vmatpush3.bf16.msra.mxu1 %v4765_v11  ;;  %v4766_v11 = vld [vmem:[#allocation11] sm:$0xff]  }
0x1dd0   :  { %3482 = vmatpush1.bf16.msra.mxu0 %v4738_v58 }
0x1dd1   :  { %3483 = vmatprep.subr.bf16.mxu0 %v4743_v59 }
0x1dd4   :  { %3484 = vmatpush1.bf16.msra.mxu0 %v4741_v61 }
0x1dd5   :  { %3485 = vmatprep.subr.bf16.mxu0 %v4746_v60 }
0x1dd8   :  { %3486 = vmatpush1.bf16.msra.mxu0 %v4744_v26 }
0x1dd9   :  { %3487 = vmatprep.subr.bf16.mxu0 %v4749_v17 }
0x1ddc   :  { %3488 = vmatpush1.bf16.msra.mxu0 %v4747_v21 }
0x1ddd   :  { %4541 = vmatprep.subr.bf16.mxu0 %v5024_v0 }
0x1e52   :  { %v3325_v22 = vpop.xlane.xlu0 %3324 }
0x1e53   :  { %v3328_v50 = vmul.f32 0.0078125, %v3325_v22 }
0x1e54   :  { %v3327_v34 = vpop.xlane.xlu1 %3326 }
0x1e55   :  { %v3330_v18 = vsub.f32 %v3318_v47, %v3328_v50  ;;  %v3329_v19 = vmul.f32 0.0078125, %v3327_v34  ;;  %v3390_v47 = vrot.slane %v4060_v45, %v5277_v5  ;;  %v4767_v45 = vld [vmem:[#allocation11 + $0x8] sm:$0xff]  }
0x1e57   :  { %v3331_v52 = vsub.f32 %v3319_v16, %v3329_v19  ;;  %v3332_v7 = vmul.f32 %v3330_v18, %v3330_v18 }
0x1e59   :  { %3334 = vadd.xlane.f32.xlu0 %v3332_v7  ;;  %v3333_v53 = vmul.f32 %v3331_v52, %v3331_v52 }
0x1e5d   :  { %3336 = vadd.xlane.f32.xlu0 %v3333_v53 }
0x1ee6   :  { %v3335_v24 = vpop.xlane.xlu0 %3334 }
0x1ee7   :  { %v3338_v43 = vmul.f32 0.0078125, %v3335_v24 }
0x1ee9   :  { %v3340_v2 = vadd.f32 1e-12, %v3338_v43 }
0x1eea   :  { %v3337_v32 = vpop.xlane.xlu0 %3336 }
0x1eeb   :  { %4858 = vrsqrt.f32 %v3340_v2  ;;  %v3339_v33 = vmul.f32 0.0078125, %v3337_v32 }
0x1eed   :  { %v3341_v3 = vadd.f32 1e-12, %v3339_v33 }
0x1eef   :  { %4860 = vrsqrt.f32 %v3341_v3 }
0x1ef5   :  { %v4859_v25 = vpop.eup %4858 }
0x1ef6   :  { %v3344_v63 = vmul.f32 %v4859_v25, %v3330_v18 }
0x1ef8   :  { %v3352_v8 = vmul.f32 %v4042_v1, %v3344_v63 }
0x1ef9   :  { %v4861_v35 = vpop.eup %4860 }
0x1efa   :  { %v3345_v6 = vmul.f32 %v4861_v35, %v3331_v52  ;;  %v5862_v51 = vadd.f32 %v4043_v10, %v3352_v8 }
0x1efc   :  { %v3353_v12 = vmul.f32 %v4042_v1, %v3345_v6 }
0x1efe   :  { %v5864_v4 = vadd.f32 %v4043_v10, %v3353_v12 }
0x1f00   :  { %v3362_v14 = vpack.c.bf16 %v5864_v4, %v5862_v51 }
0x1f02   :  { %3506 = vmatmul.mubr.bf16.vlgmr.msra.gmra.mrb[88].mxu0 %v3362_v14 }
0x1f03   :  { %4557 = vmatprep.mubr.msk.bf16.mxu0 %vm5025_vm0, %v5024_v0  ;;  %4542 = vmatpush3.bf16.msra.mxu0 %v4766_v11 }
0x1f04   :  { %4543 = vmatprep.subr.bf16.mxu0 %v5024_v0 }
0x1f07   :  { %4544 = vmatpush3.bf16.msra.mxu0 %v4767_v45 }
0x1f08   :  { %4545 = vmatprep.subr.bf16.mxu0 %v5024_v0 }
0x1fd5   :  { %v3507_v16 = vpop.f32.mrb[88].mxu0 }
0x1fd6   :  { %v3508_v38 = vadd.f32 %v3507_v16, %v3386_v46  ;;  %v3509_v48 = vpop.f32.mrb[89].mxu0 }
0x1fd7   :  { %v3510_v49 = vadd.f32 %v3509_v48, %v3390_v47  ;;  %v3511_v62 = vpop.f32.mrb[90].mxu0 }
0x1fd8   :  { %v3520_v22 = vmul.f32 0.044715, %v3508_v38  ;;  %v3512_v50 = vadd.f32 %v3511_v62, %v3386_v46  ;;  %v3513_v34 = vpop.f32.mrb[91].mxu0  ;;  %v3516_v63 = vmul.f32 0.5, %v3508_v38 }
0x1fd9   :  { %v3521_v18 = vmul.f32 0.044715, %v3510_v49  ;;  %v3514_v19 = vadd.f32 %v3513_v34, %v3390_v47  ;;  %v3517_v6 = vmul.f32 0.5, %v3510_v49  ;;  %v4771_v34 = vld [vmem:[#allocation11 + $0x28] sm:$0xff]  }
0x1fda   :  { %v3524_v52 = vmul.f32 %v3520_v22, %v3508_v38  ;;  %v3522_v7 = vmul.f32 0.044715, %v3512_v50  ;;  %v3518_v1 = vmul.f32 0.5, %v3512_v50  ;;  %v4769_v22 = vld [vmem:[#allocation11 + $0x18] sm:$0xff]  }
0x1fdb   :  { %v3525_v53 = vmul.f32 %v3521_v18, %v3510_v49  ;;  %v3523_v13 = vmul.f32 0.044715, %v3514_v19  ;;  %v3519_v8 = vmul.f32 0.5, %v3514_v19  ;;  %v4772_v18 = vld [vmem:[#allocation11 + $0x30] sm:$0xff]  }
0x1fdc   :  { %v3528_v54 = vmul.f32 %v3524_v52, %v3508_v38  ;;  %v3526_v55 = vmul.f32 %v3522_v7, %v3512_v50 }
0x1fdd   :  { %v3529_v56 = vmul.f32 %v3525_v53, %v3510_v49  ;;  %v3527_v9 = vmul.f32 %v3523_v13, %v3514_v19 }
0x1fde   :  { %v3532_v57 = vadd.f32 %v3528_v54, %v3508_v38  ;;  %v3530_v5 = vmul.f32 %v3526_v55, %v3512_v50 }
0x1fdf   :  { %v3531_v58 = vmul.f32 %v3527_v9, %v3514_v19  ;;  %v3533_v59 = vadd.f32 %v3529_v56, %v3510_v49  ;;  %v4097_v9 = vld [vmem:[%s5916_s17 + $0x1] ss:$0 sm:$0xff] }
0x1fe0   :  { %v3536_v61 = vmul.f32 0.7978846, %v3532_v57  ;;  %v3534_v60 = vadd.f32 %v3530_v5, %v3512_v50  ;;  %v4770_v50 = vld [vmem:[#allocation11 + $0x20] sm:$0xff]  }
0x1fe1   :  { %v3535_v26 = vadd.f32 %v3531_v58, %v3514_v19  ;;  %v3537_v17 = vmul.f32 0.7978846, %v3533_v59  ;;  %v4773_v19 = vld [vmem:[#allocation11 + $0x38] sm:$0xff]  }
0x1fe2   :  { %4862 = vtanh.f32 %v3536_v61  ;;  %v3538_v21 = vmul.f32 0.7978846, %v3534_v60 }
0x1fe3   :  { %v3539_v24 = vmul.f32 0.7978846, %v3535_v26  ;;  %4864 = vtanh.f32 %v3537_v17 }
0x1fe4   :  { %4866 = vtanh.f32 %v3538_v21  ;;  %v4099_v21 = vld [vmem:[#allocation12] ss:$0 sm:$0xff] }
0x1fe5   :  { %4868 = vtanh.f32 %v3539_v24 }
0x1fec   :  { %v4863_v43 = vpop.eup %4862 }
0x1fed   :  { %v4865_v2 = vpop.eup %4864  ;;  %v3544_v32 = vadd.f32 1.0, %v4863_v43 }
0x1fee   :  { %v4867_v33 = vpop.eup %4866  ;;  %v3545_v3 = vadd.f32 1.0, %v4865_v2 }
0x1fef   :  { %v4869_v25 = vpop.eup %4868  ;;  %v3546_v35 = vadd.f32 1.0, %v4867_v33  ;;  %v3548_v12 = vmul.f32 %v3544_v32, %v3516_v63 }
0x1ff0   :  { %v3547_v10 = vadd.f32 1.0, %v4869_v25  ;;  %v3549_v29 = vmul.f32 %v3545_v3, %v3517_v6 }
0x1ff1   :  { %v3550_v14 = vmul.f32 %v3546_v35, %v3518_v1 }
0x1ff2   :  { %v3551_v15 = vmul.f32 %v3547_v10, %v3519_v8 }
0x1ff3   :  { %v3552_v20 = vpack.c.bf16 %v3550_v14, %v3548_v12 }
0x1ff4   :  { %v3553_v23 = vpack.c.bf16 %v3551_v15, %v3549_v29 }
0x1ff6   :  { %3723 = vmatprep.mubr.bf16.mxu1 %v3553_v23 }
0x1ff7   :  { %3724 = vmatmul.mubr.bf16.vlgmr.msra.gmra.mrb[76].mxu1 %v3552_v20 }
0x20ca   :  { %v4248_v27 = vpop.f32.mrb[76].mxu1 }
0x20cb   :  { %v4249_v30 = vpop.f32.mrb[77].mxu1 }
0x20cc   :  { %v4250_v36 = vadd.f32 %v4249_v30, %v4248_v27  ;;  %v4251_v37 = vpop.f32.mrb[78].mxu1 }
0x20cd   :  { %v4252_v39 = vpop.f32.mrb[79].mxu1 }
0x20ce   :  { %v3726_v40 = vadd.f32 %v4250_v36, %v4078_v28  ;;  %v4253_v41 = vadd.f32 %v4252_v39, %v4251_v37 }
0x20d0   :  { %v3729_v31 = vadd.f32 %v4253_v41, %v4078_v28  ;;  %v3732_v42 = vadd.f32 %v3726_v40, %v5862_v51 }
0x20d2   :  { %3738 = vadd.xlane.f32.xlu0 %v3732_v42  ;;  %v3733_v44 = vadd.f32 %v3729_v31, %v5864_v4  ;;  %v4768_v4 = vld [vmem:[#allocation11 + $0x10] sm:$0xff]  }
0x20d3   :  { %4546 = vmatpush3.bf16.msra.mxu0 %v4768_v4 }
0x20d4   :  { %3740 = vadd.xlane.f32.xlu1 %v3733_v44  ;;  %4547 = vmatprep.subr.bf16.mxu0 %v5024_v0 }
0x20d7   :  { %4548 = vmatpush3.bf16.msra.mxu0 %v4769_v22 }
0x20d8   :  { %4549 = vmatprep.subr.bf16.mxu0 %v5024_v0 }
0x20db   :  { %4550 = vmatpush3.bf16.msra.mxu0 %v4770_v50 }
0x20dc   :  { %4551 = vmatprep.subr.bf16.mxu0 %v5024_v0 }
0x20df   :  { %4552 = vmatpush3.bf16.msra.mxu0 %v4771_v34 }
0x20e0   :  { %4553 = vmatprep.subr.bf16.mxu0 %v5024_v0 }
0x20e3   :  { %4554 = vmatpush3.bf16.msra.mxu0 %v4772_v18 }
0x20e4   :  { %4555 = vmatprep.subr.bf16.mxu0 %v5024_v0  ;;  %v4098_v0 = vld [vmem:[%s5917_s18 + $0x1] ss:$0 sm:$0xff] }
0x20e7   :  { %4556 = vmatpush3.bf16.msra.mxu0 %v4773_v19 }
0x215f   :  { %v3739_v46 = vpop.xlane.xlu0 %3738 }
0x2160   :  { %v3742_v47 = vmul.f32 0.0078125, %v3739_v46 }
0x2161   :  { %v3741_v16 = vpop.xlane.xlu1 %3740 }
0x2162   :  { %v3744_v38 = vsub.f32 %v3732_v42, %v3742_v47  ;;  %v3743_v48 = vmul.f32 0.0078125, %v3741_v16 }
0x2164   :  { %v3745_v49 = vsub.f32 %v3733_v44, %v3743_v48  ;;  %v3746_v62 = vmul.f32 %v3744_v38, %v3744_v38 }
0x2166   :  { %3748 = vadd.xlane.f32.xlu0 %v3746_v62  ;;  %v3747_v51 = vmul.f32 %v3745_v49, %v3745_v49 }
0x2168   :  { %3750 = vadd.xlane.f32.xlu1 %v3747_v51 }
0x21f3   :  { %v3749_v52 = vpop.xlane.xlu0 %3748 }
0x21f4   :  { %v3752_v7 = vmul.f32 0.0078125, %v3749_v52 }
0x21f5   :  { %v3751_v53 = vpop.xlane.xlu1 %3750 }
0x21f6   :  { %v3754_v13 = vadd.f32 1e-12, %v3752_v7  ;;  %v3753_v54 = vmul.f32 0.0078125, %v3751_v53 }
0x21f8   :  { %4870 = vrsqrt.f32 %v3754_v13  ;;  %v3755_v55 = vadd.f32 1e-12, %v3753_v54 }
0x21fa   :  { %4872 = vrsqrt.f32 %v3755_v55 }
0x2202   :  { %v4871_v56 = vpop.eup %4870 }
0x2203   :  { %v3758_v57 = vmul.f32 %v4871_v56, %v3744_v38 }
0x2204   :  { %v4873_v5 = vpop.eup %4872 }
0x2205   :  { %v3759_v58 = vmul.f32 %v4873_v5, %v3745_v49  ;;  %v3766_v59 = vmul.f32 %v4097_v9, %v3758_v57 }
0x2207   :  { %v3767_v61 = vmul.f32 %v4097_v9, %v3759_v58  ;;  %v3774_v60 = vadd.f32 %v4098_v0, %v3766_v59 }
0x2209   :  { %v3775_v26 = vadd.f32 %v4098_v0, %v3767_v61 }
0x220b   :  { %v3776_v17 = vpack.c.bf16 %v3775_v26, %v3774_v60 }
0x220d   :  { %4558 = vmatmul.mubr.bf16.vlgmr.msra.gmra.mrb[92].mxu0 %v3776_v17 }
0x22e0   :  { %v3882_v24 = vpop.f32.mrb[92].mxu0 }
0x22e1   :  { %v3883_v43 = vadd.f32 %v4099_v21, %v3882_v24  ;;  %v4559_v2 = vpop.f32.mrb[93].mxu0 }
0x22e2   :  { %v3885_v32 = vpop.f32.mrb[94].mxu0 }
0x22e3   :  { %3889 = vst [vmem:[%s5938_s7] sm:$0xff] %v3883_v43  ;;  %v3886_v33 = vadd.f32 %v4099_v21, %v3885_v32  ;;  %v4560_v3 = vpop.f32.mrb[95].mxu0 }
0x22e5   :  { %3890 = vst [vmem:[%s5938_s7 + $0x8] sm:$0xff] %v3886_v33 }
0x22e6   :  { %3895 = vsyncpa [#allocation5], 1 }
0x22e7   :  { %3896 = vsyncpa [#allocation7], 1 }
0x22e8   :  { %3897 = vsyncpa [#allocation10], 1 }
0x22e9   :  { %3898 = vsyncpa [#allocation13], 1 }

</bundles_post_ra>
